<compile_context>
chip_gen: v7x
topology: tpu7x:2x2x1
jax: 0.10.0
libtpu: 0.0.40
codegen_flags: <defaults>
</compile_context>

<pallas_src>
import jax
import jax.numpy as jnp
from jax import lax
from jax.experimental import pallas as pl
from jax.experimental.pallas import tpu as pltpu

# ----------------------------------------------------------------------------
# Graph metadata (matches the MetricalGNN example usage)
# ----------------------------------------------------------------------------

NODE_TYPES = ("note", "beat")
EDGE_TYPES = (
    ("note", "onset", "note"),
    ("note", "to", "beat"),
    ("beat", "to", "note"),
)

LANE = 128


def _round_up(x, m):
    return ((x + m - 1) // m) * m


def _pad2(x, rows, cols):
    x = jnp.asarray(x, jnp.float32)
    return jnp.pad(x, ((0, rows - x.shape[0]), (0, cols - x.shape[1])))


# ----------------------------------------------------------------------------
# Fused forward kernel (one grid step; everything resident in VMEM)
# ----------------------------------------------------------------------------


def make_fused_forward_kernel(treedef, *, n_note, n_beat, num_layers, hid,
                              n_edge_types, ln_eps=1e-5):
    """Kernel args: [h0, adj_0..adj_{E-1}, *param_leaves, out]."""

    def kernel(*refs):
        h_ref = refs[0]
        adj_refs = refs[1:1 + n_edge_types]
        leaf_refs = list(refs[1 + n_edge_types:-1])
        o_ref = refs[-1]
        params = jax.tree_util.tree_unflatten(treedef, leaf_refs)

        f32 = jnp.float32
        h = h_ref[...]                                     # [N_pad, C] f32
        n_pad, c_pad = h.shape

        row_ids = lax.broadcasted_iota(jnp.int32, (n_pad, c_pad), 0)
        col_ids = lax.broadcasted_iota(jnp.int32, (n_pad, c_pad), 1)
        is_note = row_ids < n_note                         # row -> node type
        hid_mask = (col_ids < hid).astype(f32)             # real hidden lanes

        adj = {et: adj_refs[i][...] for i, et in enumerate(EDGE_TYPES)}

        for l in range(num_layers):
            per_dst = {nt: [] for nt in NODE_TYPES}
            for et in EDGE_TYPES:
                dst_t = et[2]
                pp = params["convs"][l][et]
                # SAGEConv(project=True) on layer 0: src feats -> relu(proj(x))
                x_src = h
                if l == 0:
                    x_src = jnp.maximum(
                        jnp.dot(h, pp["proj_w_t"][...],
                                preferred_element_type=f32) + pp["proj_b"][...],
                        0.0)
                # mean aggregation of source messages (row-normalized dense A)
                m = jnp.dot(adj[et], x_src, preferred_element_type=f32)
                # out = lin_l(agg) + lin_r(x_dst)   (lin_r has no bias)
                y = (jnp.dot(m, pp["lin_l_w_t"][...], preferred_element_type=f32)
                     + jnp.dot(h, pp["lin_r_w_t"][...], preferred_element_type=f32)
                     + pp["lin_l_b"][...])
                if l == 0:
                    # F.normalize(y, p=2, dim=-1); clamp(norm, 1e-12) == clamp(ssq, 1e-24)
                    ssq = jnp.sum(y * y, axis=-1, keepdims=True)
                    y = y * lax.rsqrt(jnp.maximum(ssq, 1e-24))
                per_dst[dst_t].append(y)

            # HeteroConv aggr='mean' per destination node type.
            def _mean(lst):
                acc = lst[0]
                for extra in lst[1:]:
                    acc = acc + extra
                return acc * (1.0 / len(lst))

            note_out = _mean(per_dst["note"])
            beat_out = _mean(per_dst["beat"])
            h = jnp.where(is_note, note_out, beat_out)

            if l != num_layers - 1:
                ln = params["ln"][l]
                # relu -> LayerNorm (over the real hid channels only; padded
                # lanes have gamma = beta = 0 so they stay exactly zero).
                x = jnp.maximum(h, 0.0)
                mu = jnp.sum(x * hid_mask, axis=-1, keepdims=True) * (1.0 / hid)
                d = (x - mu) * hid_mask
                var = jnp.sum(d * d, axis=-1, keepdims=True) * (1.0 / hid)
                h = ((x - mu) * lax.rsqrt(var + ln_eps)
                     * ln["gamma"][...] + ln["beta"][...])
                # Dropout is identity in eval mode.

        # MLP head: Linear -> ReLU -> (BatchNorm folded into w2/b2) -> Linear.
        # Applied to every row; the wrapper keeps only the 'note' rows.
        mlp = params["mlp"]
        h1 = jnp.maximum(
            jnp.dot(h, mlp["w1_t"][...], preferred_element_type=f32) + mlp["b1"][...],
            0.0)
        o_ref[...] = (jnp.dot(h1, mlp["w2_t"][...], preferred_element_type=f32)
                      + mlp["b2"][...])

    return kernel


# ----------------------------------------------------------------------------
# Plain-JAX glue: adjacency build, parameter padding / BN folding, forward
# ----------------------------------------------------------------------------


def build_mean_adj_stacked(edge_index, src_offset, dst_offset, n_pad):
    """Row-normalized dense adjacency in the stacked node index space.

    A[d, s] = (#edges s->d) / deg(d), built via one-hot matmuls (no scatter).
    Isolated destination rows stay all-zero (deg clamped to 1), duplicate
    edges are counted like PyG mean aggregation.
    """
    src = edge_index[0].astype(jnp.int32) + src_offset
    dst = edge_index[1].astype(jnp.int32) + dst_offset
    oh_dst = jax.nn.one_hot(dst, n_pad, dtype=jnp.float32)      # [E, N_pad]
    oh_src = jax.nn.one_hot(src, n_pad, dtype=jnp.float32)      # [E, N_pad]
    counts = oh_dst.T @ oh_src                                   # [N_pad, N_pad]
    deg = jnp.sum(counts, axis=1, keepdims=True)
    return counts / jnp.maximum(deg, 1.0)


def init_params(key, in_ch, hid, out_ch, num_layers):
    def nxt():
        nonlocal key
        key, sub = jax.random.split(key)
        return sub

    params = {"convs": [], "ln": [], "mlp": {}}
    for l in range(num_layers):
        cin = in_ch if l == 0 else hid
        layer = {}
        for et in EDGE_TYPES:
            p = {}
            if l == 0:  # SAGEConv(project=True): proj Linear(in, in) + ReLU on src
                p["proj_w_t"] = jax.random.normal(nxt(), (cin, cin), jnp.float32) * 0.1
                p["proj_b"] = jax.random.normal(nxt(), (1, cin), jnp.float32) * 0.1
            p["lin_l_w_t"] = jax.random.normal(nxt(), (cin, hid), jnp.float32) * 0.1
            p["lin_l_b"] = jax.random.normal(nxt(), (1, hid), jnp.float32) * 0.1
            p["lin_r_w_t"] = jax.random.normal(nxt(), (cin, hid), jnp.float32) * 0.1
            layer[et] = p
        params["convs"].append(layer)
    for _ in range(num_layers - 1):
        params["ln"].append({"gamma": jnp.ones((1, hid), jnp.float32),
                             "beta": jnp.zeros((1, hid), jnp.float32)})
    params["mlp"] = {
        "w1_t": jax.random.normal(nxt(), (hid, hid), jnp.float32) * 0.1,
        "b1": jax.random.normal(nxt(), (1, hid), jnp.float32) * 0.1,
        "bn_gamma": jnp.ones((1, hid), jnp.float32),
        "bn_beta": jnp.zeros((1, hid), jnp.float32),
        "bn_rm": jnp.zeros((1, hid), jnp.float32),
        "bn_rv": jnp.ones((1, hid), jnp.float32),
        "w2_t": jax.random.normal(nxt(), (hid, out_ch), jnp.float32) * 0.1,
        "b2": jnp.zeros((1, out_ch), jnp.float32),
    }
    return params


def prepare_padded_params(params, c_pad):
    """Zero-pad all weights to lane-dense [*, c_pad] and fold eval-mode BN."""
    out = {"convs": [], "ln": [], "mlp": {}}
    for layer in params["convs"]:
        padded_layer = {}
        for et, p in layer.items():
            q = {}
            if "proj_w_t" in p:
                q["proj_w_t"] = _pad2(p["proj_w_t"], c_pad, c_pad)
                q["proj_b"] = _pad2(p["proj_b"], 1, c_pad)
            q["lin_l_w_t"] = _pad2(p["lin_l_w_t"], c_pad, c_pad)
            q["lin_l_b"] = _pad2(p["lin_l_b"], 1, c_pad)
            q["lin_r_w_t"] = _pad2(p["lin_r_w_t"], c_pad, c_pad)
            padded_layer[et] = q
        out["convs"].append(padded_layer)
    for ln in params["ln"]:
        out["ln"].append({"gamma": _pad2(ln["gamma"], 1, c_pad),
                          "beta": _pad2(ln["beta"], 1, c_pad)})
    mlp = params["mlp"]
    # Fold eval-mode BatchNorm1d (running stats) into the second linear:
    #   BN(h) @ W2 + b2 == h @ (scale * W2) + (shift @ W2 + b2)
    scale = mlp["bn_gamma"] * lax.rsqrt(mlp["bn_rv"] + 1e-5)            # [1, hid]
    shift = mlp["bn_beta"] - mlp["bn_rm"] * scale                        # [1, hid]
    w2_fold = scale.reshape(-1, 1) * mlp["w2_t"]                         # [hid, out]
    b2_fold = shift @ mlp["w2_t"] + mlp["b2"]                            # [1, out]
    out["mlp"] = {"w1_t": _pad2(mlp["w1_t"], c_pad, c_pad),
                  "b1": _pad2(mlp["b1"], 1, c_pad),
                  "w2_t": _pad2(w2_fold, c_pad, c_pad),
                  "b2": _pad2(b2_fold, 1, c_pad)}
    return out


def metrical_gnn_forward(params, x_dict, edge_index_dict, num_layers, hid, out_ch):
    n_note = x_dict["note"].shape[0]
    n_beat = x_dict["beat"].shape[0]
    n_total = n_note + n_beat
    n_pad = _round_up(max(n_total, 8), LANE)          # lane-dense adjacency rows/cols
    c_pad = _round_up(max(x_dict["note"].shape[1], x_dict["beat"].shape[1],
                          hid, out_ch), LANE)

    # Stacked, channel-padded node features: [note rows | beat rows | zero pad].
    h0 = jnp.zeros((n_pad, c_pad), jnp.float32)
    h0 = h0.at[:n_note, :x_dict["note"].shape[1]].set(x_dict["note"])
    h0 = h0.at[n_note:n_total, :x_dict["beat"].shape[1]].set(x_dict["beat"])

    offsets = {"note": 0, "beat": n_note}
    adjs = [build_mean_adj_stacked(edge_index_dict[et],
                                   offsets[et[0]], offsets[et[2]], n_pad)
            for et in EDGE_TYPES]

    padded = prepare_padded_params(params, c_pad)
    leaves, treedef = jax.tree_util.tree_flatten(padded)

    kernel = make_fused_forward_kernel(
        treedef, n_note=n_note, n_beat=n_beat, num_layers=num_layers,
        hid=hid, n_edge_types=len(EDGE_TYPES))

    args = [h0, *adjs, *leaves]          # all 2-D, lane-padded
    out_pad = pl.pallas_call(
        kernel,
        out_shape=jax.ShapeDtypeStruct((n_pad, c_pad), jnp.float32),
        grid=(1,),
        in_specs=[pl.BlockSpec(a.shape, lambda i: (0, 0)) for a in args],
        out_specs=pl.BlockSpec((n_pad, c_pad), lambda i: (0, 0)),
        compiler_params=pltpu.CompilerParams(
            dimension_semantics=("arbitrary",)),
    )(*args)

    return out_pad[:n_note, :out_ch]


# ----------------------------------------------------------------------------
# Main
# ----------------------------------------------------------------------------

if __name__ == "__main__":
    IN_CH, HID, OUT_CH, NUM_LAYERS = 8, 32, 4, 2
    N_NOTE, N_BEAT = 16, 8
    N_EDGE = {("note", "onset", "note"): 32,
              ("note", "to", "beat"): 24,
              ("beat", "to", "note"): 24}
    N_NODES = {"note": N_NOTE, "beat": N_BEAT}

    key = jax.random.PRNGKey(0)
    key, k_note, k_beat = jax.random.split(key, 3)
    x_dict = {
        "note": jax.random.normal(k_note, (N_NOTE, IN_CH), jnp.float32),
        "beat": jax.random.normal(k_beat, (N_BEAT, IN_CH), jnp.float32),
    }

    edge_index_dict = {}
    for et in EDGE_TYPES:
        key, ks, kd = jax.random.split(key, 3)
        e = N_EDGE[et]
        src = jax.random.randint(ks, (e,), 0, N_NODES[et[0]], jnp.int32)
        dst = jax.random.randint(kd, (e,), 0, N_NODES[et[2]], jnp.int32)
        edge_index_dict[et] = jnp.stack([src, dst], axis=0)

    key, kp = jax.random.split(key)
    params = init_params(kp, IN_CH, HID, OUT_CH, NUM_LAYERS)

    out = metrical_gnn_forward(params, x_dict, edge_index_dict,
                               NUM_LAYERS, HID, OUT_CH)
    out = jax.block_until_ready(out)
    assert out.shape == (N_NOTE, OUT_CH) and out.dtype == jnp.float32
    print("KERNEL_OK")
</pallas_src>

<mosaic_0001>
module attributes {stable_mosaic.version = 11 : i64} {
  func.func @kernel(%arg0: i32, %arg1: memref<128x128xf32, #tpu.memory_space<vmem>>, %arg2: memref<128x128xf32, #tpu.memory_space<vmem>>, %arg3: memref<128x128xf32, #tpu.memory_space<vmem>>, %arg4: memref<128x128xf32, #tpu.memory_space<vmem>>, %arg5: memref<1x128xf32, #tpu.memory_space<vmem>>, %arg6: memref<128x128xf32, #tpu.memory_space<vmem>>, %arg7: memref<128x128xf32, #tpu.memory_space<vmem>>, %arg8: memref<1x128xf32, #tpu.memory_space<vmem>>, %arg9: memref<128x128xf32, #tpu.memory_space<vmem>>, %arg10: memref<1x128xf32, #tpu.memory_space<vmem>>, %arg11: memref<128x128xf32, #tpu.memory_space<vmem>>, %arg12: memref<128x128xf32, #tpu.memory_space<vmem>>, %arg13: memref<1x128xf32, #tpu.memory_space<vmem>>, %arg14: memref<128x128xf32, #tpu.memory_space<vmem>>, %arg15: memref<1x128xf32, #tpu.memory_space<vmem>>, %arg16: memref<128x128xf32, #tpu.memory_space<vmem>>, %arg17: memref<128x128xf32, #tpu.memory_space<vmem>>, %arg18: memref<1x128xf32, #tpu.memory_space<vmem>>, %arg19: memref<128x128xf32, #tpu.memory_space<vmem>>, %arg20: memref<1x128xf32, #tpu.memory_space<vmem>>, %arg21: memref<128x128xf32, #tpu.memory_space<vmem>>, %arg22: memref<128x128xf32, #tpu.memory_space<vmem>>, %arg23: memref<1x128xf32, #tpu.memory_space<vmem>>, %arg24: memref<128x128xf32, #tpu.memory_space<vmem>>, %arg25: memref<128x128xf32, #tpu.memory_space<vmem>>, %arg26: memref<1x128xf32, #tpu.memory_space<vmem>>, %arg27: memref<128x128xf32, #tpu.memory_space<vmem>>, %arg28: memref<128x128xf32, #tpu.memory_space<vmem>>, %arg29: memref<1x128xf32, #tpu.memory_space<vmem>>, %arg30: memref<1x128xf32, #tpu.memory_space<vmem>>, %arg31: memref<1x128xf32, #tpu.memory_space<vmem>>, %arg32: memref<1x128xf32, #tpu.memory_space<vmem>>, %arg33: memref<128x128xf32, #tpu.memory_space<vmem>>, %arg34: memref<128x128xf32, #tpu.memory_space<vmem>>, %arg35: memref<128x128xf32, #tpu.memory_space<vmem>>) attributes {dimension_semantics = [#tpu.dimension_semantics<arbitrary>], iteration_bounds = array<i64: 1>, scalar_prefetch = 0 : i64, scratch_operands = 0 : i64, tpu.core_type = #tpu.core_type<tc>, window_params = [{pipeline_mode = #tpu.pipeline_mode<synchronous>, transform_indices = @transform_0, window_bounds = array<i64: 128, 128>}, {pipeline_mode = #tpu.pipeline_mode<synchronous>, transform_indices = @transform_1, window_bounds = array<i64: 128, 128>}, {pipeline_mode = #tpu.pipeline_mode<synchronous>, transform_indices = @transform_2, window_bounds = array<i64: 128, 128>}, {pipeline_mode = #tpu.pipeline_mode<synchronous>, transform_indices = @transform_3, window_bounds = array<i64: 128, 128>}, {pipeline_mode = #tpu.pipeline_mode<synchronous>, transform_indices = @transform_4, window_bounds = array<i64: 1, 128>}, {pipeline_mode = #tpu.pipeline_mode<synchronous>, transform_indices = @transform_5, window_bounds = array<i64: 128, 128>}, {pipeline_mode = #tpu.pipeline_mode<synchronous>, transform_indices = @transform_6, window_bounds = array<i64: 128, 128>}, {pipeline_mode = #tpu.pipeline_mode<synchronous>, transform_indices = @transform_7, window_bounds = array<i64: 1, 128>}, {pipeline_mode = #tpu.pipeline_mode<synchronous>, transform_indices = @transform_8, window_bounds = array<i64: 128, 128>}, {pipeline_mode = #tpu.pipeline_mode<synchronous>, transform_indices = @transform_9, window_bounds = array<i64: 1, 128>}, {pipeline_mode = #tpu.pipeline_mode<synchronous>, transform_indices = @transform_10, window_bounds = array<i64: 128, 128>}, {pipeline_mode = #tpu.pipeline_mode<synchronous>, transform_indices = @transform_11, window_bounds = array<i64: 128, 128>}, {pipeline_mode = #tpu.pipeline_mode<synchronous>, transform_indices = @transform_12, window_bounds = array<i64: 1, 128>}, {pipeline_mode = #tpu.pipeline_mode<synchronous>, transform_indices = @transform_13, window_bounds = array<i64: 128, 128>}, {pipeline_mode = #tpu.pipeline_mode<synchronous>, transform_indices = @transform_14, window_bounds = array<i64: 1, 128>}, {pipeline_mode = #tpu.pipeline_mode<synchronous>, transform_indices = @transform_15, window_bounds = array<i64: 128, 128>}, {pipeline_mode = #tpu.pipeline_mode<synchronous>, transform_indices = @transform_16, window_bounds = array<i64: 128, 128>}, {pipeline_mode = #tpu.pipeline_mode<synchronous>, transform_indices = @transform_17, window_bounds = array<i64: 1, 128>}, {pipeline_mode = #tpu.pipeline_mode<synchronous>, transform_indices = @transform_18, window_bounds = array<i64: 128, 128>}, {pipeline_mode = #tpu.pipeline_mode<synchronous>, transform_indices = @transform_19, window_bounds = array<i64: 1, 128>}, {pipeline_mode = #tpu.pipeline_mode<synchronous>, transform_indices = @transform_20, window_bounds = array<i64: 128, 128>}, {pipeline_mode = #tpu.pipeline_mode<synchronous>, transform_indices = @transform_21, window_bounds = array<i64: 128, 128>}, {pipeline_mode = #tpu.pipeline_mode<synchronous>, transform_indices = @transform_22, window_bounds = array<i64: 1, 128>}, {pipeline_mode = #tpu.pipeline_mode<synchronous>, transform_indices = @transform_23, window_bounds = array<i64: 128, 128>}, {pipeline_mode = #tpu.pipeline_mode<synchronous>, transform_indices = @transform_24, window_bounds = array<i64: 128, 128>}, {pipeline_mode = #tpu.pipeline_mode<synchronous>, transform_indices = @transform_25, window_bounds = array<i64: 1, 128>}, {pipeline_mode = #tpu.pipeline_mode<synchronous>, transform_indices = @transform_26, window_bounds = array<i64: 128, 128>}, {pipeline_mode = #tpu.pipeline_mode<synchronous>, transform_indices = @transform_27, window_bounds = array<i64: 128, 128>}, {pipeline_mode = #tpu.pipeline_mode<synchronous>, transform_indices = @transform_28, window_bounds = array<i64: 1, 128>}, {pipeline_mode = #tpu.pipeline_mode<synchronous>, transform_indices = @transform_29, window_bounds = array<i64: 1, 128>}, {pipeline_mode = #tpu.pipeline_mode<synchronous>, transform_indices = @transform_30, window_bounds = array<i64: 1, 128>}, {pipeline_mode = #tpu.pipeline_mode<synchronous>, transform_indices = @transform_31, window_bounds = array<i64: 1, 128>}, {pipeline_mode = #tpu.pipeline_mode<synchronous>, transform_indices = @transform_32, window_bounds = array<i64: 128, 128>}, {pipeline_mode = #tpu.pipeline_mode<synchronous>, transform_indices = @transform_33, window_bounds = array<i64: 128, 128>}, {pipeline_mode = #tpu.pipeline_mode<synchronous>, transform_indices = @transform_34, window_bounds = array<i64: 128, 128>}]} {
    %c0 = arith.constant 0 : index
    %c0_0 = arith.constant 0 : index
    %0 = vector.load %arg1[%c0, %c0_0] : memref<128x128xf32, #tpu.memory_space<vmem>>, vector<128x128xf32>
    %1 = tpu.iota {dimensions = array<i32: 0>} : vector<128x128xi32>
    %2 = tpu.iota {dimensions = array<i32: 1>} : vector<128x128xi32>
    %c16_i32 = arith.constant 16 : i32
    %3 = vector.broadcast %c16_i32 : i32 to vector<128x128xi32>
    %4 = arith.cmpi slt, %1, %3 : vector<128x128xi32>
    %c32_i32 = arith.constant 32 : i32
    %5 = vector.broadcast %c32_i32 : i32 to vector<128x128xi32>
    %6 = arith.cmpi slt, %2, %5 : vector<128x128xi32>
    %7 = arith.extui %6 : vector<128x128xi1> to vector<128x128xi32>
    %8 = arith.sitofp %7 : vector<128x128xi32> to vector<128x128xf32>
    %c0_1 = arith.constant 0 : index
    %c0_2 = arith.constant 0 : index
    %9 = vector.load %arg2[%c0_1, %c0_2] : memref<128x128xf32, #tpu.memory_space<vmem>>, vector<128x128xf32>
    %c0_3 = arith.constant 0 : index
    %c0_4 = arith.constant 0 : index
    %10 = vector.load %arg3[%c0_3, %c0_4] : memref<128x128xf32, #tpu.memory_space<vmem>>, vector<128x128xf32>
    %c0_5 = arith.constant 0 : index
    %c0_6 = arith.constant 0 : index
    %11 = vector.load %arg4[%c0_5, %c0_6] : memref<128x128xf32, #tpu.memory_space<vmem>>, vector<128x128xf32>
    %c0_7 = arith.constant 0 : index
    %c0_8 = arith.constant 0 : index
    %12 = vector.load %arg14[%c0_7, %c0_8] : memref<128x128xf32, #tpu.memory_space<vmem>>, vector<128x128xf32>
    %cst = arith.constant dense<0.000000e+00> : vector<128x128xf32>
    %13 = tpu.matmul %0, %12, %cst {dimension_numbers = #tpu.dot_dimension_numbers<[1], [0], [0], [1], [0, 0, 1, 1], [], []>} : vector<128x128xf32>, vector<128x128xf32>, vector<128x128xf32> -> vector<128x128xf32>
    %c0_9 = arith.constant 0 : index
    %c0_10 = arith.constant 0 : index
    %14 = vector.load %arg13[%c0_9, %c0_10] : memref<1x128xf32, #tpu.memory_space<vmem>>, vector<1x128xf32>
    %15 = vector.broadcast %14 : vector<1x128xf32> to vector<128x128xf32>
    %16 = arith.addf %13, %15 : vector<128x128xf32>
    %cst_11 = arith.constant 0.000000e+00 : f32
    %17 = vector.broadcast %cst_11 : f32 to vector<128x128xf32>
    %18 = arith.maximumf %16, %17 : vector<128x128xf32>
    %cst_12 = arith.constant dense<0.000000e+00> : vector<128x128xf32>
    %19 = tpu.matmul %9, %18, %cst_12 {dimension_numbers = #tpu.dot_dimension_numbers<[1], [0], [0], [1], [0, 0, 1, 1], [], []>} : vector<128x128xf32>, vector<128x128xf32>, vector<128x128xf32> -> vector<128x128xf32>
    %c0_13 = arith.constant 0 : index
    %c0_14 = arith.constant 0 : index
    %20 = vector.load %arg11[%c0_13, %c0_14] : memref<128x128xf32, #tpu.memory_space<vmem>>, vector<128x128xf32>
    %cst_15 = arith.constant dense<0.000000e+00> : vector<128x128xf32>
    %21 = tpu.matmul %19, %20, %cst_15 {dimension_numbers = #tpu.dot_dimension_numbers<[1], [0], [0], [1], [0, 0, 1, 1], [], []>} : vector<128x128xf32>, vector<128x128xf32>, vector<128x128xf32> -> vector<128x128xf32>
    %c0_16 = arith.constant 0 : index
    %c0_17 = arith.constant 0 : index
    %22 = vector.load %arg12[%c0_16, %c0_17] : memref<128x128xf32, #tpu.memory_space<vmem>>, vector<128x128xf32>
    %cst_18 = arith.constant dense<0.000000e+00> : vector<128x128xf32>
    %23 = tpu.matmul %0, %22, %cst_18 {dimension_numbers = #tpu.dot_dimension_numbers<[1], [0], [0], [1], [0, 0, 1, 1], [], []>} : vector<128x128xf32>, vector<128x128xf32>, vector<128x128xf32> -> vector<128x128xf32>
    %24 = arith.addf %21, %23 : vector<128x128xf32>
    %c0_19 = arith.constant 0 : index
    %c0_20 = arith.constant 0 : index
    %25 = vector.load %arg10[%c0_19, %c0_20] : memref<1x128xf32, #tpu.memory_space<vmem>>, vector<1x128xf32>
    %26 = vector.broadcast %25 : vector<1x128xf32> to vector<128x128xf32>
    %27 = arith.addf %24, %26 : vector<128x128xf32>
    %28 = arith.mulf %27, %27 : vector<128x128xf32>
    %cst_21 = arith.constant dense<0.000000e+00> : vector<128xf32>
    %29 = vector.multi_reduction <add>, %28, %cst_21 [1] : vector<128x128xf32> to vector<128xf32>
    %30 = vector.shape_cast %29 : vector<128xf32> to vector<128x1xf32>
    %cst_22 = arith.constant 1.000000e-24 : f32
    %31 = vector.broadcast %cst_22 : f32 to vector<128x1xf32>
    %32 = arith.maximumf %30, %31 : vector<128x1xf32>
    %33 = math.rsqrt %32 : vector<128x1xf32>
    %34 = vector.broadcast %33 : vector<128x1xf32> to vector<128x128xf32>
    %35 = arith.mulf %27, %34 : vector<128x128xf32>
    %c0_23 = arith.constant 0 : index
    %c0_24 = arith.constant 0 : index
    %36 = vector.load %arg19[%c0_23, %c0_24] : memref<128x128xf32, #tpu.memory_space<vmem>>, vector<128x128xf32>
    %cst_25 = arith.constant dense<0.000000e+00> : vector<128x128xf32>
    %37 = tpu.matmul %0, %36, %cst_25 {dimension_numbers = #tpu.dot_dimension_numbers<[1], [0], [0], [1], [0, 0, 1, 1], [], []>} : vector<128x128xf32>, vector<128x128xf32>, vector<128x128xf32> -> vector<128x128xf32>
    %c0_26 = arith.constant 0 : index
    %c0_27 = arith.constant 0 : index
    %38 = vector.load %arg18[%c0_26, %c0_27] : memref<1x128xf32, #tpu.memory_space<vmem>>, vector<1x128xf32>
    %39 = vector.broadcast %38 : vector<1x128xf32> to vector<128x128xf32>
    %40 = arith.addf %37, %39 : vector<128x128xf32>
    %cst_28 = arith.constant 0.000000e+00 : f32
    %41 = vector.broadcast %cst_28 : f32 to vector<128x128xf32>
    %42 = arith.maximumf %40, %41 : vector<128x128xf32>
    %cst_29 = arith.constant dense<0.000000e+00> : vector<128x128xf32>
    %43 = tpu.matmul %10, %42, %cst_29 {dimension_numbers = #tpu.dot_dimension_numbers<[1], [0], [0], [1], [0, 0, 1, 1], [], []>} : vector<128x128xf32>, vector<128x128xf32>, vector<128x128xf32> -> vector<128x128xf32>
    %c0_30 = arith.constant 0 : index
    %c0_31 = arith.constant 0 : index
    %44 = vector.load %arg16[%c0_30, %c0_31] : memref<128x128xf32, #tpu.memory_space<vmem>>, vector<128x128xf32>
    %cst_32 = arith.constant dense<0.000000e+00> : vector<128x128xf32>
    %45 = tpu.matmul %43, %44, %cst_32 {dimension_numbers = #tpu.dot_dimension_numbers<[1], [0], [0], [1], [0, 0, 1, 1], [], []>} : vector<128x128xf32>, vector<128x128xf32>, vector<128x128xf32> -> vector<128x128xf32>
    %c0_33 = arith.constant 0 : index
    %c0_34 = arith.constant 0 : index
    %46 = vector.load %arg17[%c0_33, %c0_34] : memref<128x128xf32, #tpu.memory_space<vmem>>, vector<128x128xf32>
    %cst_35 = arith.constant dense<0.000000e+00> : vector<128x128xf32>
    %47 = tpu.matmul %0, %46, %cst_35 {dimension_numbers = #tpu.dot_dimension_numbers<[1], [0], [0], [1], [0, 0, 1, 1], [], []>} : vector<128x128xf32>, vector<128x128xf32>, vector<128x128xf32> -> vector<128x128xf32>
    %48 = arith.addf %45, %47 : vector<128x128xf32>
    %c0_36 = arith.constant 0 : index
    %c0_37 = arith.constant 0 : index
    %49 = vector.load %arg15[%c0_36, %c0_37] : memref<1x128xf32, #tpu.memory_space<vmem>>, vector<1x128xf32>
    %50 = vector.broadcast %49 : vector<1x128xf32> to vector<128x128xf32>
    %51 = arith.addf %48, %50 : vector<128x128xf32>
    %52 = arith.mulf %51, %51 : vector<128x128xf32>
    %cst_38 = arith.constant dense<0.000000e+00> : vector<128xf32>
    %53 = vector.multi_reduction <add>, %52, %cst_38 [1] : vector<128x128xf32> to vector<128xf32>
    %54 = vector.shape_cast %53 : vector<128xf32> to vector<128x1xf32>
    %cst_39 = arith.constant 1.000000e-24 : f32
    %55 = vector.broadcast %cst_39 : f32 to vector<128x1xf32>
    %56 = arith.maximumf %54, %55 : vector<128x1xf32>
    %57 = math.rsqrt %56 : vector<128x1xf32>
    %58 = vector.broadcast %57 : vector<128x1xf32> to vector<128x128xf32>
    %59 = arith.mulf %51, %58 : vector<128x128xf32>
    %c0_40 = arith.constant 0 : index
    %c0_41 = arith.constant 0 : index
    %60 = vector.load %arg9[%c0_40, %c0_41] : memref<128x128xf32, #tpu.memory_space<vmem>>, vector<128x128xf32>
    %cst_42 = arith.constant dense<0.000000e+00> : vector<128x128xf32>
    %61 = tpu.matmul %0, %60, %cst_42 {dimension_numbers = #tpu.dot_dimension_numbers<[1], [0], [0], [1], [0, 0, 1, 1], [], []>} : vector<128x128xf32>, vector<128x128xf32>, vector<128x128xf32> -> vector<128x128xf32>
    %c0_43 = arith.constant 0 : index
    %c0_44 = arith.constant 0 : index
    %62 = vector.load %arg8[%c0_43, %c0_44] : memref<1x128xf32, #tpu.memory_space<vmem>>, vector<1x128xf32>
    %63 = vector.broadcast %62 : vector<1x128xf32> to vector<128x128xf32>
    %64 = arith.addf %61, %63 : vector<128x128xf32>
    %cst_45 = arith.constant 0.000000e+00 : f32
    %65 = vector.broadcast %cst_45 : f32 to vector<128x128xf32>
    %66 = arith.maximumf %64, %65 : vector<128x128xf32>
    %cst_46 = arith.constant dense<0.000000e+00> : vector<128x128xf32>
    %67 = tpu.matmul %11, %66, %cst_46 {dimension_numbers = #tpu.dot_dimension_numbers<[1], [0], [0], [1], [0, 0, 1, 1], [], []>} : vector<128x128xf32>, vector<128x128xf32>, vector<128x128xf32> -> vector<128x128xf32>
    %c0_47 = arith.constant 0 : index
    %c0_48 = arith.constant 0 : index
    %68 = vector.load %arg6[%c0_47, %c0_48] : memref<128x128xf32, #tpu.memory_space<vmem>>, vector<128x128xf32>
    %cst_49 = arith.constant dense<0.000000e+00> : vector<128x128xf32>
    %69 = tpu.matmul %67, %68, %cst_49 {dimension_numbers = #tpu.dot_dimension_numbers<[1], [0], [0], [1], [0, 0, 1, 1], [], []>} : vector<128x128xf32>, vector<128x128xf32>, vector<128x128xf32> -> vector<128x128xf32>
    %c0_50 = arith.constant 0 : index
    %c0_51 = arith.constant 0 : index
    %70 = vector.load %arg7[%c0_50, %c0_51] : memref<128x128xf32, #tpu.memory_space<vmem>>, vector<128x128xf32>
    %cst_52 = arith.constant dense<0.000000e+00> : vector<128x128xf32>
    %71 = tpu.matmul %0, %70, %cst_52 {dimension_numbers = #tpu.dot_dimension_numbers<[1], [0], [0], [1], [0, 0, 1, 1], [], []>} : vector<128x128xf32>, vector<128x128xf32>, vector<128x128xf32> -> vector<128x128xf32>
    %72 = arith.addf %69, %71 : vector<128x128xf32>
    %c0_53 = arith.constant 0 : index
    %c0_54 = arith.constant 0 : index
    %73 = vector.load %arg5[%c0_53, %c0_54] : memref<1x128xf32, #tpu.memory_space<vmem>>, vector<1x128xf32>
    %74 = vector.broadcast %73 : vector<1x128xf32> to vector<128x128xf32>
    %75 = arith.addf %72, %74 : vector<128x128xf32>
    %76 = arith.mulf %75, %75 : vector<128x128xf32>
    %cst_55 = arith.constant dense<0.000000e+00> : vector<128xf32>
    %77 = vector.multi_reduction <add>, %76, %cst_55 [1] : vector<128x128xf32> to vector<128xf32>
    %78 = vector.shape_cast %77 : vector<128xf32> to vector<128x1xf32>
    %cst_56 = arith.constant 1.000000e-24 : f32
    %79 = vector.broadcast %cst_56 : f32 to vector<128x1xf32>
    %80 = arith.maximumf %78, %79 : vector<128x1xf32>
    %81 = math.rsqrt %80 : vector<128x1xf32>
    %82 = vector.broadcast %81 : vector<128x1xf32> to vector<128x128xf32>
    %83 = arith.mulf %75, %82 : vector<128x128xf32>
    %84 = arith.addf %35, %83 : vector<128x128xf32>
    %cst_57 = arith.constant 5.000000e-01 : f32
    %85 = vector.broadcast %cst_57 : f32 to vector<128x128xf32>
    %86 = arith.mulf %84, %85 : vector<128x128xf32>
    %cst_58 = arith.constant 1.000000e+00 : f32
    %87 = vector.broadcast %cst_58 : f32 to vector<128x128xf32>
    %88 = arith.mulf %59, %87 : vector<128x128xf32>
    %89 = arith.select %4, %86, %88 : vector<128x128xi1>, vector<128x128xf32>
    %cst_59 = arith.constant 0.000000e+00 : f32
    %90 = vector.broadcast %cst_59 : f32 to vector<128x128xf32>
    %91 = arith.maximumf %89, %90 : vector<128x128xf32>
    %92 = arith.mulf %91, %8 : vector<128x128xf32>
    %cst_60 = arith.constant dense<0.000000e+00> : vector<128xf32>
    %93 = vector.multi_reduction <add>, %92, %cst_60 [1] : vector<128x128xf32> to vector<128xf32>
    %94 = vector.shape_cast %93 : vector<128xf32> to vector<128x1xf32>
    %cst_61 = arith.constant 3.125000e-02 : f32
    %95 = vector.broadcast %cst_61 : f32 to vector<128x1xf32>
    %96 = arith.mulf %94, %95 : vector<128x1xf32>
    %97 = vector.broadcast %96 : vector<128x1xf32> to vector<128x128xf32>
    %98 = arith.subf %91, %97 : vector<128x128xf32>
    %99 = arith.mulf %98, %8 : vector<128x128xf32>
    %100 = arith.mulf %99, %99 : vector<128x128xf32>
    %cst_62 = arith.constant dense<0.000000e+00> : vector<128xf32>
    %101 = vector.multi_reduction <add>, %100, %cst_62 [1] : vector<128x128xf32> to vector<128xf32>
    %102 = vector.shape_cast %101 : vector<128xf32> to vector<128x1xf32>
    %cst_63 = arith.constant 3.125000e-02 : f32
    %103 = vector.broadcast %cst_63 : f32 to vector<128x1xf32>
    %104 = arith.mulf %102, %103 : vector<128x1xf32>
    %105 = vector.broadcast %96 : vector<128x1xf32> to vector<128x128xf32>
    %106 = arith.subf %91, %105 : vector<128x128xf32>
    %cst_64 = arith.constant 9.99999974E-6 : f32
    %107 = vector.broadcast %cst_64 : f32 to vector<128x1xf32>
    %108 = arith.addf %104, %107 : vector<128x1xf32>
    %109 = math.rsqrt %108 : vector<128x1xf32>
    %110 = vector.broadcast %109 : vector<128x1xf32> to vector<128x128xf32>
    %111 = arith.mulf %106, %110 : vector<128x128xf32>
    %c0_65 = arith.constant 0 : index
    %c0_66 = arith.constant 0 : index
    %112 = vector.load %arg30[%c0_65, %c0_66] : memref<1x128xf32, #tpu.memory_space<vmem>>, vector<1x128xf32>
    %113 = vector.broadcast %112 : vector<1x128xf32> to vector<128x128xf32>
    %114 = arith.mulf %111, %113 : vector<128x128xf32>
    %c0_67 = arith.constant 0 : index
    %c0_68 = arith.constant 0 : index
    %115 = vector.load %arg29[%c0_67, %c0_68] : memref<1x128xf32, #tpu.memory_space<vmem>>, vector<1x128xf32>
    %116 = vector.broadcast %115 : vector<1x128xf32> to vector<128x128xf32>
    %117 = arith.addf %114, %116 : vector<128x128xf32>
    %cst_69 = arith.constant dense<0.000000e+00> : vector<128x128xf32>
    %118 = tpu.matmul %9, %117, %cst_69 {dimension_numbers = #tpu.dot_dimension_numbers<[1], [0], [0], [1], [0, 0, 1, 1], [], []>} : vector<128x128xf32>, vector<128x128xf32>, vector<128x128xf32> -> vector<128x128xf32>
    %c0_70 = arith.constant 0 : index
    %c0_71 = arith.constant 0 : index
    %119 = vector.load %arg24[%c0_70, %c0_71] : memref<128x128xf32, #tpu.memory_space<vmem>>, vector<128x128xf32>
    %cst_72 = arith.constant dense<0.000000e+00> : vector<128x128xf32>
    %120 = tpu.matmul %118, %119, %cst_72 {dimension_numbers = #tpu.dot_dimension_numbers<[1], [0], [0], [1], [0, 0, 1, 1], [], []>} : vector<128x128xf32>, vector<128x128xf32>, vector<128x128xf32> -> vector<128x128xf32>
    %c0_73 = arith.constant 0 : index
    %c0_74 = arith.constant 0 : index
    %121 = vector.load %arg25[%c0_73, %c0_74] : memref<128x128xf32, #tpu.memory_space<vmem>>, vector<128x128xf32>
    %cst_75 = arith.constant dense<0.000000e+00> : vector<128x128xf32>
    %122 = tpu.matmul %117, %121, %cst_75 {dimension_numbers = #tpu.dot_dimension_numbers<[1], [0], [0], [1], [0, 0, 1, 1], [], []>} : vector<128x128xf32>, vector<128x128xf32>, vector<128x128xf32> -> vector<128x128xf32>
    %123 = arith.addf %120, %122 : vector<128x128xf32>
    %c0_76 = arith.constant 0 : index
    %c0_77 = arith.constant 0 : index
    %124 = vector.load %arg23[%c0_76, %c0_77] : memref<1x128xf32, #tpu.memory_space<vmem>>, vector<1x128xf32>
    %125 = vector.broadcast %124 : vector<1x128xf32> to vector<128x128xf32>
    %126 = arith.addf %123, %125 : vector<128x128xf32>
    %cst_78 = arith.constant dense<0.000000e+00> : vector<128x128xf32>
    %127 = tpu.matmul %10, %117, %cst_78 {dimension_numbers = #tpu.dot_dimension_numbers<[1], [0], [0], [1], [0, 0, 1, 1], [], []>} : vector<128x128xf32>, vector<128x128xf32>, vector<128x128xf32> -> vector<128x128xf32>
    %c0_79 = arith.constant 0 : index
    %c0_80 = arith.constant 0 : index
    %128 = vector.load %arg27[%c0_79, %c0_80] : memref<128x128xf32, #tpu.memory_space<vmem>>, vector<128x128xf32>
    %cst_81 = arith.constant dense<0.000000e+00> : vector<128x128xf32>
    %129 = tpu.matmul %127, %128, %cst_81 {dimension_numbers = #tpu.dot_dimension_numbers<[1], [0], [0], [1], [0, 0, 1, 1], [], []>} : vector<128x128xf32>, vector<128x128xf32>, vector<128x128xf32> -> vector<128x128xf32>
    %c0_82 = arith.constant 0 : index
    %c0_83 = arith.constant 0 : index
    %130 = vector.load %arg28[%c0_82, %c0_83] : memref<128x128xf32, #tpu.memory_space<vmem>>, vector<128x128xf32>
    %cst_84 = arith.constant dense<0.000000e+00> : vector<128x128xf32>
    %131 = tpu.matmul %117, %130, %cst_84 {dimension_numbers = #tpu.dot_dimension_numbers<[1], [0], [0], [1], [0, 0, 1, 1], [], []>} : vector<128x128xf32>, vector<128x128xf32>, vector<128x128xf32> -> vector<128x128xf32>
    %132 = arith.addf %129, %131 : vector<128x128xf32>
    %c0_85 = arith.constant 0 : index
    %c0_86 = arith.constant 0 : index
    %133 = vector.load %arg26[%c0_85, %c0_86] : memref<1x128xf32, #tpu.memory_space<vmem>>, vector<1x128xf32>
    %134 = vector.broadcast %133 : vector<1x128xf32> to vector<128x128xf32>
    %135 = arith.addf %132, %134 : vector<128x128xf32>
    %cst_87 = arith.constant dense<0.000000e+00> : vector<128x128xf32>
    %136 = tpu.matmul %11, %117, %cst_87 {dimension_numbers = #tpu.dot_dimension_numbers<[1], [0], [0], [1], [0, 0, 1, 1], [], []>} : vector<128x128xf32>, vector<128x128xf32>, vector<128x128xf32> -> vector<128x128xf32>
    %c0_88 = arith.constant 0 : index
    %c0_89 = arith.constant 0 : index
    %137 = vector.load %arg21[%c0_88, %c0_89] : memref<128x128xf32, #tpu.memory_space<vmem>>, vector<128x128xf32>
    %cst_90 = arith.constant dense<0.000000e+00> : vector<128x128xf32>
    %138 = tpu.matmul %136, %137, %cst_90 {dimension_numbers = #tpu.dot_dimension_numbers<[1], [0], [0], [1], [0, 0, 1, 1], [], []>} : vector<128x128xf32>, vector<128x128xf32>, vector<128x128xf32> -> vector<128x128xf32>
    %c0_91 = arith.constant 0 : index
    %c0_92 = arith.constant 0 : index
    %139 = vector.load %arg22[%c0_91, %c0_92] : memref<128x128xf32, #tpu.memory_space<vmem>>, vector<128x128xf32>
    %cst_93 = arith.constant dense<0.000000e+00> : vector<128x128xf32>
    %140 = tpu.matmul %117, %139, %cst_93 {dimension_numbers = #tpu.dot_dimension_numbers<[1], [0], [0], [1], [0, 0, 1, 1], [], []>} : vector<128x128xf32>, vector<128x128xf32>, vector<128x128xf32> -> vector<128x128xf32>
    %141 = arith.addf %138, %140 : vector<128x128xf32>
    %c0_94 = arith.constant 0 : index
    %c0_95 = arith.constant 0 : index
    %142 = vector.load %arg20[%c0_94, %c0_95] : memref<1x128xf32, #tpu.memory_space<vmem>>, vector<1x128xf32>
    %143 = vector.broadcast %142 : vector<1x128xf32> to vector<128x128xf32>
    %144 = arith.addf %141, %143 : vector<128x128xf32>
    %145 = arith.addf %126, %144 : vector<128x128xf32>
    %cst_96 = arith.constant 5.000000e-01 : f32
    %146 = vector.broadcast %cst_96 : f32 to vector<128x128xf32>
    %147 = arith.mulf %145, %146 : vector<128x128xf32>
    %cst_97 = arith.constant 1.000000e+00 : f32
    %148 = vector.broadcast %cst_97 : f32 to vector<128x128xf32>
    %149 = arith.mulf %135, %148 : vector<128x128xf32>
    %150 = arith.select %4, %147, %149 : vector<128x128xi1>, vector<128x128xf32>
    %c0_98 = arith.constant 0 : index
    %c0_99 = arith.constant 0 : index
    %151 = vector.load %arg33[%c0_98, %c0_99] : memref<128x128xf32, #tpu.memory_space<vmem>>, vector<128x128xf32>
    %cst_100 = arith.constant dense<0.000000e+00> : vector<128x128xf32>
    %152 = tpu.matmul %150, %151, %cst_100 {dimension_numbers = #tpu.dot_dimension_numbers<[1], [0], [0], [1], [0, 0, 1, 1], [], []>} : vector<128x128xf32>, vector<128x128xf32>, vector<128x128xf32> -> vector<128x128xf32>
    %c0_101 = arith.constant 0 : index
    %c0_102 = arith.constant 0 : index
    %153 = vector.load %arg31[%c0_101, %c0_102] : memref<1x128xf32, #tpu.memory_space<vmem>>, vector<1x128xf32>
    %154 = vector.broadcast %153 : vector<1x128xf32> to vector<128x128xf32>
    %155 = arith.addf %152, %154 : vector<128x128xf32>
    %cst_103 = arith.constant 0.000000e+00 : f32
    %156 = vector.broadcast %cst_103 : f32 to vector<128x128xf32>
    %157 = arith.maximumf %155, %156 : vector<128x128xf32>
    %c0_104 = arith.constant 0 : index
    %c0_105 = arith.constant 0 : index
    %158 = vector.load %arg34[%c0_104, %c0_105] : memref<128x128xf32, #tpu.memory_space<vmem>>, vector<128x128xf32>
    %cst_106 = arith.constant dense<0.000000e+00> : vector<128x128xf32>
    %159 = tpu.matmul %157, %158, %cst_106 {dimension_numbers = #tpu.dot_dimension_numbers<[1], [0], [0], [1], [0, 0, 1, 1], [], []>} : vector<128x128xf32>, vector<128x128xf32>, vector<128x128xf32> -> vector<128x128xf32>
    %c0_107 = arith.constant 0 : index
    %c0_108 = arith.constant 0 : index
    %160 = vector.load %arg32[%c0_107, %c0_108] : memref<1x128xf32, #tpu.memory_space<vmem>>, vector<1x128xf32>
    %161 = vector.broadcast %160 : vector<1x128xf32> to vector<128x128xf32>
    %162 = arith.addf %159, %161 : vector<128x128xf32>
    %c0_109 = arith.constant 0 : index
    %c0_110 = arith.constant 0 : index
    %163 = vector.load %arg35[%c0_109, %c0_110] : memref<128x128xf32, #tpu.memory_space<vmem>>, vector<128x128xf32>
    tpu.vector_store %arg35[%c0_109, %c0_110], %162 {strides = array<i32>} : memref<128x128xf32, #tpu.memory_space<vmem>>, vector<128x128xf32>,
    return
  }
  func.func @transform_0(%arg0: i32) -> (i32, i32) {
    %c0_i32 = arith.constant 0 : i32
    %c0_i32_0 = arith.constant 0 : i32
    %c0_i32_1 = arith.constant 0 : i32
    return %c0_i32, %c0_i32_0 : i32, i32
  }
  func.func @transform_1(%arg0: i32) -> (i32, i32) {
    %c0_i32 = arith.constant 0 : i32
    %c0_i32_0 = arith.constant 0 : i32
    %c0_i32_1 = arith.constant 0 : i32
    return %c0_i32, %c0_i32_0 : i32, i32
  }
  func.func @transform_2(%arg0: i32) -> (i32, i32) {
    %c0_i32 = arith.constant 0 : i32
    %c0_i32_0 = arith.constant 0 : i32
    %c0_i32_1 = arith.constant 0 : i32
    return %c0_i32, %c0_i32_0 : i32, i32
  }
  func.func @transform_3(%arg0: i32) -> (i32, i32) {
    %c0_i32 = arith.constant 0 : i32
    %c0_i32_0 = arith.constant 0 : i32
    %c0_i32_1 = arith.constant 0 : i32
    return %c0_i32, %c0_i32_0 : i32, i32
  }
  func.func @transform_4(%arg0: i32) -> (i32, i32) {
    %c0_i32 = arith.constant 0 : i32
    %c0_i32_0 = arith.constant 0 : i32
    %c0_i32_1 = arith.constant 0 : i32
    return %c0_i32, %c0_i32_0 : i32, i32
  }
  func.func @transform_5(%arg0: i32) -> (i32, i32) {
    %c0_i32 = arith.constant 0 : i32
    %c0_i32_0 = arith.constant 0 : i32
    %c0_i32_1 = arith.constant 0 : i32
    return %c0_i32, %c0_i32_0 : i32, i32
  }
  func.func @transform_6(%arg0: i32) -> (i32, i32) {
    %c0_i32 = arith.constant 0 : i32
    %c0_i32_0 = arith.constant 0 : i32
    %c0_i32_1 = arith.constant 0 : i32
    return %c0_i32, %c0_i32_0 : i32, i32
  }
  func.func @transform_7(%arg0: i32) -> (i32, i32) {
    %c0_i32 = arith.constant 0 : i32
    %c0_i32_0 = arith.constant 0 : i32
    %c0_i32_1 = arith.constant 0 : i32
    return %c0_i32, %c0_i32_0 : i32, i32
  }
  func.func @transform_8(%arg0: i32) -> (i32, i32) {
    %c0_i32 = arith.constant 0 : i32
    %c0_i32_0 = arith.constant 0 : i32
    %c0_i32_1 = arith.constant 0 : i32
    return %c0_i32, %c0_i32_0 : i32, i32
  }
  func.func @transform_9(%arg0: i32) -> (i32, i32) {
    %c0_i32 = arith.constant 0 : i32
    %c0_i32_0 = arith.constant 0 : i32
    %c0_i32_1 = arith.constant 0 : i32
    return %c0_i32, %c0_i32_0 : i32, i32
  }
  func.func @transform_10(%arg0: i32) -> (i32, i32) {
    %c0_i32 = arith.constant 0 : i32
    %c0_i32_0 = arith.constant 0 : i32
    %c0_i32_1 = arith.constant 0 : i32
    return %c0_i32, %c0_i32_0 : i32, i32
  }
  func.func @transform_11(%arg0: i32) -> (i32, i32) {
    %c0_i32 = arith.constant 0 : i32
    %c0_i32_0 = arith.constant 0 : i32
    %c0_i32_1 = arith.constant 0 : i32
    return %c0_i32, %c0_i32_0 : i32, i32
  }
  func.func @transform_12(%arg0: i32) -> (i32, i32) {
    %c0_i32 = arith.constant 0 : i32
    %c0_i32_0 = arith.constant 0 : i32
    %c0_i32_1 = arith.constant 0 : i32
    return %c0_i32, %c0_i32_0 : i32, i32
  }
  func.func @transform_13(%arg0: i32) -> (i32, i32) {
    %c0_i32 = arith.constant 0 : i32
    %c0_i32_0 = arith.constant 0 : i32
    %c0_i32_1 = arith.constant 0 : i32
    return %c0_i32, %c0_i32_0 : i32, i32
  }
  func.func @transform_14(%arg0: i32) -> (i32, i32) {
    %c0_i32 = arith.constant 0 : i32
    %c0_i32_0 = arith.constant 0 : i32
    %c0_i32_1 = arith.constant 0 : i32
    return %c0_i32, %c0_i32_0 : i32, i32
  }
  func.func @transform_15(%arg0: i32) -> (i32, i32) {
    %c0_i32 = arith.constant 0 : i32
    %c0_i32_0 = arith.constant 0 : i32
    %c0_i32_1 = arith.constant 0 : i32
    return %c0_i32, %c0_i32_0 : i32, i32
  }
  func.func @transform_16(%arg0: i32) -> (i32, i32) {
    %c0_i32 = arith.constant 0 : i32
    %c0_i32_0 = arith.constant 0 : i32
    %c0_i32_1 = arith.constant 0 : i32
    return %c0_i32, %c0_i32_0 : i32, i32
  }
  func.func @transform_17(%arg0: i32) -> (i32, i32) {
    %c0_i32 = arith.constant 0 : i32
    %c0_i32_0 = arith.constant 0 : i32
    %c0_i32_1 = arith.constant 0 : i32
    return %c0_i32, %c0_i32_0 : i32, i32
  }
  func.func @transform_18(%arg0: i32) -> (i32, i32) {
    %c0_i32 = arith.constant 0 : i32
    %c0_i32_0 = arith.constant 0 : i32
    %c0_i32_1 = arith.constant 0 : i32
    return %c0_i32, %c0_i32_0 : i32, i32
  }
  func.func @transform_19(%arg0: i32) -> (i32, i32) {
    %c0_i32 = arith.constant 0 : i32
    %c0_i32_0 = arith.constant 0 : i32
    %c0_i32_1 = arith.constant 0 : i32
    return %c0_i32, %c0_i32_0 : i32, i32
  }
  func.func @transform_20(%arg0: i32) -> (i32, i32) {
    %c0_i32 = arith.constant 0 : i32
    %c0_i32_0 = arith.constant 0 : i32
    %c0_i32_1 = arith.constant 0 : i32
    return %c0_i32, %c0_i32_0 : i32, i32
  }
  func.func @transform_21(%arg0: i32) -> (i32, i32) {
    %c0_i32 = arith.constant 0 : i32
    %c0_i32_0 = arith.constant 0 : i32
    %c0_i32_1 = arith.constant 0 : i32
    return %c0_i32, %c0_i32_0 : i32, i32
  }
  func.func @transform_22(%arg0: i32) -> (i32, i32) {
    %c0_i32 = arith.constant 0 : i32
    %c0_i32_0 = arith.constant 0 : i32
    %c0_i32_1 = arith.constant 0 : i32
    return %c0_i32, %c0_i32_0 : i32, i32
  }
  func.func @transform_23(%arg0: i32) -> (i32, i32) {
    %c0_i32 = arith.constant 0 : i32
    %c0_i32_0 = arith.constant 0 : i32
    %c0_i32_1 = arith.constant 0 : i32
    return %c0_i32, %c0_i32_0 : i32, i32
  }
  func.func @transform_24(%arg0: i32) -> (i32, i32) {
    %c0_i32 = arith.constant 0 : i32
    %c0_i32_0 = arith.constant 0 : i32
    %c0_i32_1 = arith.constant 0 : i32
    return %c0_i32, %c0_i32_0 : i32, i32
  }
  func.func @transform_25(%arg0: i32) -> (i32, i32) {
    %c0_i32 = arith.constant 0 : i32
    %c0_i32_0 = arith.constant 0 : i32
    %c0_i32_1 = arith.constant 0 : i32
    return %c0_i32, %c0_i32_0 : i32, i32
  }
  func.func @transform_26(%arg0: i32) -> (i32, i32) {
    %c0_i32 = arith.constant 0 : i32
    %c0_i32_0 = arith.constant 0 : i32
    %c0_i32_1 = arith.constant 0 : i32
    return %c0_i32, %c0_i32_0 : i32, i32
  }
  func.func @transform_27(%arg0: i32) -> (i32, i32) {
    %c0_i32 = arith.constant 0 : i32
    %c0_i32_0 = arith.constant 0 : i32
    %c0_i32_1 = arith.constant 0 : i32
    return %c0_i32, %c0_i32_0 : i32, i32
  }
  func.func @transform_28(%arg0: i32) -> (i32, i32) {
    %c0_i32 = arith.constant 0 : i32
    %c0_i32_0 = arith.constant 0 : i32
    %c0_i32_1 = arith.constant 0 : i32
    return %c0_i32, %c0_i32_0 : i32, i32
  }
  func.func @transform_29(%arg0: i32) -> (i32, i32) {
    %c0_i32 = arith.constant 0 : i32
    %c0_i32_0 = arith.constant 0 : i32
    %c0_i32_1 = arith.constant 0 : i32
    return %c0_i32, %c0_i32_0 : i32, i32
  }
  func.func @transform_30(%arg0: i32) -> (i32, i32) {
    %c0_i32 = arith.constant 0 : i32
    %c0_i32_0 = arith.constant 0 : i32
    %c0_i32_1 = arith.constant 0 : i32
    return %c0_i32, %c0_i32_0 : i32, i32
  }
  func.func @transform_31(%arg0: i32) -> (i32, i32) {
    %c0_i32 = arith.constant 0 : i32
    %c0_i32_0 = arith.constant 0 : i32
    %c0_i32_1 = arith.constant 0 : i32
    return %c0_i32, %c0_i32_0 : i32, i32
  }
  func.func @transform_32(%arg0: i32) -> (i32, i32) {
    %c0_i32 = arith.constant 0 : i32
    %c0_i32_0 = arith.constant 0 : i32
    %c0_i32_1 = arith.constant 0 : i32
    return %c0_i32, %c0_i32_0 : i32, i32
  }
  func.func @transform_33(%arg0: i32) -> (i32, i32) {
    %c0_i32 = arith.constant 0 : i32
    %c0_i32_0 = arith.constant 0 : i32
    %c0_i32_1 = arith.constant 0 : i32
    return %c0_i32, %c0_i32_0 : i32, i32
  }
  func.func @transform_34(%arg0: i32) -> (i32, i32) {
    %c0_i32 = arith.constant 0 : i32
    %c0_i32_0 = arith.constant 0 : i32
    %c0_i32_1 = arith.constant 0 : i32
    return %c0_i32, %c0_i32_0 : i32, i32
  }
}

</mosaic_0001>

<bundles_post_ra>
// kernel: tpu_custom_call.1
= control target key start
LH: loop header
LB: loop body
LE: loop exit
PB: predicated region body
PF: predicated region fallthrough
CT: control target
= control target key end

     0   :  { %s8635_s6 = smov 1   ;;  %s8636_s10 = smov 2   ;;  %s9881_s0 = inlined_call_operand.smem [shape: u32[35], index: -1, kind: input, shape index: {}] }
   0x1   :  { %s8702_s5 = sld [smem:[%s9881_s0]]   ;;  %s8637_s14 = smov 3  }
   0x2   :  { %s8707_s9 = sld [smem:[%s9881_s0 + %s8635_s6]]   ;;  %s8638_s18 = smov 4  }
   0x3   :  { %s8712_s13 = sld [smem:[%s9881_s0 + %s8636_s10]]   ;;  %s8639_s22 = smov 5  }
   0x4   :  { %s8717_s17 = sld [smem:[%s9881_s0 + %s8637_s14]]   ;;  %s8640_s26 = smov 6  }
   0x5   :  { %s8722_s21 = sld [smem:[%s9881_s0 + %s8638_s18]]   ;;  %s8641_s30 = smov 7  }
   0x6   :  { %s8727_s25 = sld [smem:[%s9881_s0 + %s8639_s22]]   ;;  %s8642_s4 = smov 8  }
   0x7   :  { %s8732_s29 = sld [smem:[%s9881_s0 + %s8640_s26]]   ;;  %s8643_s10 = smov 9  }
   0x8   :  { %s8737_s3 = sld [smem:[%s9881_s0 + %s8641_s30]]   ;;  %s8644_s15 = smov 10  }
   0x9   :  { %s8742_s8 = sld [smem:[%s9881_s0 + %s8642_s4]]   ;;  %s8645_s20 = smov 11  }
   0xa   :  { %s8747_s14 = sld [smem:[%s9881_s0 + %s8643_s10]]   ;;  %s8646_s26 = smov 12  }
   0xb   :  { %9887 = sst [smem:[#allocation48_spill]] %s8722_s21  ;;  %s8647_s1 = smov 13  }
   0xc   :  { %s8752_s19 = sld [smem:[%s9881_s0 + %s8644_s15]]   ;;  %s8648_s7 = smov 14  }
   0xd   :  { %s8757_s24 = sld [smem:[%s9881_s0 + %s8645_s20]]   ;;  %s8649_s15 = smov 15  }
   0xe   :  { %9888 = sst [smem:[#allocation49_spill]] %s8737_s3  ;;  %s8650_s22 = smov 16  }
   0xf   :  { %s8762_s30 = sld [smem:[%s9881_s0 + %s8646_s26]]   ;;  %s8651_s28 = smov 17  }
  0x10   :  { %9889 = sst [smem:[#allocation50_spill]] %s8747_s14 }
  0x11   :  { %s8767_s6 = sld [smem:[%s9881_s0 + %s8647_s1]]  }
  0x12   :  { %s8772_s12 = sld [smem:[%s9881_s0 + %s8648_s7]]   ;;  %s8652_s7 = smov 18  }
  0x13   :  { %s8777_s20 = sld [smem:[%s9881_s0 + %s8649_s15]]   ;;  %s8653_s15 = smov 19  }
  0x14   :  { %s8782_s27 = sld [smem:[%s9881_s0 + %s8650_s22]]   ;;  %s8654_s22 = smov 20  }
  0x15   :  { %9890 = sst [smem:[#allocation51_spill]] %s8762_s30 }
  0x16   :  { %s8787_s4 = sld [smem:[%s9881_s0 + %s8651_s28]]   ;;  %s8655_s28 = smov 21  }
  0x17   :  { %s8792_s21 = sld [smem:[%s9881_s0 + %s8652_s7]]   ;;  %s8656_s7 = smov 22  }
  0x18   :  { %9891 = sst [smem:[#allocation52_spill]] %s8772_s12 }
  0x19   :  { %9892 = sst [smem:[#allocation53_spill]] %s8777_s20 }
  0x1a   :  { %s8797_s12 = sld [smem:[%s9881_s0 + %s8653_s15]]   ;;  %s8657_s15 = smov 23  }
  0x1b   :  { %s8802_s3 = sld [smem:[%s9881_s0 + %s8654_s22]]   ;;  %s8658_s22 = smov 24  }
  0x1c   :  { %9893 = sst [smem:[#allocation54_spill]] %s8787_s4 }
  0x1d   :  { %9894 = sst [smem:[#allocation55_spill]] %s8792_s21 }
  0x1e   :  { %s8807_s14 = sld [smem:[%s9881_s0 + %s8655_s28]]   ;;  %s8659_s28 = smov 25  }
  0x1f   :  { %s8812_s4 = sld [smem:[%s9881_s0 + %s8656_s7]]   ;;  %s8660_s7 = smov 26  }
  0x20   :  { %9895 = sst [smem:[#allocation56_spill]] %s8797_s12 }
  0x21   :  { %s8817_s12 = sld [smem:[%s9881_s0 + %s8657_s15]]   ;;  %s8661_s15 = smov 27  }
  0x22   :  { %s8822_s30 = sld [smem:[%s9881_s0 + %s8658_s22]]   ;;  %s8662_s22 = smov 28  }
  0x23   :  { %s8837_s21 = sld [smem:[%s9881_s0 + %s8661_s15]]   ;;  %s8665_s15 = smov 31  }
  0x24   :  { %9896 = sst [smem:[#allocation57_spill]] %s8807_s14 }
  0x25   :  { %9897 = sst [smem:[#allocation58_spill]] %s8812_s4 }
  0x26   :  { %s8827_s14 = sld [smem:[%s9881_s0 + %s8659_s28]]   ;;  %s8663_s28 = smov 29  }
  0x27   :  { %s8832_s4 = sld [smem:[%s9881_s0 + %s8660_s7]]   ;;  %s8664_s7 = smov 30  }
  0x28   :  { %9898 = sst [smem:[#allocation59_spill]] %s8822_s30 }
  0x29   :  { %9900 = sst [smem:[#allocation61_spill]] %s8837_s21 }
  0x2a   :  { %s8842_s30 = sld [smem:[%s9881_s0 + %s8662_s22]]   ;;  %s8666_s22 = smov 32  }
  0x2b   :  { %s8852_s20 = sld [smem:[%s9881_s0 + %s8664_s7]]   ;;  %s8668_s7 = smov 34  }
  0x2c   :  { %9899 = sst [smem:[#allocation60_spill]] %s8827_s14 }
  0x2d   :  { %s8847_s14 = sld [smem:[%s9881_s0 + %s8663_s28]]   ;;  %s8667_s28 = smov 33  }
  0x2e   :  { %s8857_s21 = sld [smem:[%s9881_s0 + %s8665_s15]]  }
  0x30   :  { %9901 = sst [smem:[#allocation62_spill]] %s8842_s30 }
  0x31   :  { %9903 = sst [smem:[#allocation64_spill]] %s8852_s20 }
  0x32   :  { %s8862_s30 = sld [smem:[%s9881_s0 + %s8666_s22]]  }
  0x33   :  { %9902 = sst [smem:[#allocation63_spill]] %s8847_s14 }
  0x34   :  { %s8867_s14 = sld [smem:[%s9881_s0 + %s8667_s28]]  }
  0x35   :  { %s8872_s20 = sld [smem:[%s9881_s0 + %s8668_s7]]  }
  0x36   :  { %74 = vsyncpa [#allocation3], 0 }
  0x37   :  { %75 = vsyncpa [#allocation6], 0 }
  0x38   :  { %76 = vsyncpa [#allocation9], 0 }
  0x39   :  { %77 = vsyncpa [#allocation12], 0 }
  0x3a   :  { %78 = vsyncpa [#allocation15], 0 }
  0x3b   :  { %79 = vsyncpa [#allocation18], 0 }
  0x3c   :  { %80 = vsyncpa [#allocation21], 0 }
  0x3d   :  { %81 = vsyncpa [#allocation24], 0 }
  0x3e   :  { %82 = vsyncpa [#allocation27], 0 }
  0x3f   :  { %83 = vsyncpa [#allocation30], 0 }
  0x40   :  { %84 = vsyncpa [#allocation33], 0 }
  0x41   :  { %85 = vsyncpa [#allocation4], 0  ;;  %s8669_s15 = smov [#allocation5]   ;;  %s8670_s18 = smov [#allocation8]  }
  0x42   :  { %s103_s16 = sshll.u32 %s8669_s15, 4  ;;  %s127_s0 = sshll.u32 %s8670_s18, 4  ;;  %s104_s16 = int_to_ptr.vmem [resolvable:$true] %s103_s16  ;;  %s8874_s0 = int_to_ptr.vmem [resolvable:$true] %s127_s0 }
  0x43   :  { %s8127_s22 = scalar_lea.hbm %s8707_s9, 2048 }
  0x44   :  { %p8128_p0 = scmp.ne.s32.totalorder %s8707_s9, %s8127_s22  ;;  %p8131_p1 = scmp.lt.u32.totalorder %s8127_s22, %s8707_s9 }
  0x46   :  { %p8133_p2 = pnand %p8131_p1, %p8128_p0 }
  0x48   :  { %8136 = shalt.err (!%p8133_p2)
}
  0x49   :  { %s8137_s23 = scalar_lea.vmem %s104_s16, 2048  ;;  %p8142_p4 = scmp.lt.s32.totalorder %s104_s16, %s104_s16 }
  0x4a   :  { %p8138_p3 = scmp.ne.s32.totalorder %s104_s16, %s8137_s23  ;;  %p8143_p5 = scmp.lt.s32.totalorder %s8137_s23, %s8137_s23 }
  0x4c   :  { %p8144_p6 = por %p8143_p5, %p8142_p4 }
  0x4e   :  { %p8145_p7 = pnand %p8144_p6, %p8138_p3 }
  0x50   :  { %8148 = shalt.err (!%p8145_p7)
}
  0x51   :  { %s8671_s26 = smov 128   ;;  %s8672_s28 = smov 8  }
  0x52   :  { %109 = dma.hbm_to_vmem [thread:$0]  %s8707_s9, 2048, %s104_s16, [#allocation6], %s8671_s26, %s8671_s26, %s8672_s28  }
  0x53   :  { %s8149_s1 = scalar_lea.hbm %s8717_s17, 2048 }
  0x54   :  { %p8150_p8 = scmp.ne.s32.totalorder %s8717_s17, %s8149_s1  ;;  %p8153_p9 = scmp.lt.u32.totalorder %s8149_s1, %s8717_s17 }
  0x56   :  { %p8155_p10 = pnand %p8153_p9, %p8150_p8 }
  0x58   :  { %8158 = shalt.err (!%p8155_p10)
}
  0x59   :  { %s8159_s2 = scalar_lea.vmem %s8874_s0, 2048  ;;  %p8164_p12 = scmp.lt.s32.totalorder %s8874_s0, %s8874_s0 }
  0x5a   :  { %p8160_p11 = scmp.ne.s32.totalorder %s8874_s0, %s8159_s2  ;;  %p8165_p13 = scmp.lt.s32.totalorder %s8159_s2, %s8159_s2 }
  0x5c   :  { %p8166_p0 = por %p8165_p13, %p8164_p12 }
  0x5e   :  { %p8167_p1 = pnand %p8166_p0, %p8160_p11 }
  0x60   :  { %8170 = shalt.err (!%p8167_p1)
}
  0x61   :  { %133 = dma.hbm_to_vmem [thread:$0]  %s8717_s17, 2048, %s8874_s0, [#allocation9], %s8671_s26, %s8671_s26, %s8672_s28  }
  0x62   :  { %s8673_s9 = smov [#allocation11]   ;;  %s8674_s10 = smov [#allocation14]  }
  0x63   :  { %s153_s7 = sshll.u32 %s8673_s9, 4  ;;  %s181_s11 = sshll.u32 %s8674_s10, 4  ;;  %s154_s7 = int_to_ptr.vmem [resolvable:$true] %s153_s7  ;;  %s8895_s11 = int_to_ptr.vmem [resolvable:$true] %s181_s11 }
  0x64   :  { %s8171_s15 = scalar_lea.hbm %s8732_s29, 2048 }
  0x65   :  { %p8172_p2 = scmp.ne.s32.totalorder %s8732_s29, %s8171_s15  ;;  %p8175_p3 = scmp.lt.u32.totalorder %s8171_s15, %s8732_s29 }
  0x67   :  { %p8177_p4 = pnand %p8175_p3, %p8172_p2 }
  0x69   :  { %8180 = shalt.err (!%p8177_p4)
}
  0x6a   :  { %s8181_s16 = scalar_lea.vmem %s154_s7, 2048  ;;  %p8186_p6 = scmp.lt.s32.totalorder %s154_s7, %s154_s7 }
  0x6b   :  { %p8182_p5 = scmp.ne.s32.totalorder %s154_s7, %s8181_s16  ;;  %p8187_p7 = scmp.lt.s32.totalorder %s8181_s16, %s8181_s16 }
  0x6d   :  { %p8188_p8 = por %p8187_p7, %p8186_p6 }
  0x6f   :  { %p8189_p9 = pnand %p8188_p8, %p8182_p5 }
  0x71   :  { %8192 = shalt.err (!%p8189_p9)
}
  0x72   :  { %159 = dma.hbm_to_vmem [thread:$0]  %s8732_s29, 2048, %s154_s7, [#allocation12], %s8671_s26, %s8671_s26, %s8672_s28  }
  0x73   :  { %s8193_s17 = scalar_lea.hbm %s8752_s19, 2048 }
  0x74   :  { %p8194_p10 = scmp.ne.s32.totalorder %s8752_s19, %s8193_s17  ;;  %p8197_p11 = scmp.lt.u32.totalorder %s8193_s17, %s8752_s19 }
  0x76   :  { %p8199_p12 = pnand %p8197_p11, %p8194_p10 }
  0x78   :  { %8202 = shalt.err (!%p8199_p12)
}
  0x79   :  { %s8203_s18 = scalar_lea.vmem %s8895_s11, 2048  ;;  %p8208_p0 = scmp.lt.s32.totalorder %s8895_s11, %s8895_s11 }
  0x7a   :  { %p8204_p13 = scmp.ne.s32.totalorder %s8895_s11, %s8203_s18  ;;  %p8209_p1 = scmp.lt.s32.totalorder %s8203_s18, %s8203_s18 }
  0x7c   :  { %p8210_p2 = por %p8209_p1, %p8208_p0 }
  0x7e   :  { %p8211_p3 = pnand %p8210_p2, %p8204_p13 }
  0x80   :  { %8214 = shalt.err (!%p8211_p3)
}
  0x81   :  { %187 = dma.hbm_to_vmem [thread:$0]  %s8752_s19, 2048, %s8895_s11, [#allocation15], %s8671_s26, %s8671_s26, %s8672_s28  }
  0x82   :  { %s8675_s29 = smov [#allocation17]   ;;  %s8676_s22 = smov [#allocation20]  }
  0x83   :  { %s207_s0 = sshll.u32 %s8675_s29, 4  ;;  %s233_s23 = sshll.u32 %s8676_s22, 4  ;;  %s208_s0 = int_to_ptr.vmem [resolvable:$true] %s207_s0  ;;  %s8916_s23 = int_to_ptr.vmem [resolvable:$true] %s233_s23 }
  0x84   :  { %s8215_s1 = scalar_lea.hbm %s8767_s6, 2048 }
  0x85   :  { %p8216_p4 = scmp.ne.s32.totalorder %s8767_s6, %s8215_s1  ;;  %p8219_p5 = scmp.lt.u32.totalorder %s8215_s1, %s8767_s6 }
  0x87   :  { %p8221_p6 = pnand %p8219_p5, %p8216_p4 }
  0x89   :  { %8224 = shalt.err (!%p8221_p6)
}
  0x8a   :  { %s8225_s2 = scalar_lea.vmem %s208_s0, 2048  ;;  %p8230_p8 = scmp.lt.s32.totalorder %s208_s0, %s208_s0 }
  0x8b   :  { %p8226_p7 = scmp.ne.s32.totalorder %s208_s0, %s8225_s2  ;;  %p8231_p9 = scmp.lt.s32.totalorder %s8225_s2, %s8225_s2 }
  0x8d   :  { %p8232_p10 = por %p8231_p9, %p8230_p8 }
  0x8f   :  { %p8233_p11 = pnand %p8232_p10, %p8226_p7 }
  0x91   :  { %8236 = shalt.err (!%p8233_p11)
}
  0x92   :  { %213 = dma.hbm_to_vmem [thread:$0]  %s8767_s6, 2048, %s208_s0, [#allocation18], %s8671_s26, %s8671_s26, %s8672_s28  }
  0x93   :  { %s8237_s19 = scalar_lea.hbm %s8782_s27, 2048 }
  0x94   :  { %p8238_p12 = scmp.ne.s32.totalorder %s8782_s27, %s8237_s19  ;;  %p8241_p13 = scmp.lt.u32.totalorder %s8237_s19, %s8782_s27 }
  0x96   :  { %p8243_p0 = pnand %p8241_p13, %p8238_p12 }
  0x98   :  { %8246 = shalt.err (!%p8243_p0)
}
  0x99   :  { %s8247_s9 = scalar_lea.vmem %s8916_s23, 2048  ;;  %p8252_p2 = scmp.lt.s32.totalorder %s8916_s23, %s8916_s23 }
  0x9a   :  { %p8248_p1 = scmp.ne.s32.totalorder %s8916_s23, %s8247_s9  ;;  %p8253_p3 = scmp.lt.s32.totalorder %s8247_s9, %s8247_s9 }
  0x9c   :  { %p8254_p4 = por %p8253_p3, %p8252_p2 }
  0x9e   :  { %p8255_p5 = pnand %p8254_p4, %p8248_p1 }
  0xa0   :  { %8258 = shalt.err (!%p8255_p5)
}
  0xa1   :  { %239 = dma.hbm_to_vmem [thread:$0]  %s8782_s27, 2048, %s8916_s23, [#allocation21], %s8671_s26, %s8671_s26, %s8672_s28  }
  0xa2   :  { %s8677_s6 = smov [#allocation23]   ;;  %s8678_s10 = smov [#allocation26]  }
  0xa3   :  { %s261_s7 = sshll.u32 %s8677_s6, 4  ;;  %s287_s11 = sshll.u32 %s8678_s10, 4  ;;  %s262_s7 = int_to_ptr.vmem [resolvable:$true] %s261_s7  ;;  %s8937_s11 = int_to_ptr.vmem [resolvable:$true] %s287_s11 }
  0xa4   :  { %s8259_s15 = scalar_lea.hbm %s8802_s3, 2048 }
  0xa5   :  { %p8260_p6 = scmp.ne.s32.totalorder %s8802_s3, %s8259_s15  ;;  %p8263_p7 = scmp.lt.u32.totalorder %s8259_s15, %s8802_s3 }
  0xa7   :  { %p8265_p8 = pnand %p8263_p7, %p8260_p6 }
  0xa9   :  { %8268 = shalt.err (!%p8265_p8)
}
  0xaa   :  { %s8269_s16 = scalar_lea.vmem %s262_s7, 2048  ;;  %p8274_p10 = scmp.lt.s32.totalorder %s262_s7, %s262_s7 }
  0xab   :  { %p8270_p9 = scmp.ne.s32.totalorder %s262_s7, %s8269_s16  ;;  %p8275_p11 = scmp.lt.s32.totalorder %s8269_s16, %s8269_s16 }
  0xad   :  { %p8276_p12 = por %p8275_p11, %p8274_p10 }
  0xaf   :  { %p8277_p13 = pnand %p8276_p12, %p8270_p9 }
  0xb1   :  { %8280 = shalt.err (!%p8277_p13)
}
  0xb2   :  { %267 = dma.hbm_to_vmem [thread:$0]  %s8802_s3, 2048, %s262_s7, [#allocation24], %s8671_s26, %s8671_s26, %s8672_s28  }
  0xb3   :  { %s8281_s27 = scalar_lea.hbm %s8817_s12, 2048 }
  0xb4   :  { %p8282_p0 = scmp.ne.s32.totalorder %s8817_s12, %s8281_s27  ;;  %p8285_p1 = scmp.lt.u32.totalorder %s8281_s27, %s8817_s12 }
  0xb6   :  { %p8287_p2 = pnand %p8285_p1, %p8282_p0 }
  0xb8   :  { %8290 = shalt.err (!%p8287_p2)
}
  0xb9   :  { %s8291_s17 = scalar_lea.vmem %s8937_s11, 2048  ;;  %p8296_p4 = scmp.lt.s32.totalorder %s8937_s11, %s8937_s11 }
  0xba   :  { %p8292_p3 = scmp.ne.s32.totalorder %s8937_s11, %s8291_s17  ;;  %p8297_p5 = scmp.lt.s32.totalorder %s8291_s17, %s8291_s17 }
  0xbc   :  { %p8298_p6 = por %p8297_p5, %p8296_p4 }
  0xbe   :  { %p8299_p7 = pnand %p8298_p6, %p8292_p3 }
  0xc0   :  { %8302 = shalt.err (!%p8299_p7)
}
  0xc1   :  { %293 = dma.hbm_to_vmem [thread:$0]  %s8817_s12, 2048, %s8937_s11, [#allocation27], %s8671_s26, %s8671_s26, %s8672_s28  }
  0xc2   :  { %s8679_s3 = smov [#allocation29]   ;;  %s8680_s29 = smov [#allocation32]  }
  0xc3   :  { %s313_s18 = sshll.u32 %s8679_s3, 4  ;;  %s345_s0 = sshll.u32 %s8680_s29, 4  ;;  %s314_s18 = int_to_ptr.vmem [resolvable:$true] %s313_s18  ;;  %s8958_s0 = int_to_ptr.vmem [resolvable:$true] %s345_s0 }
  0xc4   :  { %s8303_s22 = scalar_lea.hbm %s8832_s4, 2048 }
  0xc5   :  { %p8304_p8 = scmp.ne.s32.totalorder %s8832_s4, %s8303_s22  ;;  %p8307_p9 = scmp.lt.u32.totalorder %s8303_s22, %s8832_s4 }
  0xc7   :  { %p8309_p10 = pnand %p8307_p9, %p8304_p8 }
  0xc9   :  { %8312 = shalt.err (!%p8309_p10)
}
  0xca   :  { %s8313_s23 = scalar_lea.vmem %s314_s18, 2048  ;;  %p8318_p12 = scmp.lt.s32.totalorder %s314_s18, %s314_s18 }
  0xcb   :  { %p8314_p11 = scmp.ne.s32.totalorder %s314_s18, %s8313_s23  ;;  %p8319_p13 = scmp.lt.s32.totalorder %s8313_s23, %s8313_s23 }
  0xcd   :  { %p8320_p0 = por %p8319_p13, %p8318_p12 }
  0xcf   :  { %p8321_p1 = pnand %p8320_p0, %p8314_p11 }
  0xd1   :  { %8324 = shalt.err (!%p8321_p1)
}
  0xd2   :  { %319 = dma.hbm_to_vmem [thread:$0]  %s8832_s4, 2048, %s314_s18, [#allocation30], %s8671_s26, %s8671_s26, %s8672_s28  }
  0xd3   :  { %s8325_s12 = scalar_lea.hbm %s8862_s30, 2048 }
  0xd4   :  { %p8326_p2 = scmp.ne.s32.totalorder %s8862_s30, %s8325_s12  ;;  %p8329_p3 = scmp.lt.u32.totalorder %s8325_s12, %s8862_s30 }
  0xd6   :  { %p8331_p4 = pnand %p8329_p3, %p8326_p2 }
  0xd8   :  { %8334 = shalt.err (!%p8331_p4)
}
  0xd9   :  { %s8335_s1 = scalar_lea.vmem %s8958_s0, 2048  ;;  %p8340_p6 = scmp.lt.s32.totalorder %s8958_s0, %s8958_s0 }
  0xda   :  { %p8336_p5 = scmp.ne.s32.totalorder %s8958_s0, %s8335_s1  ;;  %p8341_p7 = scmp.lt.s32.totalorder %s8335_s1, %s8335_s1 }
  0xdc   :  { %p8342_p8 = por %p8341_p7, %p8340_p6 }
  0xde   :  { %p8343_p9 = pnand %p8342_p8, %p8336_p5 }
  0xe0   :  { %8346 = shalt.err (!%p8343_p9)
}
  0xe1   :  { %351 = dma.hbm_to_vmem [thread:$0]  %s8862_s30, 2048, %s8958_s0, [#allocation33], %s8671_s26, %s8671_s26, %s8672_s28  }
  0xe2   :  { %s8681_s4 = smov [#allocation2]   ;;  %s8682_s19 = smov [#allocation7]  }
  0xe3   :  { %s91_s2 = sshll.u32 %s8681_s4, 4  ;;  %s115_s9 = sshll.u32 %s8682_s19, 4  ;;  %s92_s2 = int_to_ptr.vmem [resolvable:$true] %s91_s2  ;;  %s8979_s9 = int_to_ptr.vmem [resolvable:$true] %s115_s9 }
  0xe4   :  { %s8347_s6 = scalar_lea.hbm %s8702_s5, 2048 }
  0xe5   :  { %p8348_p10 = scmp.ne.s32.totalorder %s8702_s5, %s8347_s6  ;;  %p8351_p11 = scmp.lt.u32.totalorder %s8347_s6, %s8702_s5 }
  0xe7   :  { %p8353_p12 = pnand %p8351_p11, %p8348_p10 }
  0xe9   :  { %8356 = shalt.err (!%p8353_p12)
}
  0xea   :  { %s8357_s7 = scalar_lea.vmem %s92_s2, 2048  ;;  %p8362_p0 = scmp.lt.s32.totalorder %s92_s2, %s92_s2 }
  0xeb   :  { %p8358_p13 = scmp.ne.s32.totalorder %s92_s2, %s8357_s7  ;;  %p8363_p1 = scmp.lt.s32.totalorder %s8357_s7, %s8357_s7 }
  0xed   :  { %p8364_p2 = por %p8363_p1, %p8362_p0 }
  0xef   :  { %p8365_p3 = pnand %p8364_p2, %p8358_p13 }
  0xf1   :  { %8368 = shalt.err (!%p8365_p3)
}
  0xf2   :  { %97 = dma.hbm_to_vmem [thread:$0]  %s8702_s5, 2048, %s92_s2, [#allocation3], %s8671_s26, %s8671_s26, %s8672_s28  }
  0xf3   :  { %s8369_s30 = scalar_lea.hbm %s8712_s13, 2048 }
  0xf4   :  { %p8370_p4 = scmp.ne.s32.totalorder %s8712_s13, %s8369_s30  ;;  %p8373_p5 = scmp.lt.u32.totalorder %s8369_s30, %s8712_s13 }
  0xf6   :  { %p8375_p6 = pnand %p8373_p5, %p8370_p4 }
  0xf8   :  { %8378 = shalt.err (!%p8375_p6)
}
  0xf9   :  { %s8379_s10 = scalar_lea.vmem %s8979_s9, 2048  ;;  %p8384_p8 = scmp.lt.s32.totalorder %s8979_s9, %s8979_s9 }
  0xfa   :  { %p8380_p7 = scmp.ne.s32.totalorder %s8979_s9, %s8379_s10  ;;  %p8385_p9 = scmp.lt.s32.totalorder %s8379_s10, %s8379_s10 }
  0xfc   :  { %p8386_p10 = por %p8385_p9, %p8384_p8 }
  0xfe   :  { %p8387_p11 = pnand %p8386_p10, %p8380_p7 }
 0x100   :  { %8390 = shalt.err (!%p8387_p11)
}
 0x101   :  { %121 = dma.hbm_to_vmem [thread:$0]  %s8712_s13, 2048, %s8979_s9, [#allocation6], %s8671_s26, %s8671_s26, %s8672_s28  }
 0x102   :  { %s8683_s5 = smov [#allocation10]   ;;  %s8684_s15 = smov [#allocation13]  }
 0x103   :  { %s141_s11 = sshll.u32 %s8683_s5, 4  ;;  %s167_s16 = sshll.u32 %s8684_s15, 4  ;;  %s142_s11 = int_to_ptr.vmem [resolvable:$true] %s141_s11  ;;  %s9000_s16 = int_to_ptr.vmem [resolvable:$true] %s167_s16 }
 0x104   :  { %s8391_s27 = scalar_lea.hbm %s8727_s25, 2048 }
 0x105   :  { %p8392_p12 = scmp.ne.s32.totalorder %s8727_s25, %s8391_s27  ;;  %p8395_p13 = scmp.lt.u32.totalorder %s8391_s27, %s8727_s25 }
 0x107   :  { %p8397_p0 = pnand %p8395_p13, %p8392_p12 }
 0x109   :  { %8400 = shalt.err (!%p8397_p0)
}
 0x10a   :  { %s8401_s17 = scalar_lea.vmem %s142_s11, 2048  ;;  %p8406_p2 = scmp.lt.s32.totalorder %s142_s11, %s142_s11 }
 0x10b   :  { %p8402_p1 = scmp.ne.s32.totalorder %s142_s11, %s8401_s17  ;;  %p8407_p3 = scmp.lt.s32.totalorder %s8401_s17, %s8401_s17 }
 0x10d   :  { %p8408_p4 = por %p8407_p3, %p8406_p2 }
 0x10f   :  { %p8409_p5 = pnand %p8408_p4, %p8402_p1 }
 0x111   :  { %8412 = shalt.err (!%p8409_p5)
}
 0x112   :  { %147 = dma.hbm_to_vmem [thread:$0]  %s8727_s25, 2048, %s142_s11, [#allocation9], %s8671_s26, %s8671_s26, %s8672_s28  }
 0x113   :  { %s8413_s13 = scalar_lea.hbm %s8742_s8, 2048 }
 0x114   :  { %p8414_p6 = scmp.ne.s32.totalorder %s8742_s8, %s8413_s13  ;;  %p8417_p7 = scmp.lt.u32.totalorder %s8413_s13, %s8742_s8 }
 0x116   :  { %p8419_p8 = pnand %p8417_p7, %p8414_p6 }
 0x118   :  { %8422 = shalt.err (!%p8419_p8)
}
 0x119   :  { %s8423_s3 = scalar_lea.vmem %s9000_s16, 2048  ;;  %p8428_p10 = scmp.lt.s32.totalorder %s9000_s16, %s9000_s16 }
 0x11a   :  { %p8424_p9 = scmp.ne.s32.totalorder %s9000_s16, %s8423_s3  ;;  %p8429_p11 = scmp.lt.s32.totalorder %s8423_s3, %s8423_s3 }
 0x11c   :  { %p8430_p12 = por %p8429_p11, %p8428_p10 }
 0x11e   :  { %p8431_p13 = pnand %p8430_p12, %p8424_p9 }
 0x120   :  { %8434 = shalt.err (!%p8431_p13)
}
 0x121   :  { %173 = dma.hbm_to_vmem [thread:$0]  %s8742_s8, 2048, %s9000_s16, [#allocation12], %s8671_s26, %s8671_s26, %s8672_s28  }
 0x122   :  { %s8685_s25 = smov [#allocation16]   ;;  %s8686_s29 = smov [#allocation19]  }
 0x123   :  { %s193_s18 = sshll.u32 %s8685_s25, 4  ;;  %s221_s0 = sshll.u32 %s8686_s29, 4  ;;  %s194_s18 = int_to_ptr.vmem [resolvable:$true] %s193_s18  ;;  %s9021_s0 = int_to_ptr.vmem [resolvable:$true] %s221_s0 }
 0x124   :  { %s8435_s22 = scalar_lea.hbm %s8757_s24, 2048 }
 0x125   :  { %p8436_p0 = scmp.ne.s32.totalorder %s8757_s24, %s8435_s22  ;;  %p8439_p1 = scmp.lt.u32.totalorder %s8435_s22, %s8757_s24 }
 0x127   :  { %p8441_p2 = pnand %p8439_p1, %p8436_p0 }
 0x129   :  { %8444 = shalt.err (!%p8441_p2)
}
 0x12a   :  { %s8445_s23 = scalar_lea.vmem %s194_s18, 2048  ;;  %p8450_p4 = scmp.lt.s32.totalorder %s194_s18, %s194_s18 }
 0x12b   :  { %p8446_p3 = scmp.ne.s32.totalorder %s194_s18, %s8445_s23  ;;  %p8451_p5 = scmp.lt.s32.totalorder %s8445_s23, %s8445_s23 }
 0x12d   :  { %p8452_p6 = por %p8451_p5, %p8450_p4 }
 0x12f   :  { %p8453_p7 = pnand %p8452_p6, %p8446_p3 }
 0x131   :  { %8456 = shalt.err (!%p8453_p7)
}
 0x132   :  { %s9904_s8 = sld [smem:[#allocation53_spill]] }
 0x133   :  { %199 = dma.hbm_to_vmem [thread:$0]  %s8757_s24, 2048, %s194_s18, [#allocation15], %s8671_s26, %s8671_s26, %s8672_s28  }
 0x138   :  { %s8457_s12 = scalar_lea.hbm %s9904_s8, 2048 }
 0x139   :  { %p8458_p8 = scmp.ne.s32.totalorder %s9904_s8, %s8457_s12  ;;  %p8461_p9 = scmp.lt.u32.totalorder %s8457_s12, %s9904_s8 }
 0x13b   :  { %p8463_p10 = pnand %p8461_p9, %p8458_p8 }
 0x13d   :  { %8466 = shalt.err (!%p8463_p10)
}
 0x13e   :  { %s8467_s1 = scalar_lea.vmem %s9021_s0, 2048  ;;  %p8472_p12 = scmp.lt.s32.totalorder %s9021_s0, %s9021_s0 }
 0x13f   :  { %p8468_p11 = scmp.ne.s32.totalorder %s9021_s0, %s8467_s1  ;;  %p8473_p13 = scmp.lt.s32.totalorder %s8467_s1, %s8467_s1 }
 0x141   :  { %p8474_p0 = por %p8473_p13, %p8472_p12 }
 0x143   :  { %p8475_p1 = pnand %p8474_p0, %p8468_p11 }
 0x145   :  { %8478 = shalt.err (!%p8475_p1)
}
 0x146   :  { %s9905_s24 = sld [smem:[#allocation55_spill]]  ;;  %s8687_s4 = smov [#allocation22]  }
 0x147   :  { %227 = dma.hbm_to_vmem [thread:$0]  %s9904_s8, 2048, %s9021_s0, [#allocation18], %s8671_s26, %s8671_s26, %s8672_s28  }
 0x148   :  { %s247_s2 = sshll.u32 %s8687_s4, 4  ;;  %s8688_s19 = smov [#allocation25]   ;;  %s248_s2 = int_to_ptr.vmem [resolvable:$true] %s247_s2 }
 0x149   :  { %s273_s9 = sshll.u32 %s8688_s19, 4  ;;  %s9042_s9 = int_to_ptr.vmem [resolvable:$true] %s273_s9 }
 0x14c   :  { %s8479_s6 = scalar_lea.hbm %s9905_s24, 2048 }
 0x14d   :  { %p8480_p2 = scmp.ne.s32.totalorder %s9905_s24, %s8479_s6  ;;  %p8483_p3 = scmp.lt.u32.totalorder %s8479_s6, %s9905_s24 }
 0x14f   :  { %p8485_p4 = pnand %p8483_p3, %p8480_p2 }
 0x151   :  { %8488 = shalt.err (!%p8485_p4)
}
 0x152   :  { %s8489_s7 = scalar_lea.vmem %s248_s2, 2048  ;;  %p8494_p6 = scmp.lt.s32.totalorder %s248_s2, %s248_s2 }
 0x153   :  { %p8490_p5 = scmp.ne.s32.totalorder %s248_s2, %s8489_s7  ;;  %p8495_p7 = scmp.lt.s32.totalorder %s8489_s7, %s8489_s7 }
 0x155   :  { %p8496_p8 = por %p8495_p7, %p8494_p6 }
 0x157   :  { %p8497_p9 = pnand %p8496_p8, %p8490_p5 }
 0x159   :  { %8500 = shalt.err (!%p8497_p9)
}
 0x15a   :  { %s9906_s30 = sld [smem:[#allocation57_spill]] }
 0x15b   :  { %253 = dma.hbm_to_vmem [thread:$0]  %s9905_s24, 2048, %s248_s2, [#allocation21], %s8671_s26, %s8671_s26, %s8672_s28  }
 0x160   :  { %s8501_s10 = scalar_lea.hbm %s9906_s30, 2048 }
 0x161   :  { %p8502_p10 = scmp.ne.s32.totalorder %s9906_s30, %s8501_s10  ;;  %p8505_p11 = scmp.lt.u32.totalorder %s8501_s10, %s9906_s30 }
 0x163   :  { %p8507_p12 = pnand %p8505_p11, %p8502_p10 }
 0x165   :  { %8510 = shalt.err (!%p8507_p12)
}
 0x166   :  { %s8511_s5 = scalar_lea.vmem %s9042_s9, 2048  ;;  %p8516_p0 = scmp.lt.s32.totalorder %s9042_s9, %s9042_s9 }
 0x167   :  { %p8512_p13 = scmp.ne.s32.totalorder %s9042_s9, %s8511_s5  ;;  %p8517_p1 = scmp.lt.s32.totalorder %s8511_s5, %s8511_s5 }
 0x169   :  { %p8518_p2 = por %p8517_p1, %p8516_p0 }
 0x16b   :  { %p8519_p3 = pnand %p8518_p2, %p8512_p13 }
 0x16d   :  { %8522 = shalt.err (!%p8519_p3)
}
 0x16e   :  { %s9907_s11 = sld [smem:[#allocation59_spill]]  ;;  %s8689_s15 = smov [#allocation28]  }
 0x16f   :  { %279 = dma.hbm_to_vmem [thread:$0]  %s9906_s30, 2048, %s9042_s9, [#allocation24], %s8671_s26, %s8671_s26, %s8672_s28  }
 0x170   :  { %s299_s16 = sshll.u32 %s8689_s15, 4  ;;  %s8690_s27 = smov [#allocation31]   ;;  %s300_s16 = int_to_ptr.vmem [resolvable:$true] %s299_s16 }
 0x171   :  { %s325_s17 = sshll.u32 %s8690_s27, 4  ;;  %s9063_s17 = int_to_ptr.vmem [resolvable:$true] %s325_s17 }
 0x174   :  { %s8523_s13 = scalar_lea.hbm %s9907_s11, 2048 }
 0x175   :  { %p8524_p4 = scmp.ne.s32.totalorder %s9907_s11, %s8523_s13  ;;  %p8527_p5 = scmp.lt.u32.totalorder %s8523_s13, %s9907_s11 }
 0x177   :  { %p8529_p6 = pnand %p8527_p5, %p8524_p4 }
 0x179   :  { %8532 = shalt.err (!%p8529_p6)
}
 0x17a   :  { %s8533_s3 = scalar_lea.vmem %s300_s16, 2048  ;;  %p8538_p8 = scmp.lt.s32.totalorder %s300_s16, %s300_s16 }
 0x17b   :  { %p8534_p7 = scmp.ne.s32.totalorder %s300_s16, %s8533_s3  ;;  %p8539_p9 = scmp.lt.s32.totalorder %s8533_s3, %s8533_s3 }
 0x17d   :  { %p8540_p10 = por %p8539_p9, %p8538_p8 }
 0x17f   :  { %p8541_p11 = pnand %p8540_p10, %p8534_p7 }
 0x181   :  { %8544 = shalt.err (!%p8541_p11)
}
 0x182   :  { %s9908_s25 = sld [smem:[#allocation61_spill]] }
 0x183   :  { %305 = dma.hbm_to_vmem [thread:$0]  %s9907_s11, 2048, %s300_s16, [#allocation27], %s8671_s26, %s8671_s26, %s8672_s28  }
 0x188   :  { %s8545_s18 = scalar_lea.hbm %s9908_s25, 2048 }
 0x189   :  { %p8546_p12 = scmp.ne.s32.totalorder %s9908_s25, %s8545_s18  ;;  %p8549_p13 = scmp.lt.u32.totalorder %s8545_s18, %s9908_s25 }
 0x18b   :  { %p8551_p0 = pnand %p8549_p13, %p8546_p12 }
 0x18d   :  { %8554 = shalt.err (!%p8551_p0)
}
 0x18e   :  { %s8555_s29 = scalar_lea.vmem %s9063_s17, 2048  ;;  %p8560_p2 = scmp.lt.s32.totalorder %s9063_s17, %s9063_s17 }
 0x18f   :  { %p8556_p1 = scmp.ne.s32.totalorder %s9063_s17, %s8555_s29  ;;  %p8561_p3 = scmp.lt.s32.totalorder %s8555_s29, %s8555_s29 }
 0x191   :  { %p8562_p4 = por %p8561_p3, %p8560_p2 }
 0x193   :  { %p8563_p5 = pnand %p8562_p4, %p8556_p1 }
 0x195   :  { %8566 = shalt.err (!%p8563_p5)
}
 0x196   :  { %331 = dma.hbm_to_vmem [thread:$0]  %s9908_s25, 2048, %s9063_s17, [#allocation30], %s8671_s26, %s8671_s26, %s8672_s28  }
 0x197   :  { %s8691_s0 = smov [#allocation34]   ;;  %s8567_s23 = scalar_lea.hbm %s8867_s14, 2048 }
 0x198   :  { %s357_s22 = sshll.u32 %s8691_s0, 4  ;;  %p8568_p6 = scmp.ne.s32.totalorder %s8867_s14, %s8567_s23  ;;  %s358_s22 = int_to_ptr.vmem [resolvable:$true] %s357_s22 }
 0x199   :  { %p8571_p7 = scmp.lt.u32.totalorder %s8567_s23, %s8867_s14 }
 0x19b   :  { %p8573_p8 = pnand %p8571_p7, %p8568_p6 }
 0x19d   :  { %8576 = shalt.err (!%p8573_p8)
}
 0x19e   :  { %s8577_s8 = scalar_lea.vmem %s358_s22, 2048  ;;  %p8582_p10 = scmp.lt.s32.totalorder %s358_s22, %s358_s22 }
 0x19f   :  { %p8578_p9 = scmp.ne.s32.totalorder %s358_s22, %s8577_s8  ;;  %p8583_p11 = scmp.lt.s32.totalorder %s8577_s8, %s8577_s8 }
 0x1a1   :  { %p8584_p12 = por %p8583_p11, %p8582_p10 }
 0x1a3   :  { %p8585_p13 = pnand %p8584_p12, %p8578_p9 }
 0x1a5   :  { %8588 = shalt.err (!%p8585_p13)
}
 0x1a6   :  { %363 = dma.hbm_to_vmem [thread:$0]  %s8867_s14, 2048, %s358_s22, [#allocation33], %s8671_s26, %s8671_s26, %s8672_s28  }
 0x1a7   :  { %8611 = dma.done.wait [#allocation3], 2048  }
 0x1a8   :  { %8612 = vsyncadd [#allocation3], 4294965248 }
 0x1a9   :  { %8613 = dma.done.wait [#allocation6], 4096  }
 0x1aa   :  { %8614 = vsyncadd [#allocation6], 4294963200 }
 0x1ab   :  { %8615 = dma.done.wait [#allocation9], 4096  }
 0x1ac   :  { %8616 = vsyncadd [#allocation9], 4294963200 }
 0x1ad   :  { %8617 = dma.done.wait [#allocation12], 4096  }
 0x1ae   :  { %8618 = vsyncadd [#allocation12], 4294963200 }
 0x1af   :  { %8619 = dma.done.wait [#allocation15], 4096  }
 0x1b0   :  { %8620 = vsyncadd [#allocation15], 4294963200 }
 0x1b1   :  { %8621 = dma.done.wait [#allocation18], 4096  }
 0x1b2   :  { %8622 = vsyncadd [#allocation18], 4294963200 }
 0x1b3   :  { %8623 = dma.done.wait [#allocation21], 4096  }
 0x1b4   :  { %8624 = vsyncadd [#allocation21], 4294963200 }
 0x1b5   :  { %8625 = dma.done.wait [#allocation24], 4096  }
 0x1b6   :  { %8626 = vsyncadd [#allocation24], 4294963200 }
 0x1b7   :  { %8627 = dma.done.wait [#allocation27], 4096  }
 0x1b8   :  { %8628 = vsyncadd [#allocation27], 4294963200 }
 0x1b9   :  { %8629 = dma.done.wait [#allocation30], 4096  }
 0x1ba   :  { %8630 = vsyncadd [#allocation30], 4294963200 }
 0x1bb   :  { %8631 = dma.done.wait [#allocation33], 4096  }
 0x1bc   :  { %8632 = vsyncadd [#allocation33], 4294963200  ;;  %v529_v0 = vld [vmem:[#allocation17] sm:$0xff]  ;;  %v530_v1 = vld [vmem:[#allocation17 + $0x8] sm:$0xff]  ;;  %s9909_s14 = sld [smem:[#allocation51_spill]]  ;;  %s9910_s12 = sld [smem:[#allocation54_spill]] }
 0x1bd   :  { %v531_v2 = vld [vmem:[#allocation17 + $0x10] sm:$0xff]  ;;  %v7142_v3 = vpack.c.bf16 %v530_v1, %v529_v0  ;;  %v532_v4 = vld [vmem:[#allocation17 + $0x18] sm:$0xff]  ;;  %v533_v6 = vld [vmem:[#allocation17 + $0x20] sm:$0xff]  ;;  %s9911_s1 = sld [smem:[#allocation50_spill]]  ;;  %s9912_s24 = sld [smem:[#allocation49_spill]] }
 0x1be   :  { %v7146_v5 = vpack.c.bf16 %v532_v4, %v531_v2  ;;  %v534_v7 = vld [vmem:[#allocation17 + $0x28] sm:$0xff]  ;;  %v9091_v9 = vld [vmem:[#allocation2] sm:$0xff]  ;;  %v535_v10 = vld [vmem:[#allocation17 + $0x30] sm:$0xff]  ;;  %s9913_s4 = sld [smem:[#allocation52_spill]]  ;;  %s9914_s2 = sld [smem:[#allocation48_spill]] }
 0x1bf   :  { %7143 = vmatprep.subr.bf16.mxu0 %v7142_v3  ;;  %v7150_v8 = vpack.c.bf16 %v534_v7, %v533_v6  ;;  %v536_v11 = vld [vmem:[#allocation17 + $0x38] sm:$0xff]  ;;  %5886 = vmatprep.mubr.f32.mxu0 %v9091_v9  ;;  %v537_v13 = vld [vmem:[#allocation17 + $0x40] sm:$0xff]  ;;  %v538_v14 = vld [vmem:[#allocation17 + $0x48] sm:$0xff]  ;;  %s9915_s19 = sld [smem:[#allocation63_spill]]  ;;  %s9916_s9 = sld [smem:[#allocation62_spill]] }
 0x1c0   :  { %7145 = vmatpush3.bf16.msra.mxu0 %v7142_v3  ;;  %v7154_v12 = vpack.c.bf16 %v536_v11, %v535_v10  ;;  %v7158_v15 = vpack.c.bf16 %v538_v14, %v537_v13  ;;  %v539_v16 = vld [vmem:[#allocation17 + $0x50] sm:$0xff]  ;;  %v540_v17 = vld [vmem:[#allocation17 + $0x58] sm:$0xff]  ;;  %v541_v19 = vld [vmem:[#allocation17 + $0x60] sm:$0xff]  ;;  %s9917_s6 = sld [smem:[#allocation58_spill]]  ;;  %s9918_s7 = sld [smem:[#allocation56_spill]] }
 0x1c1   :  { %7147 = vmatprep.subr.bf16.mxu0 %v7146_v5  ;;  %v7162_v18 = vpack.c.bf16 %v540_v17, %v539_v16  ;;  %v542_v20 = vld [vmem:[#allocation17 + $0x68] sm:$0xff]  ;;  %v543_v22 = vld [vmem:[#allocation17 + $0x70] sm:$0xff]  ;;  %v544_v23 = vld [vmem:[#allocation17 + $0x78] sm:$0xff]  ;;  %s9919_s30 = sld [smem:[#allocation60_spill]]  ;;  %s9920_s10 = sld [smem:[#allocation64_spill]] }
 0x1c2   :  { %v7166_v21 = vpack.c.bf16 %v542_v20, %v541_v19  ;;  %v7170_v24 = vpack.c.bf16 %v544_v23, %v543_v22  ;;  %v9094_v25 = vld [vmem:[#allocation2 + $0x8] sm:$0xff]  ;;  %v9096_v26 = vld [vmem:[#allocation2 + $0x10] sm:$0xff]  ;;  %v9100_v27 = vld [vmem:[#allocation2 + $0x18] sm:$0xff] }
 0x1c3   :  { %v9102_v28 = vld [vmem:[#allocation2 + $0x20] sm:$0xff]  ;;  %v9106_v29 = vld [vmem:[#allocation2 + $0x28] sm:$0xff]  ;;  %v9108_v30 = vld [vmem:[#allocation2 + $0x30] sm:$0xff] }
 0x1c4   :  { %7149 = vmatpush3.bf16.msra.mxu0 %v7146_v5  ;;  %v9112_v31 = vld [vmem:[#allocation2 + $0x38] sm:$0xff]  ;;  %v9114_v32 = vld [vmem:[#allocation2 + $0x40] sm:$0xff]  ;;  %v9118_v33 = vld [vmem:[#allocation2 + $0x48] sm:$0xff] }
 0x1c5   :  { %7151 = vmatprep.subr.bf16.mxu0 %v7150_v8  ;;  %v9120_v34 = vld [vmem:[#allocation2 + $0x50] sm:$0xff]  ;;  %v9124_v35 = vld [vmem:[#allocation2 + $0x58] sm:$0xff]  ;;  %v9126_v36 = vld [vmem:[#allocation2 + $0x60] sm:$0xff] }
 0x1c6   :  { %v9130_v37 = vld [vmem:[#allocation2 + $0x68] sm:$0xff]  ;;  %v9132_v38 = vld [vmem:[#allocation2 + $0x70] sm:$0xff]  ;;  %v9136_v39 = vld [vmem:[#allocation2 + $0x78] sm:$0xff] }
 0x1c7   :  { %v481_v40 = vld [vmem:[#allocation5] sm:$0xff]  ;;  %v875_v42 = vld [vmem:[#allocation16 + $0x8] sm:$0xff]  ;;  %v876_v43 = vld [vmem:[#allocation16 + $0x10] sm:$0xff] }
 0x1c8   :  { %7153 = vmatpush3.bf16.msra.mxu0 %v7150_v8  ;;  %5942 = vmatprep.mubr.f32.mxu1 %v481_v40  ;;  %v874_v41 = vld [vmem:[#allocation16] sm:$0xff]  ;;  %v877_v45 = vld [vmem:[#allocation16 + $0x18] sm:$0xff]  ;;  %v879_v48 = vld [vmem:[#allocation16 + $0x28] sm:$0xff] }
 0x1c9   :  { %7155 = vmatprep.subr.bf16.mxu0 %v7154_v12  ;;  %v7206_v44 = vpack.c.bf16 %v875_v42, %v874_v41  ;;  %v7210_v46 = vpack.c.bf16 %v877_v45, %v876_v43  ;;  %v878_v47 = vld [vmem:[#allocation16 + $0x20] sm:$0xff]  ;;  %v880_v50 = vld [vmem:[#allocation16 + $0x30] sm:$0xff]  ;;  %v881_v51 = vld [vmem:[#allocation16 + $0x38] sm:$0xff] }
 0x1ca   :  { %v7214_v49 = vpack.c.bf16 %v879_v48, %v878_v47  ;;  %v7218_v52 = vpack.c.bf16 %v881_v51, %v880_v50  ;;  %v882_v53 = vld [vmem:[#allocation16 + $0x40] sm:$0xff]  ;;  %v883_v54 = vld [vmem:[#allocation16 + $0x48] sm:$0xff]  ;;  %v884_v56 = vld [vmem:[#allocation16 + $0x50] sm:$0xff] }
 0x1cb   :  { %v7222_v55 = vpack.c.bf16 %v883_v54, %v882_v53  ;;  %v885_v57 = vld [vmem:[#allocation16 + $0x58] sm:$0xff]  ;;  %v886_v59 = vld [vmem:[#allocation16 + $0x60] sm:$0xff]  ;;  %v887_v60 = vld [vmem:[#allocation16 + $0x68] sm:$0xff] }
 0x1cc   :  { %7157 = vmatpush3.bf16.msra.mxu0 %v7154_v12  ;;  %v7226_v58 = vpack.c.bf16 %v885_v57, %v884_v56  ;;  %v7230_v61 = vpack.c.bf16 %v887_v60, %v886_v59  ;;  %v888_v62 = vld [vmem:[#allocation16 + $0x70] sm:$0xff]  ;;  %v889_v63 = vld [vmem:[#allocation16 + $0x78] sm:$0xff]  ;;  %v9141_v1 = vld [vmem:[%s9909_s14] ss:$0 sm:$0xff] }
 0x1cd   :  { %7159 = vmatprep.subr.bf16.mxu0 %v7158_v15  ;;  %v7234_v0 = vpack.c.bf16 %v889_v63, %v888_v62  ;;  %v858_v2 = vld [vmem:[#allocation14] sm:$0xff]  ;;  %v859_v3 = vld [vmem:[#allocation14 + $0x8] sm:$0xff]  ;;  %v860_v11 = vld [vmem:[#allocation14 + $0x10] sm:$0xff] }
 0x1ce   :  { %v7238_v7 = vpack.c.bf16 %v859_v3, %v858_v2  ;;  %v861_v12 = vld [vmem:[#allocation14 + $0x18] sm:$0xff]  ;;  %v863_v22 = vld [vmem:[#allocation14 + $0x28] sm:$0xff]  ;;  %v866_v56 = vld [vmem:[#allocation14 + $0x40] sm:$0xff] }
 0x1cf   :  { %v7242_v19 = vpack.c.bf16 %v861_v12, %v860_v11  ;;  %v865_v47 = vld [vmem:[#allocation14 + $0x38] sm:$0xff]  ;;  %v867_v57 = vld [vmem:[#allocation14 + $0x48] sm:$0xff]  ;;  %v868_v3 = vld [vmem:[#allocation14 + $0x50] sm:$0xff] }
 0x1d0   :  { %7161 = vmatpush3.bf16.msra.mxu0 %v7158_v15 }
 0x1d1   :  { %7163 = vmatprep.subr.bf16.mxu0 %v7162_v18 }
 0x1d4   :  { %7165 = vmatpush3.bf16.msra.mxu0 %v7162_v18 }
 0x1d5   :  { %7167 = vmatprep.subr.bf16.mxu0 %v7166_v21 }
 0x1d8   :  { %7169 = vmatpush3.bf16.msra.mxu0 %v7166_v21  ;;  %v862_v21 = vld [vmem:[#allocation14 + $0x20] sm:$0xff] }
 0x1d9   :  { %7171 = vmatprep.subr.bf16.mxu0 %v7170_v24 }
 0x1dc   :  { %7173 = vmatpush3.bf16.msra.mxu0 %v7170_v24 }
 0x1dd   :  { %7207 = vmatprep.subr.bf16.mxu0 %v7206_v44 }
 0x1df   :  { %5887 = vmatmul.mubr.f32.vlgmr.msra.gmra.mrb[0].mxu0 %v9094_v25 }
 0x1e0   :  { %5889 = vmatprep.mubr.f32.mxu0 %v9096_v26  ;;  %7209 = vmatpush3.bf16.msra.mxu0 %v7206_v44  ;;  %v7246_v44 = vpack.c.bf16 %v863_v22, %v862_v21 }
 0x1e1   :  { %7211 = vmatprep.subr.bf16.mxu0 %v7210_v46 }
 0x1e3   :  { %5890 = vmatmul.mubr.f32.gmra.mrb[2].mxu0 %v9100_v27 }
 0x1e4   :  { %5892 = vmatprep.mubr.f32.mxu0 %v9102_v28  ;;  %7213 = vmatpush3.bf16.msra.mxu0 %v7210_v46  ;;  %v864_v46 = vld [vmem:[#allocation14 + $0x30] sm:$0xff] }
 0x1e5   :  { %7215 = vmatprep.subr.bf16.mxu0 %v7214_v49  ;;  %v7250_v54 = vpack.c.bf16 %v865_v47, %v864_v46 }
 0x1e7   :  { %5893 = vmatmul.mubr.f32.gmra.mrb[4].mxu0 %v9106_v29 }
 0x1e8   :  { %5895 = vmatprep.mubr.f32.mxu0 %v9108_v30  ;;  %7217 = vmatpush3.bf16.msra.mxu0 %v7214_v49 }
 0x1e9   :  { %7219 = vmatprep.subr.bf16.mxu0 %v7218_v52 }
 0x1eb   :  { %5896 = vmatmul.mubr.f32.gmra.mrb[6].mxu0 %v9112_v31 }
 0x1ec   :  { %5898 = vmatprep.mubr.f32.mxu0 %v9114_v32  ;;  %7221 = vmatpush3.bf16.msra.mxu0 %v7218_v52 }
 0x1ed   :  { %7223 = vmatprep.subr.bf16.mxu0 %v7222_v55 }
 0x1ef   :  { %5899 = vmatmul.mubr.f32.gmra.mrb[8].mxu0 %v9118_v33 }
 0x1f0   :  { %5901 = vmatprep.mubr.f32.mxu0 %v9120_v34  ;;  %7225 = vmatpush3.bf16.msra.mxu0 %v7222_v55 }
 0x1f1   :  { %7227 = vmatprep.subr.bf16.mxu0 %v7226_v58 }
 0x1f3   :  { %5902 = vmatmul.mubr.f32.gmra.mrb[10].mxu0 %v9124_v35 }
 0x1f4   :  { %5904 = vmatprep.mubr.f32.mxu0 %v9126_v36  ;;  %7229 = vmatpush3.bf16.msra.mxu0 %v7226_v58 }
 0x1f5   :  { %7231 = vmatprep.subr.bf16.mxu0 %v7230_v61 }
 0x1f7   :  { %5905 = vmatmul.mubr.f32.gmra.mrb[12].mxu0 %v9130_v37 }
 0x1f8   :  { %5907 = vmatprep.mubr.f32.mxu0 %v9132_v38  ;;  %7233 = vmatpush3.bf16.msra.mxu0 %v7230_v61 }
 0x1f9   :  { %7235 = vmatprep.subr.bf16.mxu0 %v7234_v0 }
 0x1fb   :  { %5908 = vmatmul.mubr.f32.gmra.mrb[14].mxu0 %v9136_v39 }
 0x1fc   :  { %5998 = vmatprep.mubr.f32.mxu0 %v9091_v9  ;;  %7237 = vmatpush3.bf16.msra.mxu0 %v7234_v0  ;;  %v7254_v0 = vpack.c.bf16 %v867_v57, %v866_v56  ;;  %v483_v56 = vld [vmem:[#allocation5 + $0x10] sm:$0xff] }
 0x1fd   :  { %7239 = vmatprep.subr.bf16.mxu0 %v7238_v7 }
 0x1ff   :  { %5999 = vmatmul.mubr.f32.vlgmr.msra.gmra.mrb[16].mxu0 %v9094_v25 }
 0x200   :  { %7241 = vmatpush3.bf16.msra.mxu0 %v7238_v7  ;;  %6001 = vmatprep.mubr.f32.mxu0 %v9096_v26 }
 0x201   :  { %7243 = vmatprep.subr.bf16.mxu0 %v7242_v19 }
 0x203   :  { %6002 = vmatmul.mubr.f32.gmra.mrb[18].mxu0 %v9100_v27 }
 0x204   :  { %7245 = vmatpush3.bf16.msra.mxu0 %v7242_v19  ;;  %6004 = vmatprep.mubr.f32.mxu0 %v9102_v28 }
 0x205   :  { %7247 = vmatprep.subr.bf16.mxu0 %v7246_v44 }
 0x207   :  { %6005 = vmatmul.mubr.f32.gmra.mrb[20].mxu0 %v9106_v29 }
 0x208   :  { %7249 = vmatpush3.bf16.msra.mxu0 %v7246_v44  ;;  %6007 = vmatprep.mubr.f32.mxu0 %v9108_v30 }
 0x209   :  { %7251 = vmatprep.subr.bf16.mxu0 %v7250_v54 }
 0x20b   :  { %6008 = vmatmul.mubr.f32.gmra.mrb[22].mxu0 %v9112_v31 }
 0x20c   :  { %7253 = vmatpush3.bf16.msra.mxu0 %v7250_v54  ;;  %6010 = vmatprep.mubr.f32.mxu0 %v9114_v32  ;;  %v1301_v54 = vld [vmem:[#allocation22 + $0x10] sm:$0xff] }
 0x20d   :  { %7255 = vmatprep.subr.bf16.mxu0 %v7254_v0 }
 0x20f   :  { %6011 = vmatmul.mubr.f32.gmra.mrb[24].mxu0 %v9118_v33 }
 0x210   :  { %7257 = vmatpush3.bf16.msra.mxu0 %v7254_v0  ;;  %6013 = vmatprep.mubr.f32.mxu0 %v9120_v34  ;;  %v1306_v0 = vld [vmem:[#allocation22 + $0x38] sm:$0xff] }
 0x213   :  { %6014 = vmatmul.mubr.f32.gmra.mrb[26].mxu0 %v9124_v35 }
 0x214   :  { %6016 = vmatprep.mubr.f32.mxu0 %v9126_v36 }
 0x217   :  { %6017 = vmatmul.mubr.f32.gmra.mrb[28].mxu0 %v9130_v37 }
 0x218   :  { %6019 = vmatprep.mubr.f32.mxu0 %v9132_v38 }
 0x21b   :  { %6020 = vmatmul.mubr.f32.gmra.mrb[30].mxu0 %v9136_v39 }
 0x2b2   :  { %v5888_v4 = vpop.f32.mrb[0].mxu0 }
 0x2b3   :  { %v624_v5 = vadd.f32 %v5888_v4, %v9141_v1  ;;  %v618_v6 = vpop.f32.mrb[1].mxu0  ;;  %v869_v4 = vld [vmem:[#allocation14 + $0x58] sm:$0xff] }
 0x2b4   :  { %v619_v8 = vadd.f32 %v9141_v1, %v618_v6  ;;  %v7258_v12 = vpack.c.bf16 %v869_v4, %v868_v3  ;;  %v487_v3 = vld [vmem:[#allocation5 + $0x30] sm:$0xff] }
 0x2b5   :  { %v698_v10 = vmax.f32 %v624_v5, 0.0 }
 0x2b6   :  { %v697_v13 = vmax.f32 %v619_v8, 0.0  ;;  %v5891_v14 = vpop.f32.mrb[2].mxu0  ;;  %7259 = vmatprep.subr.bf16.mxu0 %v7258_v12 }
 0x2b7   :  { %v634_v15 = vadd.f32 %v5891_v14, %v9141_v1  ;;  %v628_v16 = vpop.f32.mrb[3].mxu0  ;;  %v870_v14 = vld [vmem:[#allocation14 + $0x60] sm:$0xff]  ;;  %7261 = vmatpush3.bf16.msra.mxu0 %v7258_v12  ;;  %v1310_v12 = vld [vmem:[#allocation22 + $0x58] sm:$0xff] }
 0x2b8   :  { %v629_v17 = vadd.f32 %v9141_v1, %v628_v16  ;;  %v7174_v18 = vpack.c.bf16 %v698_v10, %v697_v13 }
 0x2b9   :  { %v700_v20 = vmax.f32 %v634_v15, 0.0  ;;  %v871_v15 = vld [vmem:[#allocation14 + $0x68] sm:$0xff] }
 0x2ba   :  { %v699_v23 = vmax.f32 %v629_v17, 0.0  ;;  %v5894_v24 = vpop.f32.mrb[4].mxu0  ;;  %7175 = vmatprep.subr.bf16.mxu1 %v7174_v18  ;;  %v7262_v22 = vpack.c.bf16 %v871_v15, %v870_v14  ;;  %v491_v14 = vld [vmem:[#allocation5 + $0x50] sm:$0xff] }
 0x2bb   :  { %v644_v40 = vadd.f32 %v5894_v24, %v9141_v1  ;;  %v638_v41 = vpop.f32.mrb[5].mxu0  ;;  %7177 = vmatpush3.bf16.msra.mxu1 %v7174_v18  ;;  %v872_v24 = vld [vmem:[#allocation14 + $0x70] sm:$0xff] }
 0x2bc   :  { %v7178_v42 = vpack.c.bf16 %v700_v20, %v699_v23  ;;  %v639_v43 = vadd.f32 %v9141_v1, %v638_v41  ;;  %7263 = vmatprep.subr.bf16.mxu0 %v7262_v22 }
 0x2bd   :  { %v702_v45 = vmax.f32 %v644_v40, 0.0  ;;  %v873_v40 = vld [vmem:[#allocation14 + $0x78] sm:$0xff]  ;;  %7265 = vmatpush3.bf16.msra.mxu0 %v7262_v22 }
 0x2be   :  { %v701_v48 = vmax.f32 %v639_v43, 0.0  ;;  %v5897_v49 = vpop.f32.mrb[6].mxu0  ;;  %7179 = vmatprep.subr.bf16.mxu1 %v7178_v42  ;;  %v7266_v47 = vpack.c.bf16 %v873_v40, %v872_v24  ;;  %v1314_v22 = vld [vmem:[#allocation22 + $0x78] sm:$0xff]  ;;  %v495_v24 = vld [vmem:[#allocation5 + $0x70] sm:$0xff] }
 0x2bf   :  { %v654_v50 = vadd.f32 %v5897_v49, %v9141_v1  ;;  %v648_v51 = vpop.f32.mrb[7].mxu0  ;;  %7181 = vmatpush3.bf16.msra.mxu1 %v7178_v42  ;;  %v1299_v49 = vld [vmem:[#allocation22] sm:$0xff] }
 0x2c0   :  { %v7182_v52 = vpack.c.bf16 %v702_v45, %v701_v48  ;;  %v649_v53 = vadd.f32 %v9141_v1, %v648_v51  ;;  %7267 = vmatprep.subr.bf16.mxu0 %v7266_v47 }
 0x2c1   :  { %v704_v55 = vmax.f32 %v654_v50, 0.0  ;;  %v1300_v50 = vld [vmem:[#allocation22 + $0x8] sm:$0xff]  ;;  %7269 = vmatpush3.bf16.msra.mxu0 %v7266_v47 }
 0x2c2   :  { %v703_v58 = vmax.f32 %v649_v53, 0.0  ;;  %v5900_v59 = vpop.f32.mrb[8].mxu0  ;;  %7183 = vmatprep.subr.bf16.mxu1 %v7182_v52  ;;  %v7270_v53 = vpack.c.bf16 %v1300_v50, %v1299_v49 }
 0x2c3   :  { %v664_v60 = vadd.f32 %v5900_v59, %v9141_v1  ;;  %v658_v61 = vpop.f32.mrb[9].mxu0  ;;  %7185 = vmatpush3.bf16.msra.mxu1 %v7182_v52  ;;  %v1304_v59 = vld [vmem:[#allocation22 + $0x28] sm:$0xff] }
 0x2c4   :  { %v7186_v62 = vpack.c.bf16 %v704_v55, %v703_v58  ;;  %v659_v63 = vadd.f32 %v9141_v1, %v658_v61  ;;  %v1302_v55 = vld [vmem:[#allocation22 + $0x18] sm:$0xff]  ;;  %v1303_v58 = vld [vmem:[#allocation22 + $0x20] sm:$0xff] }
 0x2c5   :  { %v706_v2 = vmax.f32 %v664_v60, 0.0  ;;  %v7274_v57 = vpack.c.bf16 %v1302_v55, %v1301_v54  ;;  %v484_v60 = vld [vmem:[#allocation5 + $0x18] sm:$0xff]  ;;  %v485_v61 = vld [vmem:[#allocation5 + $0x20] sm:$0xff] }
 0x2c6   :  { %v705_v5 = vmax.f32 %v659_v63, 0.0  ;;  %v5903_v6 = vpop.f32.mrb[10].mxu0  ;;  %7187 = vmatprep.subr.bf16.mxu1 %v7186_v62  ;;  %v1305_v63 = vld [vmem:[#allocation22 + $0x30] sm:$0xff] }
 0x2c7   :  { %v674_v7 = vadd.f32 %v5903_v6, %v9141_v1  ;;  %v668_v8 = vpop.f32.mrb[11].mxu0  ;;  %7189 = vmatpush3.bf16.msra.mxu1 %v7186_v62  ;;  %v7278_v62 = vpack.c.bf16 %v1304_v59, %v1303_v58  ;;  %v7282_v4 = vpack.c.bf16 %v1306_v0, %v1305_v63  ;;  %v1308_v6 = vld [vmem:[#allocation22 + $0x48] sm:$0xff] }
 0x2c8   :  { %v7190_v10 = vpack.c.bf16 %v706_v2, %v705_v5  ;;  %v669_v11 = vadd.f32 %v9141_v1, %v668_v8  ;;  %v486_v2 = vld [vmem:[#allocation5 + $0x28] sm:$0xff]  ;;  %v1307_v5 = vld [vmem:[#allocation22 + $0x40] sm:$0xff] }
 0x2c9   :  { %v708_v13 = vmax.f32 %v674_v7, 0.0  ;;  %v488_v7 = vld [vmem:[#allocation5 + $0x38] sm:$0xff]  ;;  %v489_v8 = vld [vmem:[#allocation5 + $0x40] sm:$0xff] }
 0x2ca   :  { %v707_v16 = vmax.f32 %v669_v11, 0.0  ;;  %v5906_v17 = vpop.f32.mrb[12].mxu0  ;;  %7191 = vmatprep.subr.bf16.mxu1 %v7190_v10  ;;  %v1309_v11 = vld [vmem:[#allocation22 + $0x50] sm:$0xff] }
 0x2cb   :  { %v684_v18 = vadd.f32 %v5906_v17, %v9141_v1  ;;  %v678_v19 = vpop.f32.mrb[13].mxu0  ;;  %7193 = vmatpush3.bf16.msra.mxu1 %v7190_v10  ;;  %v7286_v10 = vpack.c.bf16 %v1308_v6, %v1307_v5  ;;  %v7290_v15 = vpack.c.bf16 %v1310_v12, %v1309_v11  ;;  %v1312_v17 = vld [vmem:[#allocation22 + $0x68] sm:$0xff] }
 0x2cc   :  { %v7194_v20 = vpack.c.bf16 %v708_v13, %v707_v16  ;;  %v679_v21 = vadd.f32 %v9141_v1, %v678_v19  ;;  %v490_v13 = vld [vmem:[#allocation5 + $0x48] sm:$0xff]  ;;  %v1311_v16 = vld [vmem:[#allocation22 + $0x60] sm:$0xff] }
 0x2cd   :  { %v710_v23 = vmax.f32 %v684_v18, 0.0  ;;  %v492_v18 = vld [vmem:[#allocation5 + $0x58] sm:$0xff]  ;;  %v493_v19 = vld [vmem:[#allocation5 + $0x60] sm:$0xff] }
 0x2ce   :  { %v709_v41 = vmax.f32 %v679_v21, 0.0  ;;  %v5909_v42 = vpop.f32.mrb[14].mxu0  ;;  %7195 = vmatprep.subr.bf16.mxu1 %v7194_v20  ;;  %v1313_v21 = vld [vmem:[#allocation22 + $0x70] sm:$0xff] }
 0x2cf   :  { %v694_v43 = vadd.f32 %v5909_v42, %v9141_v1  ;;  %v688_v44 = vpop.f32.mrb[15].mxu0  ;;  %7197 = vmatpush3.bf16.msra.mxu1 %v7194_v20  ;;  %v7294_v20 = vpack.c.bf16 %v1312_v17, %v1311_v16  ;;  %v7298_v40 = vpack.c.bf16 %v1314_v22, %v1313_v21  ;;  %v497_v42 = vld [vmem:[#allocation7] sm:$0xff] }
 0x2d0   :  { %v7198_v45 = vpack.c.bf16 %v710_v23, %v709_v41  ;;  %v689_v46 = vadd.f32 %v9141_v1, %v688_v44  ;;  %v482_v1 = vld [vmem:[#allocation5 + $0x8] sm:$0xff]  ;;  %v496_v41 = vld [vmem:[#allocation5 + $0x78] sm:$0xff] }
 0x2d1   :  { %v712_v48 = vmax.f32 %v694_v43, 0.0  ;;  %v494_v23 = vld [vmem:[#allocation5 + $0x68] sm:$0xff] }
 0x2d2   :  { %v711_v51 = vmax.f32 %v689_v46, 0.0  ;;  %7199 = vmatprep.subr.bf16.mxu1 %v7198_v45 }
 0x2d3   :  { %7201 = vmatpush3.bf16.msra.mxu1 %v7198_v45 }
 0x2d4   :  { %v7202_v52 = vpack.c.bf16 %v712_v48, %v711_v51 }
 0x2d6   :  { %7203 = vmatprep.subr.bf16.mxu1 %v7202_v52  ;;  %v6003_v43 = vpop.f32.mrb[18].mxu0 }
 0x2d7   :  { %7205 = vmatpush3.bf16.msra.mxu1 %v7202_v52  ;;  %v966_v44 = vpop.f32.mrb[19].mxu0 }
 0x2d8   :  { %7271 = vmatprep.subr.bf16.mxu1 %v7270_v53 }
 0x2da   :  { %5943 = vmatmul.mubr.f32.vlgmr.msra.gmra.mrb[0].mxu1 %v482_v1  ;;  %v6006_v45 = vpop.f32.mrb[20].mxu0 }
 0x2db   :  { %7273 = vmatpush3.bf16.msra.mxu1 %v7270_v53  ;;  %5945 = vmatprep.mubr.f32.mxu1 %v483_v56  ;;  %v976_v46 = vpop.f32.mrb[21].mxu0 }
 0x2dc   :  { %7275 = vmatprep.subr.bf16.mxu1 %v7274_v57 }
 0x2de   :  { %5946 = vmatmul.mubr.f32.gmra.mrb[2].mxu1 %v484_v60  ;;  %v6009_v47 = vpop.f32.mrb[22].mxu0 }
 0x2df   :  { %7277 = vmatpush3.bf16.msra.mxu1 %v7274_v57  ;;  %5948 = vmatprep.mubr.f32.mxu1 %v485_v61 }
 0x2e0   :  { %7279 = vmatprep.subr.bf16.mxu1 %v7278_v62 }
 0x2e2   :  { %5949 = vmatmul.mubr.f32.gmra.mrb[4].mxu1 %v486_v2  ;;  %v9191_v2 = vld [vmem:[%s9910_s12] ss:$0 sm:$0xff] }
 0x2e3   :  { %7281 = vmatpush3.bf16.msra.mxu1 %v7278_v62  ;;  %5951 = vmatprep.mubr.f32.mxu1 %v487_v3 }
 0x2e4   :  { %7283 = vmatprep.subr.bf16.mxu1 %v7282_v4 }
 0x2e6   :  { %5952 = vmatmul.mubr.f32.gmra.mrb[6].mxu1 %v488_v7 }
 0x2e7   :  { %7285 = vmatpush3.bf16.msra.mxu1 %v7282_v4  ;;  %5954 = vmatprep.mubr.f32.mxu1 %v489_v8 }
 0x2e8   :  { %7287 = vmatprep.subr.bf16.mxu1 %v7286_v10 }
 0x2ea   :  { %5955 = vmatmul.mubr.f32.gmra.mrb[8].mxu1 %v490_v13 }
 0x2eb   :  { %7289 = vmatpush3.bf16.msra.mxu1 %v7286_v10  ;;  %5957 = vmatprep.mubr.f32.mxu1 %v491_v14 }
 0x2ec   :  { %7291 = vmatprep.subr.bf16.mxu1 %v7290_v15 }
 0x2ee   :  { %5958 = vmatmul.mubr.f32.gmra.mrb[10].mxu1 %v492_v18 }
 0x2ef   :  { %7293 = vmatpush3.bf16.msra.mxu1 %v7290_v15  ;;  %5960 = vmatprep.mubr.f32.mxu1 %v493_v19 }
 0x2f0   :  { %7295 = vmatprep.subr.bf16.mxu1 %v7294_v20 }
 0x2f2   :  { %5961 = vmatmul.mubr.f32.gmra.mrb[12].mxu1 %v494_v23 }
 0x2f3   :  { %7297 = vmatpush3.bf16.msra.mxu1 %v7294_v20  ;;  %5963 = vmatprep.mubr.f32.mxu1 %v495_v24 }
 0x2f4   :  { %7299 = vmatprep.subr.bf16.mxu1 %v7298_v40 }
 0x2f6   :  { %5964 = vmatmul.mubr.f32.gmra.mrb[14].mxu1 %v496_v41 }
 0x2f7   :  { %7301 = vmatpush3.bf16.msra.mxu1 %v7298_v40  ;;  %6110 = vmatprep.mubr.f32.mxu1 %v9091_v9 }
 0x2fa   :  { %6111 = vmatmul.mubr.f32.vlgmr.msra.gmra.mrb[16].mxu1 %v9094_v25 }
 0x2fb   :  { %6113 = vmatprep.mubr.f32.mxu1 %v9096_v26 }
 0x2fe   :  { %6114 = vmatmul.mubr.f32.gmra.mrb[18].mxu1 %v9100_v27 }
 0x2ff   :  { %6116 = vmatprep.mubr.f32.mxu1 %v9102_v28 }
 0x302   :  { %6117 = vmatmul.mubr.f32.gmra.mrb[20].mxu1 %v9106_v29 }
 0x303   :  { %6119 = vmatprep.mubr.f32.mxu1 %v9108_v30 }
 0x306   :  { %6120 = vmatmul.mubr.f32.gmra.mrb[22].mxu1 %v9112_v31 }
 0x307   :  { %6122 = vmatprep.mubr.f32.mxu1 %v9114_v32 }
 0x30a   :  { %6123 = vmatmul.mubr.f32.gmra.mrb[24].mxu1 %v9118_v33  ;;  %v986_v33 = vpop.f32.mrb[23].mxu0 }
 0x30b   :  { %6125 = vmatprep.mubr.f32.mxu1 %v9120_v34  ;;  %v6012_v48 = vpop.f32.mrb[24].mxu0 }
 0x30c   :  { %v996_v34 = vpop.f32.mrb[25].mxu0 }
 0x30d   :  { %v6015_v49 = vpop.f32.mrb[26].mxu0 }
 0x30e   :  { %6126 = vmatmul.mubr.f32.gmra.mrb[26].mxu1 %v9124_v35  ;;  %v1006_v35 = vpop.f32.mrb[27].mxu0 }
 0x30f   :  { %6128 = vmatprep.mubr.f32.mxu1 %v9126_v36  ;;  %v6018_v50 = vpop.f32.mrb[28].mxu0 }
 0x310   :  { %v1016_v36 = vpop.f32.mrb[29].mxu0 }
 0x311   :  { %v6021_v51 = vpop.f32.mrb[30].mxu0 }
 0x312   :  { %6129 = vmatmul.mubr.f32.gmra.mrb[28].mxu1 %v9130_v37  ;;  %v1026_v37 = vpop.f32.mrb[31].mxu0 }
 0x313   :  { %6131 = vmatprep.mubr.f32.mxu1 %v9132_v38 }
 0x316   :  { %6132 = vmatmul.mubr.f32.gmra.mrb[30].mxu1 %v9136_v39 }
 0x317   :  { %6166 = vmatprep.mubr.f32.mxu1 %v497_v42 }
 0x3ad   :  { %v5944_v52 = vpop.f32.mrb[0].mxu1 }
 0x3ae   :  { %v779_v38 = vpop.f32.mrb[1].mxu1 }
 0x3af   :  { %6054 = vmatprep.mubr.f32.mxu0 %v779_v38 }
 0x3b0   :  { %6055 = vmatmul.mubr.f32.vlgmr.msra.gmra.mrb[16].mxu0 %v5944_v52 }
 0x3b1   :  { %v5947_v39 = vpop.f32.mrb[2].mxu1 }
 0x3b2   :  { %v789_v53 = vpop.f32.mrb[3].mxu1 }
 0x3b3   :  { %6057 = vmatprep.mubr.f32.mxu0 %v789_v53 }
 0x3b4   :  { %6058 = vmatmul.mubr.f32.gmra.mrb[32].mxu0 %v5947_v39 }
 0x3b5   :  { %v5950_v54 = vpop.f32.mrb[4].mxu1 }
 0x3b6   :  { %v799_v55 = vpop.f32.mrb[5].mxu1 }
 0x3b7   :  { %6060 = vmatprep.mubr.f32.mxu0 %v799_v55 }
 0x3b8   :  { %6061 = vmatmul.mubr.f32.gmra.mrb[34].mxu0 %v5950_v54 }
 0x3b9   :  { %v5953_v1 = vpop.f32.mrb[6].mxu1 }
 0x3ba   :  { %v809_v56 = vpop.f32.mrb[7].mxu1 }
 0x3bb   :  { %6063 = vmatprep.mubr.f32.mxu0 %v809_v56 }
 0x3bc   :  { %6064 = vmatmul.mubr.f32.gmra.mrb[36].mxu0 %v5953_v1 }
 0x3bd   :  { %v5956_v57 = vpop.f32.mrb[8].mxu1 }
 0x3be   :  { %v819_v58 = vpop.f32.mrb[9].mxu1 }
 0x3bf   :  { %6066 = vmatprep.mubr.f32.mxu0 %v819_v58 }
 0x3c0   :  { %6067 = vmatmul.mubr.f32.gmra.mrb[38].mxu0 %v5956_v57 }
 0x3c1   :  { %v5959_v59 = vpop.f32.mrb[10].mxu1 }
 0x3c2   :  { %v829_v60 = vpop.f32.mrb[11].mxu1 }
 0x3c3   :  { %6069 = vmatprep.mubr.f32.mxu0 %v829_v60 }
 0x3c4   :  { %6070 = vmatmul.mubr.f32.gmra.mrb[40].mxu0 %v5959_v59 }
 0x3c5   :  { %v5962_v61 = vpop.f32.mrb[12].mxu1 }
 0x3c6   :  { %v839_v62 = vpop.f32.mrb[13].mxu1 }
 0x3c7   :  { %6072 = vmatprep.mubr.f32.mxu0 %v839_v62 }
 0x3c8   :  { %6073 = vmatmul.mubr.f32.gmra.mrb[42].mxu0 %v5962_v61 }
 0x3c9   :  { %v5965_v63 = vpop.f32.mrb[14].mxu1 }
 0x3ca   :  { %v849_v0 = vpop.f32.mrb[15].mxu1 }
 0x3cb   :  { %6075 = vmatprep.mubr.f32.mxu0 %v849_v0  ;;  %v2069_v0 = vld [vmem:[#allocation13] sm:$0xff] }
 0x3cc   :  { %6076 = vmatmul.mubr.f32.gmra.mrb[44].mxu0 %v5965_v63 }
 0x3cd   :  { %v6112_v3 = vpop.f32.mrb[16].mxu1  ;;  %6222 = vmatprep.mubr.f32.mxu0 %v9091_v9 }
 0x3ce   :  { %v1394_v4 = vadd.f32 %v6112_v3, %v9191_v2  ;;  %v1388_v5 = vpop.f32.mrb[17].mxu1  ;;  %v2070_v3 = vld [vmem:[#allocation13 + $0x8] sm:$0xff] }
 0x3cf   :  { %v1389_v6 = vadd.f32 %v9191_v2, %v1388_v5 }
 0x3d0   :  { %v1468_v7 = vmax.f32 %v1394_v4, 0.0 }
 0x3d1   :  { %v1467_v8 = vmax.f32 %v1389_v6, 0.0  ;;  %v6115_v10 = vpop.f32.mrb[18].mxu1  ;;  %v7398_v6 = vpack.c.bf16 %v2070_v3, %v2069_v0  ;;  %v1654_v3 = vld [vmem:[#allocation20 + $0x50] sm:$0xff] }
 0x3d2   :  { %v1404_v11 = vadd.f32 %v6115_v10, %v9191_v2  ;;  %v1398_v12 = vpop.f32.mrb[19].mxu1  ;;  %v498_v10 = vld [vmem:[#allocation7 + $0x8] sm:$0xff] }
 0x3d3   :  { %v7302_v13 = vpack.c.bf16 %v1468_v7, %v1467_v8  ;;  %v1399_v14 = vadd.f32 %v9191_v2, %v1398_v12  ;;  %v2071_v7 = vld [vmem:[#allocation13 + $0x10] sm:$0xff]  ;;  %v2072_v8 = vld [vmem:[#allocation13 + $0x18] sm:$0xff] }
 0x3d4   :  { %v1470_v15 = vmax.f32 %v1404_v11, 0.0  ;;  %v499_v11 = vld [vmem:[#allocation7 + $0x10] sm:$0xff]  ;;  %v7402_v12 = vpack.c.bf16 %v2072_v8, %v2071_v7  ;;  %v1659_v7 = vld [vmem:[#allocation20 + $0x78] sm:$0xff]  ;;  %v1628_v8 = vld [vmem:[#allocation19] sm:$0xff] }
 0x3d5   :  { %v1469_v16 = vmax.f32 %v1399_v14, 0.0  ;;  %v6118_v17 = vpop.f32.mrb[20].mxu1  ;;  %7303 = vmatprep.subr.bf16.mxu1 %v7302_v13  ;;  %v2074_v14 = vld [vmem:[#allocation13 + $0x28] sm:$0xff] }
 0x3d6   :  { %v1414_v9 = vadd.f32 %v6118_v17, %v9191_v2  ;;  %v1408_v18 = vpop.f32.mrb[21].mxu1  ;;  %7305 = vmatpush3.bf16.msra.mxu1 %v7302_v13  ;;  %v2073_v13 = vld [vmem:[#allocation13 + $0x20] sm:$0xff]  ;;  %v2075_v17 = vld [vmem:[#allocation13 + $0x30] sm:$0xff] }
 0x3d7   :  { %v7306_v19 = vpack.c.bf16 %v1470_v15, %v1469_v16  ;;  %v1409_v20 = vadd.f32 %v9191_v2, %v1408_v18  ;;  %v501_v15 = vld [vmem:[#allocation7 + $0x20] sm:$0xff]  ;;  %v7406_v16 = vpack.c.bf16 %v2074_v14, %v2073_v13  ;;  %v502_v18 = vld [vmem:[#allocation7 + $0x28] sm:$0xff]  ;;  %v9227_v13 = vld [vmem:[#allocation2 + $0x58] sm:$0xff] }
 0x3d8   :  { %v1472_v21 = vmax.f32 %v1414_v9, 0.0  ;;  %v2076_v9 = vld [vmem:[#allocation13 + $0x38] sm:$0xff]  ;;  %v9230_v14 = vld [vmem:[#allocation2 + $0x60] sm:$0xff] }
 0x3d9   :  { %v1471_v22 = vmax.f32 %v1409_v20, 0.0  ;;  %v6121_v23 = vpop.f32.mrb[22].mxu1  ;;  %7307 = vmatprep.subr.bf16.mxu1 %v7306_v19  ;;  %v7410_v20 = vpack.c.bf16 %v2076_v9, %v2075_v17  ;;  %v9236_v17 = vld [vmem:[#allocation2 + $0x10] sm:$0xff]  ;;  %v9239_v9 = vld [vmem:[#allocation2 + $0x68] sm:$0xff] }
 0x3da   :  { %v1424_v24 = vadd.f32 %v6121_v23, %v9191_v2  ;;  %v1418_v40 = vpop.f32.mrb[23].mxu1  ;;  %7309 = vmatpush3.bf16.msra.mxu1 %v7306_v19  ;;  %v503_v19 = vld [vmem:[#allocation7 + $0x30] sm:$0xff]  ;;  %v504_v23 = vld [vmem:[#allocation7 + $0x38] sm:$0xff] }
 0x3db   :  { %v7310_v41 = vpack.c.bf16 %v1472_v21, %v1471_v22  ;;  %v1419_v42 = vadd.f32 %v9191_v2, %v1418_v40  ;;  %v2077_v21 = vld [vmem:[#allocation13 + $0x40] sm:$0xff]  ;;  %v2078_v22 = vld [vmem:[#allocation13 + $0x48] sm:$0xff] }
 0x3dc   :  { %v1474_v43 = vmax.f32 %v1424_v24, 0.0  ;;  %v505_v24 = vld [vmem:[#allocation7 + $0x40] sm:$0xff]  ;;  %v7414_v40 = vpack.c.bf16 %v2078_v22, %v2077_v21  ;;  %v1635_v21 = vld [vmem:[#allocation19 + $0x38] sm:$0xff] }
 0x3dd   :  { %v1473_v44 = vmax.f32 %v1419_v42, 0.0  ;;  %v6124_v45 = vpop.f32.mrb[24].mxu1  ;;  %7311 = vmatprep.subr.bf16.mxu1 %v7310_v41  ;;  %v2080_v42 = vld [vmem:[#allocation13 + $0x58] sm:$0xff] }
 0x3de   :  { %v1434_v46 = vadd.f32 %v6124_v45, %v9191_v2  ;;  %v1428_v47 = vpop.f32.mrb[25].mxu1  ;;  %7313 = vmatpush3.bf16.msra.mxu1 %v7310_v41  ;;  %v2079_v41 = vld [vmem:[#allocation13 + $0x50] sm:$0xff]  ;;  %v9245_v22 = vld [vmem:[#allocation2 + $0x18] sm:$0xff] }
 0x3df   :  { %v7314_v33 = vpack.c.bf16 %v1474_v43, %v1473_v44  ;;  %v1429_v48 = vadd.f32 %v9191_v2, %v1428_v47  ;;  %v506_v43 = vld [vmem:[#allocation7 + $0x48] sm:$0xff]  ;;  %v507_v44 = vld [vmem:[#allocation7 + $0x50] sm:$0xff]  ;;  %v7418_v45 = vpack.c.bf16 %v2080_v42, %v2079_v41  ;;  %v1636_v41 = vld [vmem:[#allocation19 + $0x40] sm:$0xff] }
 0x3e0   :  { %v1476_v34 = vmax.f32 %v1434_v46, 0.0  ;;  %v2081_v46 = vld [vmem:[#allocation13 + $0x60] sm:$0xff]  ;;  %v2082_v47 = vld [vmem:[#allocation13 + $0x68] sm:$0xff] }
 0x3e1   :  { %v1475_v49 = vmax.f32 %v1429_v48, 0.0  ;;  %v6127_v35 = vpop.f32.mrb[26].mxu1  ;;  %7315 = vmatprep.subr.bf16.mxu1 %v7314_v33  ;;  %v509_v48 = vld [vmem:[#allocation7 + $0x60] sm:$0xff]  ;;  %v1637_v42 = vld [vmem:[#allocation19 + $0x48] sm:$0xff] }
 0x3e2   :  { %v1444_v50 = vadd.f32 %v6127_v35, %v9191_v2  ;;  %v1438_v36 = vpop.f32.mrb[27].mxu1  ;;  %7317 = vmatpush3.bf16.msra.mxu1 %v7314_v33  ;;  %v508_v33 = vld [vmem:[#allocation7 + $0x58] sm:$0xff] }
 0x3e3   :  { %v7318_v51 = vpack.c.bf16 %v1476_v34, %v1475_v49  ;;  %v1439_v37 = vadd.f32 %v9191_v2, %v1438_v36  ;;  %v7422_v34 = vpack.c.bf16 %v2082_v47, %v2081_v46  ;;  %v2083_v49 = vld [vmem:[#allocation13 + $0x70] sm:$0xff]  ;;  %v2084_v35 = vld [vmem:[#allocation13 + $0x78] sm:$0xff]  ;;  %v1645_v36 = vld [vmem:[#allocation20 + $0x8] sm:$0xff] }
 0x3e4   :  { %v1478_v52 = vmax.f32 %v1444_v50, 0.0  ;;  %v1644_v50 = vld [vmem:[#allocation20] sm:$0xff]  ;;  %v1638_v46 = vld [vmem:[#allocation19 + $0x50] sm:$0xff]  ;;  %v1639_v47 = vld [vmem:[#allocation19 + $0x58] sm:$0xff] }
 0x3e5   :  { %v1477_v38 = vmax.f32 %v1439_v37, 0.0  ;;  %v6130_v39 = vpop.f32.mrb[28].mxu1  ;;  %7319 = vmatprep.subr.bf16.mxu1 %v7318_v51  ;;  %v510_v37 = vld [vmem:[#allocation7 + $0x68] sm:$0xff] }
 0x3e6   :  { %v1454_v53 = vadd.f32 %v6130_v39, %v9191_v2  ;;  %v1448_v54 = vpop.f32.mrb[29].mxu1  ;;  %7321 = vmatpush3.bf16.msra.mxu1 %v7318_v51  ;;  %v7334_v51 = vpack.c.bf16 %v1645_v36, %v1644_v50  ;;  %v1646_v39 = vld [vmem:[#allocation20 + $0x10] sm:$0xff] }
 0x3e7   :  { %v7322_v55 = vpack.c.bf16 %v1478_v52, %v1477_v38  ;;  %v1449_v1 = vadd.f32 %v9191_v2, %v1448_v54  ;;  %v511_v52 = vld [vmem:[#allocation7 + $0x70] sm:$0xff]  ;;  %v7426_v38 = vpack.c.bf16 %v2084_v35, %v2083_v49  ;;  %v1640_v49 = vld [vmem:[#allocation19 + $0x60] sm:$0xff]  ;;  %v1641_v35 = vld [vmem:[#allocation19 + $0x68] sm:$0xff] }
 0x3e8   :  { %v1480_v56 = vmax.f32 %v1454_v53, 0.0  ;;  %7335 = vmatprep.subr.bf16.mxu0 %v7334_v51  ;;  %v1647_v53 = vld [vmem:[#allocation20 + $0x18] sm:$0xff]  ;;  %v7390_v50 = vpack.c.bf16 %v1641_v35, %v1640_v49  ;;  %v1642_v36 = vld [vmem:[#allocation19 + $0x70] sm:$0xff] }
 0x3e9   :  { %v1479_v57 = vmax.f32 %v1449_v1, 0.0  ;;  %v6133_v58 = vpop.f32.mrb[30].mxu1  ;;  %7323 = vmatprep.subr.bf16.mxu1 %v7322_v55  ;;  %7337 = vmatpush3.bf16.msra.mxu0 %v7334_v51  ;;  %v7338_v54 = vpack.c.bf16 %v1647_v53, %v1646_v39  ;;  %v1648_v1 = vld [vmem:[#allocation20 + $0x20] sm:$0xff]  ;;  %v1643_v51 = vld [vmem:[#allocation19 + $0x78] sm:$0xff] }
 0x3ea   :  { %v1464_v59 = vadd.f32 %v6133_v58, %v9191_v2  ;;  %v1458_v60 = vpop.f32.mrb[31].mxu1  ;;  %7325 = vmatpush3.bf16.msra.mxu1 %v7322_v55  ;;  %v512_v55 = vld [vmem:[#allocation7 + $0x78] sm:$0xff]  ;;  %v9210_v58 = vld [vmem:[#allocation2] sm:$0xff] }
 0x3eb   :  { %v7326_v61 = vpack.c.bf16 %v1480_v56, %v1479_v57  ;;  %v1459_v62 = vadd.f32 %v9191_v2, %v1458_v60  ;;  %v500_v2 = vld [vmem:[#allocation7 + $0x18] sm:$0xff]  ;;  %7339 = vmatprep.subr.bf16.mxu0 %v7338_v54  ;;  %v1649_v56 = vld [vmem:[#allocation20 + $0x28] sm:$0xff] }
 0x3ec   :  { %v1482_v63 = vmax.f32 %v1464_v59, 0.0  ;;  %v7342_v57 = vpack.c.bf16 %v1649_v56, %v1648_v1  ;;  %v1650_v59 = vld [vmem:[#allocation20 + $0x30] sm:$0xff]  ;;  %v1651_v60 = vld [vmem:[#allocation20 + $0x38] sm:$0xff] }
 0x3ed   :  { %v1481_v4 = vmax.f32 %v1459_v62, 0.0  ;;  %7327 = vmatprep.subr.bf16.mxu1 %v7326_v61  ;;  %7341 = vmatpush3.bf16.msra.mxu0 %v7338_v54  ;;  %v1652_v62 = vld [vmem:[#allocation20 + $0x40] sm:$0xff] }
 0x3ee   :  { %7329 = vmatpush3.bf16.msra.mxu1 %v7326_v61  ;;  %7343 = vmatprep.subr.bf16.mxu0 %v7342_v57  ;;  %v7346_v61 = vpack.c.bf16 %v1651_v60, %v1650_v59 }
 0x3ef   :  { %v7330_v5 = vpack.c.bf16 %v1482_v63, %v1481_v4  ;;  %v1653_v63 = vld [vmem:[#allocation20 + $0x48] sm:$0xff]  ;;  %v1655_v4 = vld [vmem:[#allocation20 + $0x58] sm:$0xff] }
 0x3f0   :  { %v7350_v0 = vpack.c.bf16 %v1653_v63, %v1652_v62 }
 0x3f1   :  { %7331 = vmatprep.subr.bf16.mxu1 %v7330_v5  ;;  %7345 = vmatpush3.bf16.msra.mxu0 %v7342_v57 }
 0x3f2   :  { %7333 = vmatpush3.bf16.msra.mxu1 %v7330_v5  ;;  %7347 = vmatprep.subr.bf16.mxu0 %v7346_v61  ;;  %v7354_v5 = vpack.c.bf16 %v1655_v4, %v1654_v3 }
 0x3f3   :  { %7399 = vmatprep.subr.bf16.mxu1 %v7398_v6 }
 0x3f5   :  { %6167 = vmatmul.mubr.f32.vlgmr.msra.gmra.mrb[32].mxu1 %v498_v10  ;;  %7349 = vmatpush3.bf16.msra.mxu0 %v7346_v61  ;;  %v1629_v10 = vld [vmem:[#allocation19 + $0x8] sm:$0xff]  ;;  %v513_v61 = vld [vmem:[#allocation8] sm:$0xff] }
 0x3f6   :  { %7401 = vmatpush3.bf16.msra.mxu1 %v7398_v6  ;;  %6169 = vmatprep.mubr.f32.mxu1 %v499_v11  ;;  %v1658_v6 = vld [vmem:[#allocation20 + $0x70] sm:$0xff] }
 0x3f7   :  { %7403 = vmatprep.subr.bf16.mxu1 %v7402_v12  ;;  %7351 = vmatprep.subr.bf16.mxu0 %v7350_v0  ;;  %v9224_v11 = vld [vmem:[#allocation2 + $0x50] sm:$0xff] }
 0x3f9   :  { %6170 = vmatmul.mubr.f32.gmra.mrb[34].mxu1 %v500_v2  ;;  %7353 = vmatpush3.bf16.msra.mxu0 %v7350_v0  ;;  %v1632_v2 = vld [vmem:[#allocation19 + $0x20] sm:$0xff] }
 0x3fa   :  { %7405 = vmatpush3.bf16.msra.mxu1 %v7402_v12  ;;  %6172 = vmatprep.mubr.f32.mxu1 %v501_v15  ;;  %v1631_v12 = vld [vmem:[#allocation19 + $0x18] sm:$0xff]  ;;  %v1633_v15 = vld [vmem:[#allocation19 + $0x28] sm:$0xff] }
 0x3fb   :  { %7407 = vmatprep.subr.bf16.mxu1 %v7406_v16  ;;  %7355 = vmatprep.subr.bf16.mxu0 %v7354_v5 }
 0x3fd   :  { %6173 = vmatmul.mubr.f32.gmra.mrb[36].mxu1 %v502_v18  ;;  %7357 = vmatpush3.bf16.msra.mxu0 %v7354_v5  ;;  %v7374_v18 = vpack.c.bf16 %v1633_v15, %v1632_v2 }
 0x3fe   :  { %7409 = vmatpush3.bf16.msra.mxu1 %v7406_v16  ;;  %6175 = vmatprep.mubr.f32.mxu1 %v503_v19  ;;  %v9233_v16 = vld [vmem:[#allocation2 + $0x8] sm:$0xff]  ;;  %v9242_v19 = vld [vmem:[#allocation2 + $0x70] sm:$0xff] }
 0x3ff   :  { %7411 = vmatprep.subr.bf16.mxu1 %v7410_v20 }
 0x401   :  { %6176 = vmatmul.mubr.f32.gmra.mrb[38].mxu1 %v504_v23  ;;  %v9248_v23 = vld [vmem:[#allocation2 + $0x20] sm:$0xff] }
 0x402   :  { %7413 = vmatpush3.bf16.msra.mxu1 %v7410_v20  ;;  %6178 = vmatprep.mubr.f32.mxu1 %v505_v24  ;;  %v1634_v20 = vld [vmem:[#allocation19 + $0x30] sm:$0xff]  ;;  %v9251_v24 = vld [vmem:[#allocation2 + $0x78] sm:$0xff] }
 0x403   :  { %7415 = vmatprep.subr.bf16.mxu1 %v7414_v40 }
 0x405   :  { %6179 = vmatmul.mubr.f32.gmra.mrb[40].mxu1 %v506_v43  ;;  %v9254_v43 = vld [vmem:[#allocation2 + $0x28] sm:$0xff] }
 0x406   :  { %7417 = vmatpush3.bf16.msra.mxu1 %v7414_v40  ;;  %6181 = vmatprep.mubr.f32.mxu1 %v507_v44  ;;  %v7378_v40 = vpack.c.bf16 %v1635_v21, %v1634_v20  ;;  %v9257_v44 = vld [vmem:[#allocation2 + $0x30] sm:$0xff] }
 0x407   :  { %7419 = vmatprep.subr.bf16.mxu1 %v7418_v45 }
 0x409   :  { %6182 = vmatmul.mubr.f32.gmra.mrb[42].mxu1 %v508_v33  ;;  %v9260_v33 = vld [vmem:[#allocation2 + $0x38] sm:$0xff] }
 0x40a   :  { %7421 = vmatpush3.bf16.msra.mxu1 %v7418_v45  ;;  %6184 = vmatprep.mubr.f32.mxu1 %v509_v48  ;;  %v7382_v45 = vpack.c.bf16 %v1637_v42, %v1636_v41  ;;  %v9263_v48 = vld [vmem:[#allocation2 + $0x40] sm:$0xff] }
 0x40b   :  { %7423 = vmatprep.subr.bf16.mxu1 %v7422_v34 }
 0x40d   :  { %6185 = vmatmul.mubr.f32.gmra.mrb[44].mxu1 %v510_v37  ;;  %v7394_v37 = vpack.c.bf16 %v1643_v51, %v1642_v36 }
 0x40e   :  { %7425 = vmatpush3.bf16.msra.mxu1 %v7422_v34  ;;  %6187 = vmatprep.mubr.f32.mxu1 %v511_v52  ;;  %v7386_v34 = vpack.c.bf16 %v1639_v47, %v1638_v46  ;;  %v5106_v52 = vld [vmem:[%s9911_s1] ss:$0 sm:$0xff] }
 0x40f   :  { %7427 = vmatprep.subr.bf16.mxu1 %v7426_v38 }
 0x411   :  { %6188 = vmatmul.mubr.f32.gmra.mrb[46].mxu1 %v512_v55 }
 0x412   :  { %7429 = vmatpush3.bf16.msra.mxu1 %v7426_v38  ;;  %6334 = vmatprep.mubr.f32.mxu1 %v9210_v58 }
 0x415   :  { %6335 = vmatmul.mubr.f32.vlgmr.msra.gmra.mrb[48].mxu1 %v9094_v25  ;;  %v1656_v25 = vld [vmem:[#allocation20 + $0x60] sm:$0xff] }
 0x416   :  { %6337 = vmatprep.mubr.f32.mxu1 %v9096_v26  ;;  %v1657_v26 = vld [vmem:[#allocation20 + $0x68] sm:$0xff] }
 0x419   :  { %6338 = vmatmul.mubr.f32.gmra.mrb[50].mxu1 %v9100_v27  ;;  %v7358_v27 = vpack.c.bf16 %v1657_v26, %v1656_v25 }
 0x41a   :  { %6340 = vmatprep.mubr.f32.mxu1 %v9102_v28  ;;  %v7362_v28 = vpack.c.bf16 %v1659_v7, %v1658_v6 }
 0x41b   :  { %7359 = vmatprep.subr.bf16.mxu0 %v7358_v27 }
 0x41c   :  { %7361 = vmatpush3.bf16.msra.mxu0 %v7358_v27 }
 0x41d   :  { %6341 = vmatmul.mubr.f32.gmra.mrb[52].mxu1 %v9106_v29  ;;  %v9221_v29 = vld [vmem:[#allocation2 + $0x48] sm:$0xff]  ;;  %7363 = vmatprep.subr.bf16.mxu0 %v7362_v28 }
 0x41e   :  { %6343 = vmatprep.mubr.f32.mxu1 %v9108_v30  ;;  %v7366_v30 = vpack.c.bf16 %v1629_v10, %v1628_v8 }
 0x420   :  { %7365 = vmatpush3.bf16.msra.mxu0 %v7362_v28 }
 0x421   :  { %6344 = vmatmul.mubr.f32.gmra.mrb[54].mxu1 %v9112_v31  ;;  %v1630_v31 = vld [vmem:[#allocation19 + $0x10] sm:$0xff]  ;;  %7367 = vmatprep.subr.bf16.mxu0 %v7366_v30 }
 0x422   :  { %6346 = vmatprep.mubr.f32.mxu1 %v9114_v32  ;;  %v7370_v32 = vpack.c.bf16 %v1631_v12, %v1630_v31 }
 0x423   :  { %6223 = vmatmul.mubr.f32.vlgmr.msra.gmra.mrb[46].mxu0 %v9233_v16 }
 0x424   :  { %7369 = vmatpush3.bf16.msra.mxu0 %v7366_v30  ;;  %6225 = vmatprep.mubr.f32.mxu0 %v9236_v17 }
 0x425   :  { %6347 = vmatmul.mubr.f32.gmra.mrb[56].mxu1 %v9221_v29  ;;  %7371 = vmatprep.subr.bf16.mxu0 %v7370_v32 }
 0x426   :  { %6349 = vmatprep.mubr.f32.mxu1 %v9224_v11 }
 0x427   :  { %6226 = vmatmul.mubr.f32.gmra.mrb[48].mxu0 %v9245_v22 }
 0x428   :  { %7373 = vmatpush3.bf16.msra.mxu0 %v7370_v32  ;;  %6228 = vmatprep.mubr.f32.mxu0 %v9248_v23 }
 0x429   :  { %6350 = vmatmul.mubr.f32.gmra.mrb[58].mxu1 %v9227_v13  ;;  %7375 = vmatprep.subr.bf16.mxu0 %v7374_v18 }
 0x42a   :  { %6352 = vmatprep.mubr.f32.mxu1 %v9230_v14 }
 0x42b   :  { %6229 = vmatmul.mubr.f32.gmra.mrb[50].mxu0 %v9254_v43 }
 0x42c   :  { %7377 = vmatpush3.bf16.msra.mxu0 %v7374_v18  ;;  %6231 = vmatprep.mubr.f32.mxu0 %v9257_v44 }
 0x42d   :  { %6353 = vmatmul.mubr.f32.gmra.mrb[60].mxu1 %v9239_v9  ;;  %7379 = vmatprep.subr.bf16.mxu0 %v7378_v40 }
 0x42e   :  { %6355 = vmatprep.mubr.f32.mxu1 %v9242_v19 }
 0x42f   :  { %6232 = vmatmul.mubr.f32.gmra.mrb[52].mxu0 %v9260_v33 }
 0x430   :  { %7381 = vmatpush3.bf16.msra.mxu0 %v7378_v40  ;;  %6234 = vmatprep.mubr.f32.mxu0 %v9263_v48 }
 0x431   :  { %6356 = vmatmul.mubr.f32.gmra.mrb[62].mxu1 %v9251_v24  ;;  %7383 = vmatprep.subr.bf16.mxu0 %v7382_v45 }
 0x432   :  { %6390 = vmatprep.mubr.f32.mxu1 %v513_v61 }
 0x433   :  { %6235 = vmatmul.mubr.f32.gmra.mrb[54].mxu0 %v9221_v29 }
 0x434   :  { %7385 = vmatpush3.bf16.msra.mxu0 %v7382_v45  ;;  %6237 = vmatprep.mubr.f32.mxu0 %v9224_v11  ;;  %v9283_v45 = vld [vmem:[%s9912_s24] ss:$0 sm:$0xff] }
 0x435   :  { %7387 = vmatprep.subr.bf16.mxu0 %v7386_v34 }
 0x437   :  { %6238 = vmatmul.mubr.f32.gmra.mrb[56].mxu0 %v9227_v13 }
 0x438   :  { %7389 = vmatpush3.bf16.msra.mxu0 %v7386_v34  ;;  %6240 = vmatprep.mubr.f32.mxu0 %v9230_v14 }
 0x439   :  { %7391 = vmatprep.subr.bf16.mxu0 %v7390_v50 }
 0x43b   :  { %6241 = vmatmul.mubr.f32.gmra.mrb[58].mxu0 %v9239_v9 }
 0x43c   :  { %7393 = vmatpush3.bf16.msra.mxu0 %v7390_v50  ;;  %6243 = vmatprep.mubr.f32.mxu0 %v9242_v19 }
 0x43d   :  { %7395 = vmatprep.subr.bf16.mxu0 %v7394_v37 }
 0x43f   :  { %6244 = vmatmul.mubr.f32.gmra.mrb[60].mxu0 %v9251_v24 }
 0x440   :  { %7397 = vmatpush3.bf16.msra.mxu0 %v7394_v37 }
 0x483   :  { %v6056_v38 = vpop.f32.mrb[16].mxu0 }
 0x484   :  { %v1101_v39 = vpop.f32.mrb[17].mxu0  ;;  %v9276_v54 = vadd.f32 %v6056_v38, %v5106_v52 }
 0x485   :  { %v9274_v53 = vadd.f32 %v5106_v52, %v1101_v39 }
 0x486   :  { %v1204_v59 = vmul.f32 %v9276_v54, %v9276_v54 }
 0x487   :  { %v6059_v55 = vpop.f32.mrb[32].mxu0  ;;  %v1203_v1 = vmul.f32 %v9274_v53, %v9274_v53 }
 0x488   :  { %v1111_v56 = vpop.f32.mrb[33].mxu0 }
 0x489   :  { %1219 = vadd.xlane.f32.xlu0 %v1203_v1 }
 0x48b   :  { %v6062_v57 = vpop.f32.mrb[34].mxu0 }
 0x48c   :  { %v1121_v60 = vpop.f32.mrb[35].mxu0 }
 0x48d   :  { %1221 = vadd.xlane.f32.xlu0 %v1204_v59 }
 0x48f   :  { %v6065_v62 = vpop.f32.mrb[36].mxu0 }
 0x490   :  { %v1131_v63 = vpop.f32.mrb[37].mxu0 }
 0x493   :  { %v6068_v0 = vpop.f32.mrb[38].mxu0 }
 0x494   :  { %v1141_v3 = vpop.f32.mrb[39].mxu0 }
 0x497   :  { %v6071_v4 = vpop.f32.mrb[40].mxu0 }
 0x498   :  { %v1151_v5 = vpop.f32.mrb[41].mxu0 }
 0x49b   :  { %v6074_v25 = vpop.f32.mrb[42].mxu0 }
 0x49c   :  { %v1161_v26 = vpop.f32.mrb[43].mxu0 }
 0x49f   :  { %v6077_v6 = vpop.f32.mrb[44].mxu0 }
 0x4a0   :  { %v1171_v27 = vpop.f32.mrb[45].mxu0 }
 0x4c8   :  { %v6168_v7 = vpop.f32.mrb[32].mxu1 }
 0x4c9   :  { %v1549_v28 = vpop.f32.mrb[33].mxu1 }
 0x4ca   :  { %6278 = vmatprep.mubr.f32.mxu0 %v1549_v28 }
 0x4cb   :  { %6279 = vmatmul.mubr.f32.vlgmr.msra.gmra.mrb[62].mxu0 %v6168_v7 }
 0x4cc   :  { %v6171_v8 = vpop.f32.mrb[34].mxu1 }
 0x4cd   :  { %v1559_v10 = vpop.f32.mrb[35].mxu1 }
 0x4ce   :  { %6281 = vmatprep.mubr.f32.mxu0 %v1559_v10 }
 0x4cf   :  { %6282 = vmatmul.mubr.f32.gmra.mrb[48].mxu0 %v6171_v8 }
 0x4d0   :  { %v6174_v30 = vpop.f32.mrb[36].mxu1 }
 0x4d1   :  { %v1569_v31 = vpop.f32.mrb[37].mxu1 }
 0x4d2   :  { %6284 = vmatprep.mubr.f32.mxu0 %v1569_v31 }
 0x4d3   :  { %6285 = vmatmul.mubr.f32.gmra.mrb[50].mxu0 %v6174_v30 }
 0x4d4   :  { %v6177_v12 = vpop.f32.mrb[38].mxu1 }
 0x4d5   :  { %v1579_v32 = vpop.f32.mrb[39].mxu1 }
 0x4d6   :  { %6287 = vmatprep.mubr.f32.mxu0 %v1579_v32 }
 0x4d7   :  { %6288 = vmatmul.mubr.f32.gmra.mrb[52].mxu0 %v6177_v12 }
 0x4d8   :  { %v6180_v2 = vpop.f32.mrb[40].mxu1 }
 0x4d9   :  { %v1589_v15 = vpop.f32.mrb[41].mxu1 }
 0x4da   :  { %6290 = vmatprep.mubr.f32.mxu0 %v1589_v15 }
 0x4db   :  { %6291 = vmatmul.mubr.f32.gmra.mrb[54].mxu0 %v6180_v2 }
 0x4dc   :  { %v6183_v18 = vpop.f32.mrb[42].mxu1 }
 0x4dd   :  { %v1599_v20 = vpop.f32.mrb[43].mxu1 }
 0x4de   :  { %6293 = vmatprep.mubr.f32.mxu0 %v1599_v20 }
 0x4df   :  { %6294 = vmatmul.mubr.f32.gmra.mrb[56].mxu0 %v6183_v18 }
 0x4e0   :  { %v6186_v21 = vpop.f32.mrb[44].mxu1 }
 0x4e1   :  { %v1609_v40 = vpop.f32.mrb[45].mxu1 }
 0x4e2   :  { %6296 = vmatprep.mubr.f32.mxu0 %v1609_v40 }
 0x4e3   :  { %6297 = vmatmul.mubr.f32.gmra.mrb[58].mxu0 %v6186_v21 }
 0x4e4   :  { %v6189_v41 = vpop.f32.mrb[46].mxu1 }
 0x4e5   :  { %v1619_v42 = vpop.f32.mrb[47].mxu1 }
 0x4e6   :  { %6299 = vmatprep.mubr.f32.mxu0 %v1619_v42 }
 0x4e7   :  { %6300 = vmatmul.mubr.f32.gmra.mrb[60].mxu0 %v6189_v41 }
 0x4e8   :  { %v6336_v46 = vpop.f32.mrb[48].mxu1  ;;  %6446 = vmatprep.mubr.f32.mxu0 %v9210_v58 }
 0x4e9   :  { %v2164_v47 = vadd.f32 %v6336_v46, %v9283_v45  ;;  %v2158_v34 = vpop.f32.mrb[49].mxu1 }
 0x4ea   :  { %v2159_v49 = vadd.f32 %v9283_v45, %v2158_v34 }
 0x4eb   :  { %v2238_v35 = vmax.f32 %v2164_v47, 0.0 }
 0x4ec   :  { %v2237_v50 = vmax.f32 %v2159_v49, 0.0  ;;  %v6339_v36 = vpop.f32.mrb[50].mxu1 }
 0x4ed   :  { %v2174_v51 = vadd.f32 %v6339_v36, %v9283_v45  ;;  %v2168_v37 = vpop.f32.mrb[51].mxu1 }
 0x4ee   :  { %v7430_v52 = vpack.c.bf16 %v2238_v35, %v2237_v50  ;;  %v2169_v38 = vadd.f32 %v9283_v45, %v2168_v37 }
 0x4ef   :  { %v2240_v39 = vmax.f32 %v2174_v51, 0.0 }
 0x4f0   :  { %v2239_v55 = vmax.f32 %v2169_v38, 0.0  ;;  %v6342_v1 = vpop.f32.mrb[52].mxu1  ;;  %7431 = vmatprep.subr.bf16.mxu1 %v7430_v52 }
 0x4f1   :  { %v2184_v58 = vadd.f32 %v6342_v1, %v9283_v45  ;;  %v2178_v56 = vpop.f32.mrb[53].mxu1  ;;  %7433 = vmatpush3.bf16.msra.mxu1 %v7430_v52  ;;  %v2414_v1 = vld [vmem:[#allocation11] sm:$0xff] }
 0x4f2   :  { %v7434_v57 = vpack.c.bf16 %v2240_v39, %v2239_v55  ;;  %v2179_v59 = vadd.f32 %v9283_v45, %v2178_v56  ;;  %v514_v55 = vld [vmem:[#allocation8 + $0x8] sm:$0xff] }
 0x4f3   :  { %v2242_v60 = vmax.f32 %v2184_v58, 0.0  ;;  %v2415_v58 = vld [vmem:[#allocation11 + $0x8] sm:$0xff] }
 0x4f4   :  { %v2241_v61 = vmax.f32 %v2179_v59, 0.0  ;;  %v6345_v62 = vpop.f32.mrb[54].mxu1  ;;  %7435 = vmatprep.subr.bf16.mxu1 %v7434_v57  ;;  %v7462_v56 = vpack.c.bf16 %v2415_v58, %v2414_v1  ;;  %v2417_v59 = vld [vmem:[#allocation11 + $0x18] sm:$0xff] }
 0x4f5   :  { %v2194_v63 = vadd.f32 %v6345_v62, %v9283_v45  ;;  %v2188_v0 = vpop.f32.mrb[55].mxu1  ;;  %7437 = vmatpush3.bf16.msra.mxu1 %v7434_v57  ;;  %v2416_v57 = vld [vmem:[#allocation11 + $0x10] sm:$0xff] }
 0x4f6   :  { %v7438_v3 = vpack.c.bf16 %v2242_v60, %v2241_v61  ;;  %v2189_v4 = vadd.f32 %v9283_v45, %v2188_v0  ;;  %v6224_v15 = vpop.f32.mrb[46].mxu0  ;;  %7463 = vmatprep.subr.bf16.mxu0 %v7462_v56  ;;  %v7466_v60 = vpack.c.bf16 %v2417_v59, %v2416_v57  ;;  %v2419_v61 = vld [vmem:[#allocation11 + $0x28] sm:$0xff]  ;;  %v2421_v0 = vld [vmem:[#allocation11 + $0x38] sm:$0xff] }
 0x4f7   :  { %v2244_v5 = vmax.f32 %v2194_v63, 0.0  ;;  %v1726_v20 = vpop.f32.mrb[47].mxu0  ;;  %7465 = vmatpush3.bf16.msra.mxu0 %v7462_v56  ;;  %v2420_v63 = vld [vmem:[#allocation11 + $0x30] sm:$0xff] }
 0x4f8   :  { %v2243_v25 = vmax.f32 %v2189_v4, 0.0  ;;  %v6348_v26 = vpop.f32.mrb[56].mxu1  ;;  %7439 = vmatprep.subr.bf16.mxu1 %v7438_v3  ;;  %7467 = vmatprep.subr.bf16.mxu0 %v7466_v60  ;;  %v2422_v4 = vld [vmem:[#allocation11 + $0x40] sm:$0xff] }
 0x4f9   :  { %v2204_v6 = vadd.f32 %v6348_v26, %v9283_v45  ;;  %v2198_v27 = vpop.f32.mrb[57].mxu1  ;;  %7441 = vmatpush3.bf16.msra.mxu1 %v7438_v3  ;;  %v7474_v3 = vpack.c.bf16 %v2421_v0, %v2420_v63  ;;  %v2424_v26 = vld [vmem:[#allocation11 + $0x50] sm:$0xff] }
 0x4fa   :  { %v7442_v7 = vpack.c.bf16 %v2244_v5, %v2243_v25  ;;  %v2199_v28 = vadd.f32 %v9283_v45, %v2198_v27  ;;  %v2423_v5 = vld [vmem:[#allocation11 + $0x48] sm:$0xff] }
 0x4fb   :  { %v2246_v8 = vmax.f32 %v2204_v6, 0.0  ;;  %7469 = vmatpush3.bf16.msra.mxu0 %v7466_v60  ;;  %v7478_v25 = vpack.c.bf16 %v2423_v5, %v2422_v4  ;;  %v2425_v6 = vld [vmem:[#allocation11 + $0x58] sm:$0xff] }
 0x4fc   :  { %v2245_v10 = vmax.f32 %v2199_v28, 0.0  ;;  %v6351_v30 = vpop.f32.mrb[58].mxu1  ;;  %7443 = vmatprep.subr.bf16.mxu1 %v7442_v7  ;;  %v7482_v27 = vpack.c.bf16 %v2425_v6, %v2424_v26  ;;  %v2427_v28 = vld [vmem:[#allocation11 + $0x68] sm:$0xff] }
 0x4fd   :  { %v2214_v31 = vadd.f32 %v6351_v30, %v9283_v45  ;;  %v2208_v12 = vpop.f32.mrb[59].mxu1  ;;  %7445 = vmatpush3.bf16.msra.mxu1 %v7442_v7  ;;  %v2426_v7 = vld [vmem:[#allocation11 + $0x60] sm:$0xff]  ;;  %v2429_v30 = vld [vmem:[#allocation11 + $0x78] sm:$0xff] }
 0x4fe   :  { %v7446_v32 = vpack.c.bf16 %v2246_v8, %v2245_v10  ;;  %v2209_v2 = vadd.f32 %v9283_v45, %v2208_v12  ;;  %v7486_v8 = vpack.c.bf16 %v2427_v28, %v2426_v7  ;;  %v2428_v10 = vld [vmem:[#allocation11 + $0x70] sm:$0xff]  ;;  %v2398_v12 = vld [vmem:[#allocation10] sm:$0xff] }
 0x4ff   :  { %v2248_v18 = vmax.f32 %v2214_v31, 0.0  ;;  %v7490_v31 = vpack.c.bf16 %v2429_v30, %v2428_v10 }
 0x500   :  { %v2247_v21 = vmax.f32 %v2209_v2, 0.0  ;;  %v6354_v40 = vpop.f32.mrb[60].mxu1  ;;  %7447 = vmatprep.subr.bf16.mxu1 %v7446_v32  ;;  %v2400_v2 = vld [vmem:[#allocation10 + $0x10] sm:$0xff] }
 0x501   :  { %v2224_v41 = vadd.f32 %v6354_v40, %v9283_v45  ;;  %v2218_v42 = vpop.f32.mrb[61].mxu1  ;;  %7449 = vmatpush3.bf16.msra.mxu1 %v7446_v32  ;;  %v2399_v32 = vld [vmem:[#allocation10 + $0x8] sm:$0xff] }
 0x502   :  { %v7450_v46 = vpack.c.bf16 %v2248_v18, %v2247_v21  ;;  %v2219_v47 = vadd.f32 %v9283_v45, %v2218_v42  ;;  %v7494_v15 = vpack.c.bf16 %v2399_v32, %v2398_v12  ;;  %v2401_v18 = vld [vmem:[#allocation10 + $0x18] sm:$0xff]  ;;  %v2402_v21 = vld [vmem:[#allocation10 + $0x20] sm:$0xff]  ;;  %v2403_v40 = vld [vmem:[#allocation10 + $0x28] sm:$0xff] }
 0x503   :  { %v2250_v34 = vmax.f32 %v2224_v41, 0.0  ;;  %v7498_v20 = vpack.c.bf16 %v2401_v18, %v2400_v2  ;;  %v7502_v41 = vpack.c.bf16 %v2403_v40, %v2402_v21  ;;  %v2404_v42 = vld [vmem:[#allocation10 + $0x30] sm:$0xff] }
 0x504   :  { %v2249_v49 = vmax.f32 %v2219_v47, 0.0  ;;  %v6357_v35 = vpop.f32.mrb[62].mxu1  ;;  %7451 = vmatprep.subr.bf16.mxu1 %v7450_v46 }
 0x505   :  { %v2234_v50 = vadd.f32 %v6357_v35, %v9283_v45  ;;  %v2228_v36 = vpop.f32.mrb[63].mxu1  ;;  %7453 = vmatpush3.bf16.msra.mxu1 %v7450_v46  ;;  %v2405_v46 = vld [vmem:[#allocation10 + $0x38] sm:$0xff] }
 0x506   :  { %v7454_v51 = vpack.c.bf16 %v2250_v34, %v2249_v49  ;;  %v2229_v37 = vadd.f32 %v9283_v45, %v2228_v36  ;;  %v2418_v45 = vld [vmem:[#allocation11 + $0x20] sm:$0xff]  ;;  %v7506_v47 = vpack.c.bf16 %v2405_v46, %v2404_v42  ;;  %v2407_v49 = vld [vmem:[#allocation10 + $0x48] sm:$0xff]  ;;  %v2409_v35 = vld [vmem:[#allocation10 + $0x58] sm:$0xff] }
 0x507   :  { %v2252_v52 = vmax.f32 %v2234_v50, 0.0  ;;  %v7470_v62 = vpack.c.bf16 %v2419_v61, %v2418_v45  ;;  %v2406_v34 = vld [vmem:[#allocation10 + $0x40] sm:$0xff]  ;;  %v2411_v50 = vld [vmem:[#allocation10 + $0x68] sm:$0xff]  ;;  %v2413_v36 = vld [vmem:[#allocation10 + $0x78] sm:$0xff] }
 0x508   :  { %v2251_v38 = vmax.f32 %v2229_v37, 0.0  ;;  %7455 = vmatprep.subr.bf16.mxu1 %v7454_v51 }
 0x509   :  { %7457 = vmatpush3.bf16.msra.mxu1 %v7454_v51  ;;  %7471 = vmatprep.subr.bf16.mxu0 %v7470_v62 }
 0x50a   :  { %v7458_v39 = vpack.c.bf16 %v2252_v52, %v2251_v38  ;;  %7473 = vmatpush3.bf16.msra.mxu0 %v7470_v62 }
 0x50b   :  { %7475 = vmatprep.subr.bf16.mxu0 %v7474_v3 }
 0x50c   :  { %7459 = vmatprep.subr.bf16.mxu1 %v7458_v39 }
 0x50d   :  { %7461 = vmatpush3.bf16.msra.mxu1 %v7458_v39 }
 0x50e   :  { %7477 = vmatpush3.bf16.msra.mxu0 %v7474_v3 }
 0x50f   :  { %7479 = vmatprep.subr.bf16.mxu0 %v7478_v25 }
 0x510   :  { %6391 = vmatmul.mubr.f32.vlgmr.msra.gmra.mrb[64].mxu1 %v514_v55 }
 0x512   :  { %7481 = vmatpush3.bf16.msra.mxu0 %v7478_v25 }
 0x513   :  { %7483 = vmatprep.subr.bf16.mxu0 %v7482_v27 }
 0x516   :  { %7485 = vmatpush3.bf16.msra.mxu0 %v7482_v27 }
 0x517   :  { %7487 = vmatprep.subr.bf16.mxu0 %v7486_v8 }
 0x51a   :  { %7489 = vmatpush3.bf16.msra.mxu0 %v7486_v8 }
 0x51b   :  { %7491 = vmatprep.subr.bf16.mxu0 %v7490_v31 }
 0x51e   :  { %7493 = vmatpush3.bf16.msra.mxu0 %v7490_v31 }
 0x51f   :  { %7495 = vmatprep.subr.bf16.mxu0 %v7494_v15 }
 0x521   :  { %6447 = vmatmul.mubr.f32.vlgmr.msra.gmra.mrb[64].mxu0 %v9233_v16  ;;  %v7510_v16 = vpack.c.bf16 %v2407_v49, %v2406_v34 }
 0x522   :  { %7497 = vmatpush3.bf16.msra.mxu0 %v7494_v15  ;;  %6449 = vmatprep.mubr.f32.mxu0 %v9236_v17  ;;  %v2408_v17 = vld [vmem:[#allocation10 + $0x50] sm:$0xff] }
 0x523   :  { %7499 = vmatprep.subr.bf16.mxu0 %v7498_v20 }
 0x525   :  { %6450 = vmatmul.mubr.f32.gmra.mrb[66].mxu0 %v9245_v22  ;;  %v7514_v22 = vpack.c.bf16 %v2409_v35, %v2408_v17  ;;  %v5110_v35 = vld [vmem:[%s9914_s2] ss:$0 sm:$0xff] }
 0x526   :  { %7501 = vmatpush3.bf16.msra.mxu0 %v7498_v20  ;;  %6452 = vmatprep.mubr.f32.mxu0 %v9248_v23  ;;  %v2410_v23 = vld [vmem:[#allocation10 + $0x60] sm:$0xff] }
 0x527   :  { %7503 = vmatprep.subr.bf16.mxu0 %v7502_v41 }
 0x529   :  { %6453 = vmatmul.mubr.f32.gmra.mrb[68].mxu0 %v9254_v43  ;;  %v7518_v43 = vpack.c.bf16 %v2411_v50, %v2410_v23 }
 0x52a   :  { %7505 = vmatpush3.bf16.msra.mxu0 %v7502_v41  ;;  %6455 = vmatprep.mubr.f32.mxu0 %v9257_v44  ;;  %v2412_v44 = vld [vmem:[#allocation10 + $0x70] sm:$0xff] }
 0x52b   :  { %7507 = vmatprep.subr.bf16.mxu0 %v7506_v47 }
 0x52d   :  { %6456 = vmatmul.mubr.f32.gmra.mrb[70].mxu0 %v9260_v33  ;;  %v7522_v33 = vpack.c.bf16 %v2413_v36, %v2412_v44 }
 0x52e   :  { %7509 = vmatpush3.bf16.msra.mxu0 %v7506_v47  ;;  %6458 = vmatprep.mubr.f32.mxu0 %v9263_v48  ;;  %v5108_v48 = vld [vmem:[%s9913_s4] ss:$0 sm:$0xff] }
 0x52f   :  { %7511 = vmatprep.subr.bf16.mxu0 %v7510_v16 }
 0x531   :  { %6459 = vmatmul.mubr.f32.gmra.mrb[72].mxu0 %v9221_v29 }
 0x532   :  { %7513 = vmatpush3.bf16.msra.mxu0 %v7510_v16  ;;  %6461 = vmatprep.mubr.f32.mxu0 %v9224_v11 }
 0x533   :  { %7515 = vmatprep.subr.bf16.mxu0 %v7514_v22 }
 0x535   :  { %6462 = vmatmul.mubr.f32.gmra.mrb[74].mxu0 %v9227_v13 }
 0x536   :  { %7517 = vmatpush3.bf16.msra.mxu0 %v7514_v22  ;;  %6464 = vmatprep.mubr.f32.mxu0 %v9230_v14 }
 0x537   :  { %7519 = vmatprep.subr.bf16.mxu0 %v7518_v43 }
 0x539   :  { %6465 = vmatmul.mubr.f32.gmra.mrb[76].mxu0 %v9239_v9 }
 0x53a   :  { %7521 = vmatpush3.bf16.msra.mxu0 %v7518_v43  ;;  %6467 = vmatprep.mubr.f32.mxu0 %v9242_v19 }
 0x53b   :  { %7523 = vmatprep.subr.bf16.mxu0 %v7522_v33 }
 0x53d   :  { %6468 = vmatmul.mubr.f32.gmra.mrb[78].mxu0 %v9251_v24 }
 0x53e   :  { %7525 = vmatpush3.bf16.msra.mxu0 %v7522_v33 }
 0x59e   :  { %v6280_v29 = vpop.f32.mrb[62].mxu0 }
 0x59f   :  { %v1871_v11 = vpop.f32.mrb[63].mxu0 }
 0x5a2   :  { %v6283_v51 = vpop.f32.mrb[48].mxu0 }
 0x5a3   :  { %v9318_v37 = vadd.f32 %v6283_v51, %v5108_v48  ;;  %v1881_v13 = vpop.f32.mrb[49].mxu0 }
 0x5a4   :  { %v9320_v52 = vadd.f32 %v5108_v48, %v1881_v13 }
 0x5a5   :  { %v1976_v33 = vmul.f32 %v9318_v37, %v9318_v37 }
 0x5a6   :  { %v6286_v14 = vpop.f32.mrb[50].mxu0  ;;  %v1975_v9 = vmul.f32 %v9320_v52, %v9320_v52 }
 0x5a7   :  { %v9324_v38 = vadd.f32 %v6286_v14, %v5108_v48  ;;  %v1891_v19 = vpop.f32.mrb[51].mxu0 }
 0x5a8   :  { %v9326_v39 = vadd.f32 %v5108_v48, %v1891_v19  ;;  %1993 = vadd.xlane.f32.xlu0 %v1975_v9  ;;  %v515_v9 = vld [vmem:[#allocation8 + $0x10] sm:$0xff]  ;;  %v516_v19 = vld [vmem:[#allocation8 + $0x18] sm:$0xff] }
 0x5a9   :  { %v1978_v29 = vmul.f32 %v9324_v38, %v9324_v38  ;;  %6393 = vmatprep.mubr.f32.mxu1 %v515_v9 }
 0x5aa   :  { %v6289_v24 = vpop.f32.mrb[52].mxu0  ;;  %v1977_v55 = vmul.f32 %v9326_v39, %v9326_v39  ;;  %6394 = vmatmul.mubr.f32.gmra.mrb[66].mxu1 %v516_v19 }
 0x5ab   :  { %v9330_v1 = vadd.f32 %v6289_v24, %v5108_v48  ;;  %v1901_v58 = vpop.f32.mrb[53].mxu0  ;;  %v517_v24 = vld [vmem:[#allocation8 + $0x20] sm:$0xff] }
 0x5ac   :  { %v9332_v56 = vadd.f32 %v5108_v48, %v1901_v58  ;;  %1997 = vadd.xlane.f32.xlu0 %v1977_v55  ;;  %6396 = vmatprep.mubr.f32.mxu1 %v517_v24  ;;  %v518_v55 = vld [vmem:[#allocation8 + $0x28] sm:$0xff]  ;;  %v519_v58 = vld [vmem:[#allocation8 + $0x30] sm:$0xff] }
 0x5ad   :  { %v1980_v11 = vmul.f32 %v9330_v1, %v9330_v1 }
 0x5ae   :  { %v6292_v57 = vpop.f32.mrb[54].mxu0  ;;  %v1979_v59 = vmul.f32 %v9332_v56, %v9332_v56  ;;  %6397 = vmatmul.mubr.f32.gmra.mrb[68].mxu1 %v518_v55 }
 0x5af   :  { %v9336_v60 = vadd.f32 %v6292_v57, %v5108_v48  ;;  %v1911_v45 = vpop.f32.mrb[55].mxu0  ;;  %6399 = vmatprep.mubr.f32.mxu1 %v519_v58  ;;  %v520_v57 = vld [vmem:[#allocation8 + $0x38] sm:$0xff] }
 0x5b0   :  { %v9338_v61 = vadd.f32 %v5108_v48, %v1911_v45  ;;  %2001 = vadd.xlane.f32.xlu0 %v1979_v59  ;;  %v521_v59 = vld [vmem:[#allocation8 + $0x40] sm:$0xff]  ;;  %v522_v45 = vld [vmem:[#allocation8 + $0x48] sm:$0xff] }
 0x5b2   :  { %v6295_v62 = vpop.f32.mrb[56].mxu0  ;;  %v1981_v63 = vmul.f32 %v9338_v61, %v9338_v61  ;;  %6400 = vmatmul.mubr.f32.gmra.mrb[70].mxu1 %v520_v57 }
 0x5b3   :  { %v9342_v0 = vadd.f32 %v6295_v62, %v5108_v48  ;;  %v1921_v3 = vpop.f32.mrb[57].mxu0  ;;  %6402 = vmatprep.mubr.f32.mxu1 %v521_v59  ;;  %v523_v62 = vld [vmem:[#allocation8 + $0x50] sm:$0xff] }
 0x5b4   :  { %v9344_v4 = vadd.f32 %v5108_v48, %v1921_v3  ;;  %2005 = vadd.xlane.f32.xlu0 %v1981_v63  ;;  %v524_v63 = vld [vmem:[#allocation8 + $0x58] sm:$0xff]  ;;  %v525_v3 = vld [vmem:[#allocation8 + $0x60] sm:$0xff] }
 0x5b5   :  { %v1984_v51 = vmul.f32 %v9342_v0, %v9342_v0 }
 0x5b6   :  { %v6298_v5 = vpop.f32.mrb[58].mxu0  ;;  %v1983_v25 = vmul.f32 %v9344_v4, %v9344_v4  ;;  %6403 = vmatmul.mubr.f32.gmra.mrb[72].mxu1 %v522_v45 }
 0x5b7   :  { %v9348_v26 = vadd.f32 %v6298_v5, %v5108_v48  ;;  %v1931_v6 = vpop.f32.mrb[59].mxu0  ;;  %6405 = vmatprep.mubr.f32.mxu1 %v523_v62  ;;  %v526_v5 = vld [vmem:[#allocation8 + $0x68] sm:$0xff] }
 0x5b8   :  { %v9350_v27 = vadd.f32 %v5108_v48, %v1931_v6  ;;  %2009 = vadd.xlane.f32.xlu0 %v1983_v25  ;;  %v527_v25 = vld [vmem:[#allocation8 + $0x70] sm:$0xff]  ;;  %v528_v6 = vld [vmem:[#allocation8 + $0x78] sm:$0xff] }
 0x5b9   :  { %v1986_v13 = vmul.f32 %v9348_v26, %v9348_v26 }
 0x5ba   :  { %v6301_v7 = vpop.f32.mrb[60].mxu0  ;;  %v1985_v28 = vmul.f32 %v9350_v27, %v9350_v27  ;;  %6406 = vmatmul.mubr.f32.gmra.mrb[74].mxu1 %v524_v63 }
 0x5bb   :  { %v9354_v8 = vadd.f32 %v6301_v7, %v5108_v48  ;;  %v1941_v10 = vpop.f32.mrb[61].mxu0  ;;  %6408 = vmatprep.mubr.f32.mxu1 %v525_v3  ;;  %v8079_v7 = vld [vmem:[#allocation5] sm:$0xff] }
 0x5bc   :  { %v9356_v30 = vadd.f32 %v5108_v48, %v1941_v10  ;;  %2013 = vadd.xlane.f32.xlu0 %v1985_v28  ;;  %v1982_v48 = vmul.f32 %v9336_v60, %v9336_v60  ;;  %v1220_v28 = vpop.xlane.xlu0 %1219 }
 0x5bd   :  { %v1988_v14 = vmul.f32 %v9354_v8, %v9354_v8 }
 0x5be   :  { %v1987_v31 = vmul.f32 %v9356_v30, %v9356_v30  ;;  %6409 = vmatmul.mubr.f32.gmra.mrb[76].mxu1 %v526_v5 }
 0x5bf   :  { %6411 = vmatprep.mubr.f32.mxu1 %v527_v25 }
 0x5c0   :  { %2017 = vadd.xlane.f32.xlu0 %v1987_v31  ;;  %v1222_v10 = vpop.xlane.xlu0 %1221 }
 0x5c2   :  { %6412 = vmatmul.mubr.f32.gmra.mrb[78].mxu1 %v528_v6  ;;  %v8692_v6 = vmov 0.0  }
 0x5c3   :  { %6558 = vmatprep.mubr.f32.mxu1 %v8079_v7 }
 0x5e3   :  { %v6392_v12 = vpop.f32.mrb[64].mxu1 }
 0x5e4   :  { %v2319_v32 = vpop.f32.mrb[65].mxu1 }
 0x5e5   :  { %6502 = vmatprep.mubr.f32.mxu0 %v2319_v32  ;;  %v1251_v32 = vmax.f32 %v1220_v28, 1e-24 }
 0x5e6   :  { %6503 = vmatmul.mubr.f32.vlgmr.msra.gmra.mrb[64].mxu0 %v6392_v12 }
 0x5e7   :  { %7995 = vrsqrt.f32 %v1251_v32 }
 0x5f8   :  { %v6451_v2 = vpop.f32.mrb[66].mxu0 }
 0x5f9   :  { %v2506_v15 = vpop.f32.mrb[67].mxu0 }
 0x5fa   :  { %v1252_v15 = vmax.f32 %v1222_v10, 1e-24 }
 0x5fc   :  { %v6454_v18 = vpop.f32.mrb[68].mxu0 }
 0x5fd   :  { %v2516_v20 = vpop.f32.mrb[69].mxu0 }
 0x600   :  { %v6457_v21 = vpop.f32.mrb[70].mxu0 }
 0x601   :  { %v2526_v40 = vpop.f32.mrb[71].mxu0 }
 0x604   :  { %v6460_v41 = vpop.f32.mrb[72].mxu0 }
 0x605   :  { %v2536_v42 = vpop.f32.mrb[73].mxu0 }
 0x608   :  { %v6463_v46 = vpop.f32.mrb[74].mxu0 }
 0x609   :  { %v2546_v47 = vpop.f32.mrb[75].mxu0 }
 0x60c   :  { %v6466_v34 = vpop.f32.mrb[76].mxu0 }
 0x60d   :  { %v2556_v49 = vpop.f32.mrb[77].mxu0 }
 0x610   :  { %v6469_v16 = vpop.f32.mrb[78].mxu0 }
 0x611   :  { %v2566_v17 = vpop.f32.mrb[79].mxu0  ;;  %v460_v16 = vlaneseq }
 0x635   :  { %v1994_v31 = vpop.xlane.xlu0 %1993 }
 0x636   :  { %v2023_v20 = vmax.f32 %v1994_v31, 1e-24 }
 0x639   :  { %v1998_v12 = vpop.xlane.xlu0 %1997 }
 0x63a   :  { %v2025_v40 = vmax.f32 %v1998_v12, 1e-24 }
 0x63d   :  { %v2002_v2 = vpop.xlane.xlu0 %2001 }
 0x63e   :  { %v2027_v47 = vmax.f32 %v2002_v2, 1e-24 }
 0x641   :  { %v2006_v41 = vpop.xlane.xlu0 %2005 }
 0x645   :  { %v2010_v17 = vpop.xlane.xlu0 %2009 }
 0x6b9   :  { %v6504_v22 = vpop.f32.mrb[64].mxu0 }
 0x6ba   :  { %v2641_v23 = vpop.f32.mrb[65].mxu0  ;;  %v9363_v43 = vadd.f32 %v6504_v22, %v5110_v35 }
 0x6bb   :  { %v9361_v50 = vadd.f32 %v5110_v35, %v2641_v23  ;;  %v7996_v35 = vpop.eup %7995 }
 0x6bc   :  { %v2744_v36 = vmul.f32 %v9363_v43, %v9363_v43 }
 0x6bd   :  { %v2743_v44 = vmul.f32 %v9361_v50, %v9361_v50 }
 0x6bf   :  { %2759 = vadd.xlane.f32.xlu1 %v2743_v44  ;;  %v2029_v44 = vmax.f32 %v2006_v41, 1e-24 }
 0x6c3   :  { %2761 = vadd.xlane.f32.xlu1 %v2744_v36 }
 0x6c7   :  { %1995 = vadd.xlane.f32.xlu1 %v1976_v33  ;;  %v461_v33 = vand.u32 127, %v460_v16 }
 0x6c9   :  { %vm478_vm0 = vcmp.lt.s32.totalorder %v461_v33, 32 }
 0x6ca   :  { %v9393_v7 = vsel %vm478_vm0, 1.0, %v8692_v6 }
 0x6cb   :  { %1999 = vadd.xlane.f32.xlu1 %v1978_v29 }
 0x6cf   :  { %2003 = vadd.xlane.f32.xlu1 %v1980_v11  ;;  %v1283_v11 = vmul.f32 %v7996_v35, %v9274_v53 }
 0x6d3   :  { %2007 = vadd.xlane.f32.xlu1 %v1982_v48 }
 0x6d7   :  { %2011 = vadd.xlane.f32.xlu1 %v1984_v51 }
 0x6db   :  { %2015 = vadd.xlane.f32.xlu1 %v1986_v13  ;;  %v2031_v13 = vmax.f32 %v2010_v17, 1e-24 }
 0x6df   :  { %2019 = vadd.xlane.f32.xlu1 %v1988_v14  ;;  %v2014_v14 = vpop.xlane.xlu0 %2013 }
 0x74c   :  { %v2760_v18 = vpop.xlane.xlu1 %2759 }
 0x74d   :  { %v2791_v21 = vmax.f32 %v2760_v18, 1e-24 }
 0x74f   :  { %7997 = vrsqrt.f32 %v2791_v21 }
 0x750   :  { %7999 = vrsqrt.f32 %v1252_v15  ;;  %v2762_v42 = vpop.xlane.xlu1 %2761 }
 0x751   :  { %8001 = vrsqrt.f32 %v2023_v20  ;;  %v2792_v46 = vmax.f32 %v2762_v42, 1e-24 }
 0x753   :  { %8003 = vrsqrt.f32 %v2792_v46 }
 0x754   :  { %8005 = vrsqrt.f32 %v2025_v40  ;;  %v1996_v34 = vpop.xlane.xlu1 %1995 }
 0x755   :  { %v2024_v49 = vmax.f32 %v1996_v34, 1e-24 }
 0x757   :  { %8007 = vrsqrt.f32 %v2024_v49 }
 0x758   :  { %8009 = vrsqrt.f32 %v2027_v47  ;;  %v2000_v22 = vpop.xlane.xlu1 %1999 }
 0x759   :  { %v7998_v23 = vpop.eup %7997  ;;  %v2026_v36 = vmax.f32 %v2000_v22, 1e-24 }
 0x75a   :  { %v8000_v29 = vpop.eup %7999  ;;  %v2823_v48 = vmul.f32 %v7998_v23, %v9361_v50  ;;  %v2033_v50 = vmax.f32 %v2014_v14, 1e-24 }
 0x75b   :  { %v8002_v51 = vpop.eup %8001  ;;  %8011 = vrsqrt.f32 %v2026_v36  ;;  %v1284_v58 = vmul.f32 %v8000_v29, %v9276_v54 }
 0x75c   :  { %v2004_v9 = vpop.xlane.xlu1 %2003  ;;  %v2839_v19 = vadd.f32 %v2823_v48, %v1283_v11  ;;  %8013 = vrsqrt.f32 %v2029_v44  ;;  %v9390_v53 = vmul.f32 %v8002_v51, %v9320_v52 }
 0x75d   :  { %v8004_v24 = vpop.eup %8003  ;;  %v2028_v55 = vmax.f32 %v2004_v9, 1e-24 }
 0x75e   :  { %v8006_v57 = vpop.eup %8005  ;;  %v9386_v59 = vmul.f32 0.5, %v2839_v19  ;;  %v2824_v45 = vmul.f32 %v8004_v24, %v9363_v43  ;;  %v2018_v43 = vpop.xlane.xlu0 %2017  ;;  %v2889_v31 = vmax.f32 %v9390_v53, 0.0 }
 0x75f   :  { %8015 = vrsqrt.f32 %v2028_v55  ;;  %v9396_v54 = vmul.f32 %v8006_v57, %v9326_v39  ;;  %v2035_v15 = vmax.f32 %v2018_v43, 1e-24 }
 0x760   :  { %8017 = vrsqrt.f32 %v2031_v13  ;;  %v2008_v62 = vpop.xlane.xlu1 %2007  ;;  %v2887_v63 = vmax.f32 %v9386_v59, 0.0  ;;  %v2840_v3 = vadd.f32 %v2824_v45, %v1284_v58 }
 0x761   :  { %v8008_v5 = vpop.eup %8007  ;;  %v2030_v25 = vmax.f32 %v2008_v62, 1e-24  ;;  %v2891_v20 = vmax.f32 %v9396_v54, 0.0 }
 0x762   :  { %v8010_v28 = vpop.eup %8009  ;;  %v2903_v52 = vmul.f32 %v9393_v7, %v2887_v63  ;;  %v9401_v10 = vmul.f32 0.5, %v2840_v3  ;;  %v9405_v12 = vmul.f32 %v8008_v5, %v9318_v37  ;;  %v2905_v37 = vmul.f32 %v9393_v7, %v2889_v31 }
 0x763   :  { %8019 = vrsqrt.f32 %v2030_v25  ;;  %v9410_v21 = vmul.f32 %v8010_v28, %v9332_v56  ;;  %v2907_v49 = vmul.f32 %v9393_v7, %v2891_v20 }
 0x764   :  { %8021 = vrsqrt.f32 %v2033_v50  ;;  %v2012_v32 = vpop.xlane.xlu1 %2011  ;;  %2919 = vadd.xlane.f32.xlu0 %v2903_v52  ;;  %v2888_v39 = vmax.f32 %v9401_v10, 0.0  ;;  %v2890_v41 = vmax.f32 %v9405_v12, 0.0 }
 0x765   :  { %v8012_v2 = vpop.eup %8011  ;;  %v2032_v18 = vmax.f32 %v2012_v32, 1e-24  ;;  %v2893_v16 = vmax.f32 %v9410_v21, 0.0 }
 0x766   :  { %v2904_v40 = vmul.f32 %v9393_v7, %v2888_v39  ;;  %v9420_v42 = vmul.f32 %v8012_v2, %v9324_v38  ;;  %v8014_v46 = vpop.eup %8013  ;;  %v2906_v38 = vmul.f32 %v9393_v7, %v2890_v41 }
 0x767   :  { %8023 = vrsqrt.f32 %v2032_v18  ;;  %v9434_v23 = vmul.f32 %v8014_v46, %v9338_v61  ;;  %v2909_v29 = vmul.f32 %v9393_v7, %v2893_v16 }
 0x768   :  { %2921 = vadd.xlane.f32.xlu1 %v2904_v40  ;;  %v2016_v47 = vpop.xlane.xlu1 %2015  ;;  %2923 = vadd.xlane.f32.xlu0 %v2905_v37  ;;  %8025 = vrsqrt.f32 %v2035_v15  ;;  %v2892_v35 = vmax.f32 %v9420_v42, 0.0 }
 0x769   :  { %v8016_v56 = vpop.eup %8015  ;;  %v2034_v34 = vmax.f32 %v2016_v47, 1e-24  ;;  %v2895_v51 = vmax.f32 %v9434_v23, 0.0 }
 0x76a   :  { %v8018_v17 = vpop.eup %8017  ;;  %v9431_v22 = vmul.f32 %v8016_v56, %v9330_v1  ;;  %v2908_v1 = vmul.f32 %v9393_v7, %v2892_v35 }
 0x76b   :  { %8027 = vrsqrt.f32 %v2034_v34  ;;  %v9440_v11 = vmul.f32 %v8018_v17, %v9344_v4  ;;  %v2911_v24 = vmul.f32 %v9393_v7, %v2895_v51 }
 0x76c   :  { %2925 = vadd.xlane.f32.xlu1 %v2906_v38  ;;  %v2020_v44 = vpop.xlane.xlu1 %2019  ;;  %2927 = vadd.xlane.f32.xlu0 %v2907_v49  ;;  %v2894_v61 = vmax.f32 %v9431_v22, 0.0 }
 0x76d   :  { %v8020_v36 = vpop.eup %8019  ;;  %v2036_v33 = vmax.f32 %v2020_v44, 1e-24  ;;  %v2897_v9 = vmax.f32 %v9440_v11, 0.0 }
 0x76e   :  { %v8022_v48 = vpop.eup %8021  ;;  %v9448_v13 = vmul.f32 %v8020_v36, %v9336_v60  ;;  %v2910_v19 = vmul.f32 %v9393_v7, %v2894_v61 }
 0x76f   :  { %8029 = vrsqrt.f32 %v2036_v33  ;;  %v9452_v4 = vmul.f32 %v8022_v48, %v9350_v27  ;;  %v2913_v27 = vmul.f32 %v9393_v7, %v2897_v9 }
 0x770   :  { %2929 = vadd.xlane.f32.xlu1 %v2908_v1  ;;  %2931 = vadd.xlane.f32.xlu0 %v2909_v29  ;;  %v2896_v60 = vmax.f32 %v9448_v13, 0.0 }
 0x771   :  { %v8024_v14 = vpop.eup %8023  ;;  %v2899_v45 = vmax.f32 %v9452_v4, 0.0 }
 0x772   :  { %v9462_v55 = vmul.f32 %v8024_v14, %v9342_v0  ;;  %v8026_v58 = vpop.eup %8025  ;;  %v2912_v50 = vmul.f32 %v9393_v7, %v2896_v60 }
 0x773   :  { %v9476_v0 = vmul.f32 %v8026_v58, %v9356_v30  ;;  %v2915_v25 = vmul.f32 %v9393_v7, %v2899_v45 }
 0x774   :  { %2933 = vadd.xlane.f32.xlu1 %v2910_v19  ;;  %2935 = vadd.xlane.f32.xlu0 %v2911_v24  ;;  %v2898_v62 = vmax.f32 %v9462_v55, 0.0 }
 0x775   :  { %v8028_v57 = vpop.eup %8027  ;;  %v2901_v43 = vmax.f32 %v9476_v0, 0.0 }
 0x776   :  { %v9473_v3 = vmul.f32 %v8028_v57, %v9348_v26  ;;  %v2914_v6 = vmul.f32 %v9393_v7, %v2898_v62 }
 0x777   :  { %v2917_v52 = vmul.f32 %v9393_v7, %v2901_v43 }
 0x778   :  { %2937 = vadd.xlane.f32.xlu1 %v2912_v50  ;;  %2939 = vadd.xlane.f32.xlu0 %v2913_v27  ;;  %v2900_v28 = vmax.f32 %v9473_v3, 0.0 }
 0x779   :  { %v8030_v5 = vpop.eup %8029 }
 0x77a   :  { %v9487_v26 = vmul.f32 %v8030_v5, %v9354_v8  ;;  %v2916_v30 = vmul.f32 %v9393_v7, %v2900_v28 }
 0x77c   :  { %2941 = vadd.xlane.f32.xlu1 %v2914_v6  ;;  %2943 = vadd.xlane.f32.xlu0 %v2915_v25  ;;  %v2902_v32 = vmax.f32 %v9487_v26, 0.0 }
 0x77e   :  { %v2918_v2 = vmul.f32 %v9393_v7, %v2902_v32 }
 0x780   :  { %2945 = vadd.xlane.f32.xlu1 %v2916_v30  ;;  %2947 = vadd.xlane.f32.xlu0 %v2917_v52 }
 0x784   :  { %2949 = vadd.xlane.f32.xlu1 %v2918_v2 }
 0x7f1   :  { %v2920_v8 = vpop.xlane.xlu0 %2919 }
 0x7f2   :  { %v2951_v15 = vmul.f32 0.03125, %v2920_v8 }
 0x7f4   :  { %v9501_v18 = vsub.f32 %v2887_v63, %v2951_v15 }
 0x7f5   :  { %v2922_v40 = vpop.xlane.xlu1 %2921  ;;  %v2924_v37 = vpop.xlane.xlu0 %2923 }
 0x7f6   :  { %v2952_v46 = vmul.f32 0.03125, %v2922_v40  ;;  %v2953_v47 = vmul.f32 0.03125, %v2924_v37  ;;  %v2983_v56 = vmul.f32 %v9393_v7, %v9501_v18 }
 0x7f8   :  { %v9507_v34 = vsub.f32 %v2888_v39, %v2952_v46  ;;  %v9511_v49 = vsub.f32 %v2889_v31, %v2953_v47  ;;  %v2999_v17 = vmul.f32 %v2983_v56, %v2983_v56 }
 0x7f9   :  { %v2926_v38 = vpop.xlane.xlu1 %2925  ;;  %v2928_v59 = vpop.xlane.xlu0 %2927 }
 0x7fa   :  { %v2954_v63 = vmul.f32 0.03125, %v2926_v38  ;;  %v2955_v44 = vmul.f32 0.03125, %v2928_v59  ;;  %3015 = vadd.xlane.f32.xlu0 %v2999_v17  ;;  %v2984_v36 = vmul.f32 %v9393_v7, %v9507_v34  ;;  %v2985_v33 = vmul.f32 %v9393_v7, %v9511_v49 }
 0x7fc   :  { %v9519_v10 = vsub.f32 %v2890_v41, %v2954_v63  ;;  %v9523_v53 = vsub.f32 %v2891_v20, %v2955_v44  ;;  %v3000_v31 = vmul.f32 %v2984_v36, %v2984_v36  ;;  %v3001_v39 = vmul.f32 %v2985_v33, %v2985_v33 }
 0x7fd   :  { %v2930_v29 = vpop.xlane.xlu1 %2929  ;;  %v2932_v48 = vpop.xlane.xlu0 %2931 }
 0x7fe   :  { %v2956_v1 = vmul.f32 0.03125, %v2930_v29  ;;  %v2957_v14 = vmul.f32 0.03125, %v2932_v48  ;;  %3017 = vadd.xlane.f32.xlu1 %v3000_v31  ;;  %3019 = vadd.xlane.f32.xlu0 %v3001_v39  ;;  %v2986_v19 = vmul.f32 %v9393_v7, %v9519_v10  ;;  %v2987_v12 = vmul.f32 %v9393_v7, %v9523_v53 }
 0x800   :  { %v9531_v41 = vsub.f32 %v2892_v35, %v2956_v1  ;;  %v9535_v54 = vsub.f32 %v2893_v16, %v2957_v14  ;;  %v3002_v20 = vmul.f32 %v2986_v19, %v2986_v19  ;;  %v3003_v24 = vmul.f32 %v2987_v12, %v2987_v12  ;;  %v6395_v14 = vpop.f32.mrb[66].mxu1 }
 0x801   :  { %v2934_v58 = vpop.xlane.xlu1 %2933  ;;  %v2936_v57 = vpop.xlane.xlu0 %2935 }
 0x802   :  { %v2958_v27 = vmul.f32 0.03125, %v2934_v58  ;;  %v2959_v50 = vmul.f32 0.03125, %v2936_v57  ;;  %3021 = vadd.xlane.f32.xlu1 %v3002_v20  ;;  %3023 = vadd.xlane.f32.xlu0 %v3003_v24  ;;  %v2988_v5 = vmul.f32 %v9393_v7, %v9531_v41  ;;  %v2989_v42 = vmul.f32 %v9393_v7, %v9535_v54  ;;  %v2329_v19 = vpop.f32.mrb[67].mxu1 }
 0x803   :  { %6505 = vmatprep.mubr.f32.mxu0 %v2329_v19  ;;  %v6398_v12 = vpop.f32.mrb[68].mxu1 }
 0x804   :  { %v9543_v35 = vsub.f32 %v2894_v61, %v2958_v27  ;;  %v9547_v21 = vsub.f32 %v2895_v51, %v2959_v50  ;;  %v3004_v16 = vmul.f32 %v2988_v5, %v2988_v5  ;;  %v3005_v25 = vmul.f32 %v2989_v42, %v2989_v42  ;;  %6506 = vmatmul.mubr.f32.gmra.mrb[80].mxu0 %v6395_v14  ;;  %v2339_v20 = vpop.f32.mrb[69].mxu1 }
 0x805   :  { %v2938_v6 = vpop.xlane.xlu1 %2937  ;;  %v2940_v30 = vpop.xlane.xlu0 %2939  ;;  %6508 = vmatprep.mubr.f32.mxu0 %v2339_v20 }
 0x806   :  { %v2960_v52 = vmul.f32 0.03125, %v2938_v6  ;;  %v2961_v2 = vmul.f32 0.03125, %v2940_v30  ;;  %3025 = vadd.xlane.f32.xlu1 %v3004_v16  ;;  %3027 = vadd.xlane.f32.xlu0 %v3005_v25  ;;  %v2990_v8 = vmul.f32 %v9393_v7, %v9543_v35  ;;  %v2991_v22 = vmul.f32 %v9393_v7, %v9547_v21  ;;  %v6401_v26 = vpop.f32.mrb[70].mxu1  ;;  %v8080_v16 = vld [vmem:[#allocation7] sm:$0xff] }
 0x808   :  { %v9555_v61 = vsub.f32 %v2896_v60, %v2960_v52  ;;  %v9559_v23 = vsub.f32 %v2897_v9, %v2961_v2  ;;  %v3006_v51 = vmul.f32 %v2990_v8, %v2990_v8  ;;  %v3007_v15 = vmul.f32 %v2991_v22, %v2991_v22  ;;  %6509 = vmatmul.mubr.f32.gmra.mrb[82].mxu0 %v6398_v12 }
 0x809   :  { %v2942_v40 = vpop.xlane.xlu1 %2941  ;;  %v2944_v37 = vpop.xlane.xlu0 %2943 }
 0x80a   :  { %v2962_v46 = vmul.f32 0.03125, %v2942_v40  ;;  %v2963_v47 = vmul.f32 0.03125, %v2944_v37  ;;  %3029 = vadd.xlane.f32.xlu1 %v3006_v51  ;;  %3031 = vadd.xlane.f32.xlu0 %v3007_v15  ;;  %v2992_v56 = vmul.f32 %v9393_v7, %v9555_v61  ;;  %v2993_v13 = vmul.f32 %v9393_v7, %v9559_v23 }
 0x80c   :  { %v9567_v60 = vsub.f32 %v2898_v62, %v2962_v46  ;;  %v9571_v11 = vsub.f32 %v2899_v45, %v2963_v47  ;;  %v3008_v9 = vmul.f32 %v2992_v56, %v2992_v56  ;;  %v3009_v17 = vmul.f32 %v2993_v13, %v2993_v13 }
 0x80d   :  { %v2946_v38 = vpop.xlane.xlu1 %2945  ;;  %v2948_v59 = vpop.xlane.xlu0 %2947 }
 0x80e   :  { %v2964_v63 = vmul.f32 0.03125, %v2946_v38  ;;  %v2965_v44 = vmul.f32 0.03125, %v2948_v59  ;;  %3033 = vadd.xlane.f32.xlu1 %v3008_v9  ;;  %3035 = vadd.xlane.f32.xlu0 %v3009_v17  ;;  %v2994_v36 = vmul.f32 %v9393_v7, %v9567_v60  ;;  %v2995_v55 = vmul.f32 %v9393_v7, %v9571_v11 }
 0x810   :  { %v9579_v62 = vsub.f32 %v2900_v28, %v2964_v63  ;;  %v9583_v4 = vsub.f32 %v2901_v43, %v2965_v44  ;;  %v3010_v45 = vmul.f32 %v2994_v36, %v2994_v36  ;;  %v3011_v33 = vmul.f32 %v2995_v55, %v2995_v55 }
 0x811   :  { %v2950_v31 = vpop.xlane.xlu1 %2949 }
 0x812   :  { %v2966_v39 = vmul.f32 0.03125, %v2950_v31  ;;  %3037 = vadd.xlane.f32.xlu1 %v3010_v45  ;;  %3039 = vadd.xlane.f32.xlu0 %v3011_v33  ;;  %v2996_v29 = vmul.f32 %v9393_v7, %v9579_v62  ;;  %v2997_v48 = vmul.f32 %v9393_v7, %v9583_v4  ;;  %v9597_v31 = vld [vmem:[%s9915_s19] ss:$0 sm:$0xff] }
 0x814   :  { %v9591_v3 = vsub.f32 %v2902_v32, %v2966_v39  ;;  %v3012_v28 = vmul.f32 %v2996_v29, %v2996_v29  ;;  %v3013_v0 = vmul.f32 %v2997_v48, %v2997_v48  ;;  %v2349_v32 = vpop.f32.mrb[71].mxu1 }
 0x815   :  { %6511 = vmatprep.mubr.f32.mxu0 %v2349_v32  ;;  %v6404_v24 = vpop.f32.mrb[72].mxu1 }
 0x816   :  { %3041 = vadd.xlane.f32.xlu1 %v3012_v28  ;;  %3043 = vadd.xlane.f32.xlu0 %v3013_v0  ;;  %v2998_v43 = vmul.f32 %v9393_v7, %v9591_v3  ;;  %v2359_v58 = vpop.f32.mrb[73].mxu1 }
 0x817   :  { %6512 = vmatmul.mubr.f32.gmra.mrb[84].mxu0 %v6401_v26  ;;  %v6407_v57 = vpop.f32.mrb[74].mxu1 }
 0x818   :  { %v3014_v1 = vmul.f32 %v2998_v43, %v2998_v43  ;;  %6514 = vmatprep.mubr.f32.mxu0 %v2359_v58  ;;  %v2369_v7 = vpop.f32.mrb[75].mxu1 }
 0x819   :  { %v6410_v27 = vpop.f32.mrb[76].mxu1 }
 0x81a   :  { %3045 = vadd.xlane.f32.xlu1 %v3014_v1  ;;  %v2379_v50 = vpop.f32.mrb[77].mxu1 }
 0x81b   :  { %6515 = vmatmul.mubr.f32.gmra.mrb[86].mxu0 %v6404_v24  ;;  %v6413_v5 = vpop.f32.mrb[78].mxu1 }
 0x81c   :  { %6517 = vmatprep.mubr.f32.mxu0 %v2369_v7  ;;  %v2389_v42 = vpop.f32.mrb[79].mxu1 }
 0x81f   :  { %6518 = vmatmul.mubr.f32.gmra.mrb[88].mxu0 %v6407_v57 }
 0x820   :  { %6520 = vmatprep.mubr.f32.mxu0 %v2379_v50 }
 0x823   :  { %6521 = vmatmul.mubr.f32.gmra.mrb[90].mxu0 %v6410_v27 }
 0x824   :  { %6523 = vmatprep.mubr.f32.mxu0 %v2389_v42 }
 0x827   :  { %6524 = vmatmul.mubr.f32.gmra.mrb[92].mxu0 %v6413_v5 }
 0x828   :  { %6726 = vmatprep.mubr.f32.mxu0 %v8080_v16 }
 0x887   :  { %v3016_v25 = vpop.xlane.xlu0 %3015 }
 0x888   :  { %v3047_v6 = vmul.f32 0.03125, %v3016_v25 }
 0x88a   :  { %v3063_v30 = vadd.f32 1e-05, %v3047_v6 }
 0x88b   :  { %v3018_v52 = vpop.xlane.xlu1 %3017  ;;  %v3020_v2 = vpop.xlane.xlu0 %3019 }
 0x88c   :  { %8031 = vrsqrt.f32 %v3063_v30  ;;  %v3048_v8 = vmul.f32 0.03125, %v3018_v52  ;;  %v3049_v22 = vmul.f32 0.03125, %v3020_v2 }
 0x88e   :  { %v3064_v51 = vadd.f32 1e-05, %v3048_v8  ;;  %v3065_v15 = vadd.f32 1e-05, %v3049_v22 }
 0x88f   :  { %v3022_v40 = vpop.xlane.xlu1 %3021  ;;  %v3024_v37 = vpop.xlane.xlu0 %3023 }
 0x890   :  { %8033 = vrsqrt.f32 %v3064_v51  ;;  %v3050_v46 = vmul.f32 0.03125, %v3022_v40  ;;  %v3051_v47 = vmul.f32 0.03125, %v3024_v37 }
 0x891   :  { %8035 = vrsqrt.f32 %v3065_v15 }
 0x892   :  { %v3066_v56 = vadd.f32 1e-05, %v3050_v46  ;;  %v3067_v13 = vadd.f32 1e-05, %v3051_v47 }
 0x893   :  { %v3026_v9 = vpop.xlane.xlu1 %3025  ;;  %v3028_v17 = vpop.xlane.xlu0 %3027 }
 0x894   :  { %8037 = vrsqrt.f32 %v3066_v56  ;;  %v3052_v38 = vmul.f32 0.03125, %v3026_v9  ;;  %v3053_v59 = vmul.f32 0.03125, %v3028_v17 }
 0x895   :  { %8039 = vrsqrt.f32 %v3067_v13 }
 0x896   :  { %v8032_v63 = vpop.eup %8031  ;;  %v3068_v44 = vadd.f32 1e-05, %v3052_v38  ;;  %v3069_v36 = vadd.f32 1e-05, %v3053_v59 }
 0x897   :  { %v3095_v55 = vmul.f32 %v8032_v63, %v9501_v18  ;;  %v3030_v45 = vpop.xlane.xlu1 %3029  ;;  %v3032_v33 = vpop.xlane.xlu0 %3031  ;;  %v9602_v18 = vld [vmem:[%s9916_s9] ss:$0 sm:$0xff] }
 0x898   :  { %8041 = vrsqrt.f32 %v3068_v44  ;;  %v3054_v39 = vmul.f32 0.03125, %v3030_v45  ;;  %v3055_v29 = vmul.f32 0.03125, %v3032_v33 }
 0x899   :  { %8043 = vrsqrt.f32 %v3069_v36  ;;  %v3118_v1 = vmul.f32 %v9597_v31, %v3095_v55 }
 0x89a   :  { %v8034_v48 = vpop.eup %8033  ;;  %v3070_v28 = vadd.f32 1e-05, %v3054_v39  ;;  %v3071_v0 = vadd.f32 1e-05, %v3055_v29 }
 0x89b   :  { %v8036_v43 = vpop.eup %8035  ;;  %v3096_v14 = vmul.f32 %v8034_v48, %v9507_v34  ;;  %v3034_v19 = vpop.xlane.xlu1 %3033  ;;  %v9607_v50 = vadd.f32 %v9602_v18, %v3118_v1 }
 0x89c   :  { %v3036_v12 = vpop.xlane.xlu0 %3035  ;;  %v3097_v20 = vmul.f32 %v8036_v43, %v9511_v49  ;;  %8045 = vrsqrt.f32 %v3070_v28  ;;  %v3056_v26 = vmul.f32 0.03125, %v3034_v19 }
 0x89d   :  { %v3057_v32 = vmul.f32 0.03125, %v3036_v12  ;;  %v3119_v24 = vmul.f32 %v9597_v31, %v3096_v14  ;;  %8047 = vrsqrt.f32 %v3071_v0 }
 0x89e   :  { %v8038_v58 = vpop.eup %8037  ;;  %v3072_v57 = vadd.f32 1e-05, %v3056_v26  ;;  %v3120_v5 = vmul.f32 %v9597_v31, %v3097_v20 }
 0x89f   :  { %v3073_v7 = vadd.f32 1e-05, %v3057_v32  ;;  %v8040_v27 = vpop.eup %8039  ;;  %v9610_v34 = vadd.f32 %v9602_v18, %v3119_v24  ;;  %v3098_v49 = vmul.f32 %v8038_v58, %v9519_v10  ;;  %v3038_v42 = vpop.xlane.xlu1 %3037 }
 0x8a0   :  { %v3040_v16 = vpop.xlane.xlu0 %3039  ;;  %v3099_v25 = vmul.f32 %v8040_v27, %v9523_v53  ;;  %8049 = vrsqrt.f32 %v3072_v57  ;;  %v3058_v6 = vmul.f32 0.03125, %v3038_v42  ;;  %v9622_v10 = vadd.f32 %v9602_v18, %v3120_v5 }
 0x8a1   :  { %v3121_v30 = vmul.f32 %v9597_v31, %v3098_v49  ;;  %8051 = vrsqrt.f32 %v3073_v7  ;;  %v3059_v52 = vmul.f32 0.03125, %v3040_v16  ;;  %v9618_v2 = vpack.c.bf16 %v9610_v34, %v9607_v50 }
 0x8a2   :  { %v8042_v8 = vpop.eup %8041  ;;  %v3122_v22 = vmul.f32 %v9597_v31, %v3099_v25  ;;  %v3074_v51 = vadd.f32 1e-05, %v3058_v6 }
 0x8a3   :  { %v8044_v15 = vpop.eup %8043  ;;  %v9625_v53 = vadd.f32 %v9602_v18, %v3121_v30  ;;  %v3100_v40 = vmul.f32 %v8042_v8, %v9531_v41  ;;  %v3075_v37 = vadd.f32 1e-05, %v3059_v52  ;;  %v3042_v46 = vpop.xlane.xlu1 %3041  ;;  %7527 = vmatprep.subr.bf16.mxu1 %v9618_v2  ;;  %7623 = vmatprep.subr.bf16.mxu0 %v9618_v2 }
 0x8a4   :  { %v3044_v47 = vpop.xlane.xlu0 %3043  ;;  %v3101_v56 = vmul.f32 %v8044_v15, %v9535_v54  ;;  %8053 = vrsqrt.f32 %v3074_v51  ;;  %v3060_v13 = vmul.f32 0.03125, %v3042_v46  ;;  %7529 = vmatpush3.bf16.msra.mxu1 %v9618_v2  ;;  %7625 = vmatpush3.bf16.msra.mxu0 %v9618_v2  ;;  %v9639_v59 = vadd.f32 %v9602_v18, %v3122_v22  ;;  %v3319_v46 = vld [vmem:[#allocation28 + $0x8] sm:$0xff] }
 0x8a5   :  { %v3123_v9 = vmul.f32 %v9597_v31, %v3100_v40  ;;  %8055 = vrsqrt.f32 %v3075_v37  ;;  %v3061_v17 = vmul.f32 0.03125, %v3044_v47  ;;  %v9636_v41 = vpack.c.bf16 %v9625_v53, %v9622_v10  ;;  %v3318_v37 = vld [vmem:[#allocation28] sm:$0xff] }
 0x8a6   :  { %v8046_v38 = vpop.eup %8045  ;;  %v3076_v63 = vadd.f32 1e-05, %v3060_v13  ;;  %v3124_v36 = vmul.f32 %v9597_v31, %v3101_v56  ;;  %v3808_v47 = vld [vmem:[#allocation31] sm:$0xff]  ;;  %v3809_v56 = vld [vmem:[#allocation31 + $0x8] sm:$0xff] }
 0x8a7   :  { %v8048_v54 = vpop.eup %8047  ;;  %v9642_v44 = vadd.f32 %v9602_v18, %v3123_v9  ;;  %v3102_v55 = vmul.f32 %v8046_v38, %v9543_v35  ;;  %v3077_v45 = vadd.f32 1e-05, %v3061_v17  ;;  %v3046_v33 = vpop.xlane.xlu1 %3045  ;;  %7531 = vmatprep.subr.bf16.mxu1 %v9636_v41  ;;  %7627 = vmatprep.subr.bf16.mxu0 %v9636_v41  ;;  %v7558_v9 = vpack.c.bf16 %v3319_v46, %v3318_v37  ;;  %v3320_v38 = vld [vmem:[#allocation28 + $0x10] sm:$0xff] }
 0x8a8   :  { %v3103_v39 = vmul.f32 %v8048_v54, %v9547_v21  ;;  %8057 = vrsqrt.f32 %v3076_v63  ;;  %v3062_v29 = vmul.f32 0.03125, %v3046_v33  ;;  %7533 = vmatpush3.bf16.msra.mxu1 %v9636_v41  ;;  %7629 = vmatpush3.bf16.msra.mxu0 %v9636_v41  ;;  %v9658_v21 = vadd.f32 %v9602_v18, %v3124_v36  ;;  %v3810_v63 = vld [vmem:[#allocation31 + $0x10] sm:$0xff]  ;;  %v3811_v54 = vld [vmem:[#allocation31 + $0x18] sm:$0xff]  ;;  %v8081_v33 = vld [vmem:[#allocation5 + $0x8] sm:$0xff] }
 0x8a9   :  { %v3125_v48 = vmul.f32 %v9597_v31, %v3102_v55  ;;  %8059 = vrsqrt.f32 %v3077_v45  ;;  %v9654_v35 = vpack.c.bf16 %v9642_v44, %v9639_v59  ;;  %v7654_v17 = vpack.c.bf16 %v3809_v56, %v3808_v47  ;;  %v3322_v45 = vld [vmem:[#allocation28 + $0x20] sm:$0xff]  ;;  %v3328_v47 = vld [vmem:[#allocation28 + $0x50] sm:$0xff]  ;;  %v8093_v56 = vld [vmem:[#allocation5 + $0x38] sm:$0xff] }
 0x8aa   :  { %v8050_v28 = vpop.eup %8049  ;;  %v3126_v0 = vmul.f32 %v9597_v31, %v3103_v39  ;;  %v3078_v43 = vadd.f32 1e-05, %v3062_v29  ;;  %v7658_v55 = vpack.c.bf16 %v3811_v54, %v3810_v63  ;;  %v8082_v39 = vld [vmem:[#allocation7 + $0x8] sm:$0xff]  ;;  %v8095_v63 = vld [vmem:[#allocation5 + $0x40] sm:$0xff] }
 0x8ab   :  { %v8052_v1 = vpop.eup %8051  ;;  %v9661_v14 = vadd.f32 %v9602_v18, %v3125_v48  ;;  %v3104_v19 = vmul.f32 %v8050_v28, %v9555_v61  ;;  %7535 = vmatprep.subr.bf16.mxu1 %v9654_v35  ;;  %7631 = vmatprep.subr.bf16.mxu0 %v9654_v35  ;;  %v3323_v29 = vld [vmem:[#allocation28 + $0x28] sm:$0xff]  ;;  %v3812_v48 = vld [vmem:[#allocation31 + $0x20] sm:$0xff] }
 0x8ac   :  { %v3105_v12 = vmul.f32 %v8052_v1, %v9559_v23  ;;  %8061 = vrsqrt.f32 %v3078_v43  ;;  %7537 = vmatpush3.bf16.msra.mxu1 %v9654_v35  ;;  %7633 = vmatpush3.bf16.msra.mxu0 %v9654_v35  ;;  %v9675_v61 = vadd.f32 %v9602_v18, %v3126_v0  ;;  %v3813_v28 = vld [vmem:[#allocation31 + $0x28] sm:$0xff]  ;;  %v8083_v0 = vld [vmem:[#allocation5 + $0x10] sm:$0xff]  ;;  %v7566_v1 = vpack.c.bf16 %v3323_v29, %v3322_v45  ;;  %v8096_v54 = vld [vmem:[#allocation7 + $0x40] sm:$0xff] }
 0x8ad   :  { %v3127_v20 = vmul.f32 %v9597_v31, %v3104_v19  ;;  %v9672_v26 = vpack.c.bf16 %v9661_v14, %v9658_v21  ;;  %v8084_v43 = vld [vmem:[#allocation7 + $0x10] sm:$0xff]  ;;  %v7662_v19 = vpack.c.bf16 %v3813_v28, %v3812_v48  ;;  %v3330_v45 = vld [vmem:[#allocation28 + $0x60] sm:$0xff]  ;;  %v3331_v29 = vld [vmem:[#allocation28 + $0x68] sm:$0xff] }
 0x8ae   :  { %v8054_v32 = vpop.eup %8053  ;;  %v3128_v23 = vmul.f32 %v9597_v31, %v3105_v12  ;;  %v3324_v12 = vld [vmem:[#allocation28 + $0x30] sm:$0xff]  ;;  %v3820_v48 = vld [vmem:[#allocation31 + $0x60] sm:$0xff]  ;;  %v3821_v28 = vld [vmem:[#allocation31 + $0x68] sm:$0xff] }
 0x8af   :  { %v8056_v24 = vpop.eup %8055  ;;  %v9678_v58 = vadd.f32 %v9602_v18, %v3127_v20  ;;  %v3106_v57 = vmul.f32 %v8054_v32, %v9567_v60  ;;  %7539 = vmatprep.subr.bf16.mxu1 %v9672_v26  ;;  %7635 = vmatprep.subr.bf16.mxu0 %v9672_v26  ;;  %v8085_v20 = vld [vmem:[#allocation5 + $0x18] sm:$0xff] }
 0x8b0   :  { %v3107_v7 = vmul.f32 %v8056_v24, %v9571_v11  ;;  %7541 = vmatpush3.bf16.msra.mxu1 %v9672_v26  ;;  %7637 = vmatpush3.bf16.msra.mxu0 %v9672_v26  ;;  %v9694_v16 = vadd.f32 %v9602_v18, %v3128_v23  ;;  %v8086_v32 = vld [vmem:[#allocation7 + $0x18] sm:$0xff]  ;;  %v3814_v23 = vld [vmem:[#allocation31 + $0x30] sm:$0xff] }
 0x8b1   :  { %v3129_v27 = vmul.f32 %v9597_v31, %v3106_v57  ;;  %v9690_v5 = vpack.c.bf16 %v9678_v58, %v9675_v61  ;;  %v3325_v24 = vld [vmem:[#allocation28 + $0x38] sm:$0xff] }
 0x8b2   :  { %v8058_v49 = vpop.eup %8057  ;;  %v3130_v42 = vmul.f32 %v9597_v31, %v3107_v7  ;;  %v3815_v57 = vld [vmem:[#allocation31 + $0x38] sm:$0xff]  ;;  %v8087_v7 = vld [vmem:[#allocation5 + $0x20] sm:$0xff] }
 0x8b3   :  { %v8060_v60 = vpop.eup %8059  ;;  %v9697_v25 = vadd.f32 %v9602_v18, %v3129_v27  ;;  %v3108_v11 = vmul.f32 %v8058_v49, %v9579_v62  ;;  %7543 = vmatprep.subr.bf16.mxu1 %v9690_v5  ;;  %7639 = vmatprep.subr.bf16.mxu0 %v9690_v5  ;;  %v8088_v27 = vld [vmem:[#allocation7 + $0x20] sm:$0xff]  ;;  %v7570_v49 = vpack.c.bf16 %v3325_v24, %v3324_v12  ;;  %v3332_v12 = vld [vmem:[#allocation28 + $0x70] sm:$0xff]  ;;  %v3333_v24 = vld [vmem:[#allocation28 + $0x78] sm:$0xff] }
 0x8b4   :  { %v3109_v6 = vmul.f32 %v8060_v60, %v9583_v4  ;;  %7545 = vmatpush3.bf16.msra.mxu1 %v9690_v5  ;;  %7641 = vmatpush3.bf16.msra.mxu0 %v9690_v5  ;;  %v9711_v22 = vadd.f32 %v9602_v18, %v3130_v42  ;;  %v7666_v42 = vpack.c.bf16 %v3815_v57, %v3814_v23  ;;  %v3326_v60 = vld [vmem:[#allocation28 + $0x40] sm:$0xff]  ;;  %v3822_v23 = vld [vmem:[#allocation31 + $0x70] sm:$0xff]  ;;  %v3823_v57 = vld [vmem:[#allocation31 + $0x78] sm:$0xff] }
 0x8b5   :  { %v3131_v30 = vmul.f32 %v9597_v31, %v3108_v11  ;;  %v9708_v52 = vpack.c.bf16 %v9697_v25, %v9694_v16  ;;  %v8089_v11 = vld [vmem:[#allocation5 + $0x28] sm:$0xff] }
 0x8b6   :  { %v8062_v8 = vpop.eup %8061  ;;  %v3132_v51 = vmul.f32 %v9597_v31, %v3109_v6  ;;  %v8090_v6 = vld [vmem:[#allocation7 + $0x28] sm:$0xff] }
 0x8b7   :  { %v9714_v62 = vadd.f32 %v9602_v18, %v3131_v30  ;;  %v3110_v4 = vmul.f32 %v8062_v8, %v9591_v3  ;;  %7547 = vmatprep.subr.bf16.mxu1 %v9708_v52  ;;  %7643 = vmatprep.subr.bf16.mxu0 %v9708_v52  ;;  %v3327_v30 = vld [vmem:[#allocation28 + $0x48] sm:$0xff]  ;;  %v3816_v8 = vld [vmem:[#allocation31 + $0x40] sm:$0xff] }
 0x8b8   :  { %7549 = vmatpush3.bf16.msra.mxu1 %v9708_v52  ;;  %7645 = vmatpush3.bf16.msra.mxu0 %v9708_v52  ;;  %v9728_v3 = vadd.f32 %v9602_v18, %v3132_v51  ;;  %v3817_v51 = vld [vmem:[#allocation31 + $0x48] sm:$0xff]  ;;  %v7574_v37 = vpack.c.bf16 %v3327_v30, %v3326_v60  ;;  %v3302_v60 = vld [vmem:[#allocation26] sm:$0xff] }
 0x8b9   :  { %v3133_v15 = vmul.f32 %v9597_v31, %v3110_v4  ;;  %v9725_v40 = vpack.c.bf16 %v9714_v62, %v9711_v22  ;;  %v8091_v4 = vld [vmem:[#allocation5 + $0x30] sm:$0xff]  ;;  %v7670_v46 = vpack.c.bf16 %v3817_v51, %v3816_v8  ;;  %v3303_v30 = vld [vmem:[#allocation26 + $0x8] sm:$0xff]  ;;  %v3792_v8 = vld [vmem:[#allocation29] sm:$0xff] }
 0x8ba   :  { %v3793_v51 = vld [vmem:[#allocation29 + $0x8] sm:$0xff] }
 0x8bb   :  { %v9731_v13 = vadd.f32 %v9602_v18, %v3133_v15  ;;  %7551 = vmatprep.subr.bf16.mxu1 %v9725_v40  ;;  %7647 = vmatprep.subr.bf16.mxu0 %v9725_v40  ;;  %v3321_v18 = vld [vmem:[#allocation28 + $0x18] sm:$0xff]  ;;  %v8092_v15 = vld [vmem:[#allocation7 + $0x30] sm:$0xff] }
 0x8bc   :  { %7553 = vmatpush3.bf16.msra.mxu1 %v9725_v40  ;;  %7649 = vmatpush3.bf16.msra.mxu0 %v9725_v40  ;;  %v7562_v36 = vpack.c.bf16 %v3321_v18, %v3320_v38  ;;  %v3818_v38 = vld [vmem:[#allocation31 + $0x50] sm:$0xff]  ;;  %v3819_v18 = vld [vmem:[#allocation31 + $0x58] sm:$0xff] }
 0x8bd   :  { %v9739_v31 = vpack.c.bf16 %v9731_v13, %v9728_v3 }
 0x8bf   :  { %7555 = vmatprep.subr.bf16.mxu1 %v9739_v31  ;;  %7651 = vmatprep.subr.bf16.mxu0 %v9739_v31 }
 0x8c0   :  { %7557 = vmatpush3.bf16.msra.mxu1 %v9739_v31  ;;  %7653 = vmatpush3.bf16.msra.mxu0 %v9739_v31 }
 0x8c1   :  { %7559 = vmatprep.subr.bf16.mxu1 %v7558_v9  ;;  %7655 = vmatprep.subr.bf16.mxu0 %v7654_v17 }
 0x8c3   :  { %6559 = vmatmul.mubr.f32.vlgmr.msra.gmra.mrb[80].mxu1 %v8081_v33  ;;  %6727 = vmatmul.mubr.f32.vlgmr.msra.gmra.mrb[94].mxu0 %v8082_v39  ;;  %v8097_v33 = vld [vmem:[#allocation5 + $0x48] sm:$0xff] }
 0x8c4   :  { %7561 = vmatpush3.bf16.msra.mxu1 %v7558_v9  ;;  %7657 = vmatpush3.bf16.msra.mxu0 %v7654_v17  ;;  %v8094_v9 = vld [vmem:[#allocation7 + $0x38] sm:$0xff]  ;;  %v8098_v39 = vld [vmem:[#allocation7 + $0x48] sm:$0xff] }
 0x8c5   :  { %6561 = vmatprep.mubr.f32.mxu1 %v8083_v0  ;;  %6729 = vmatprep.mubr.f32.mxu0 %v8084_v43  ;;  %v3329_v17 = vld [vmem:[#allocation28 + $0x58] sm:$0xff]  ;;  %v8099_v0 = vld [vmem:[#allocation5 + $0x50] sm:$0xff] }
 0x8c6   :  { %7563 = vmatprep.subr.bf16.mxu1 %v7562_v36  ;;  %7659 = vmatprep.subr.bf16.mxu0 %v7658_v55  ;;  %v8100_v43 = vld [vmem:[#allocation7 + $0x50] sm:$0xff] }
 0x8c7   :  { %6562 = vmatmul.mubr.f32.gmra.mrb[82].mxu1 %v8085_v20  ;;  %6730 = vmatmul.mubr.f32.gmra.mrb[96].mxu0 %v8086_v32  ;;  %v8101_v20 = vld [vmem:[#allocation5 + $0x58] sm:$0xff] }
 0x8c8   :  { %7565 = vmatpush3.bf16.msra.mxu1 %v7562_v36  ;;  %7661 = vmatpush3.bf16.msra.mxu0 %v7658_v55  ;;  %v7578_v36 = vpack.c.bf16 %v3329_v17, %v3328_v47  ;;  %v7674_v55 = vpack.c.bf16 %v3819_v18, %v3818_v38  ;;  %v8102_v32 = vld [vmem:[#allocation7 + $0x58] sm:$0xff]  ;;  %v3794_v38 = vld [vmem:[#allocation29 + $0x10] sm:$0xff] }
 0x8c9   :  { %6564 = vmatprep.mubr.f32.mxu1 %v8087_v7  ;;  %6732 = vmatprep.mubr.f32.mxu0 %v8088_v27  ;;  %v8103_v7 = vld [vmem:[#allocation5 + $0x60] sm:$0xff]  ;;  %v8109_v47 = vld [vmem:[#allocation5 + $0x78] sm:$0xff] }
 0x8ca   :  { %7567 = vmatprep.subr.bf16.mxu1 %v7566_v1  ;;  %7663 = vmatprep.subr.bf16.mxu0 %v7662_v19  ;;  %v8104_v27 = vld [vmem:[#allocation7 + $0x60] sm:$0xff]  ;;  %v3305_v17 = vld [vmem:[#allocation26 + $0x18] sm:$0xff] }
 0x8cb   :  { %6565 = vmatmul.mubr.f32.gmra.mrb[84].mxu1 %v8089_v11  ;;  %6733 = vmatmul.mubr.f32.gmra.mrb[98].mxu0 %v8090_v6  ;;  %v8105_v11 = vld [vmem:[#allocation5 + $0x68] sm:$0xff]  ;;  %v3795_v18 = vld [vmem:[#allocation29 + $0x18] sm:$0xff] }
 0x8cc   :  { %7569 = vmatpush3.bf16.msra.mxu1 %v7566_v1  ;;  %7665 = vmatpush3.bf16.msra.mxu0 %v7662_v19  ;;  %v7582_v1 = vpack.c.bf16 %v3331_v29, %v3330_v45  ;;  %v7678_v19 = vpack.c.bf16 %v3821_v28, %v3820_v48  ;;  %v8106_v6 = vld [vmem:[#allocation7 + $0x68] sm:$0xff]  ;;  %v3796_v45 = vld [vmem:[#allocation29 + $0x20] sm:$0xff]  ;;  %v3308_v29 = vld [vmem:[#allocation26 + $0x30] sm:$0xff] }
 0x8cd   :  { %6567 = vmatprep.mubr.f32.mxu1 %v8091_v4  ;;  %6735 = vmatprep.mubr.f32.mxu0 %v8092_v15  ;;  %v8107_v4 = vld [vmem:[#allocation5 + $0x70] sm:$0xff]  ;;  %v3309_v48 = vld [vmem:[#allocation26 + $0x38] sm:$0xff] }
 0x8ce   :  { %7571 = vmatprep.subr.bf16.mxu1 %v7570_v49  ;;  %7667 = vmatprep.subr.bf16.mxu0 %v7666_v42  ;;  %v8108_v15 = vld [vmem:[#allocation7 + $0x70] sm:$0xff] }
 0x8cf   :  { %6568 = vmatmul.mubr.f32.gmra.mrb[86].mxu1 %v8093_v56  ;;  %6736 = vmatmul.mubr.f32.gmra.mrb[100].mxu0 %v8094_v9  ;;  %v8110_v56 = vld [vmem:[#allocation7 + $0x78] sm:$0xff]  ;;  %v3304_v9 = vld [vmem:[#allocation26 + $0x10] sm:$0xff] }
 0x8d0   :  { %7573 = vmatpush3.bf16.msra.mxu1 %v7570_v49  ;;  %7669 = vmatpush3.bf16.msra.mxu0 %v7666_v42  ;;  %v7586_v49 = vpack.c.bf16 %v3333_v24, %v3332_v12  ;;  %v7682_v42 = vpack.c.bf16 %v3823_v57, %v3822_v23  ;;  %v3311_v12 = vld [vmem:[#allocation26 + $0x48] sm:$0xff]  ;;  %v3312_v57 = vld [vmem:[#allocation26 + $0x50] sm:$0xff] }
 0x8d1   :  { %6570 = vmatprep.mubr.f32.mxu1 %v8095_v63  ;;  %6738 = vmatprep.mubr.f32.mxu0 %v8096_v54  ;;  %v7594_v63 = vpack.c.bf16 %v3305_v17, %v3304_v9  ;;  %v3306_v54 = vld [vmem:[#allocation26 + $0x20] sm:$0xff]  ;;  %v3801_v24 = vld [vmem:[#allocation29 + $0x48] sm:$0xff] }
 0x8d2   :  { %7575 = vmatprep.subr.bf16.mxu1 %v7574_v37  ;;  %7671 = vmatprep.subr.bf16.mxu0 %v7670_v46 }
 0x8d3   :  { %6571 = vmatmul.mubr.f32.gmra.mrb[88].mxu1 %v8097_v33  ;;  %6739 = vmatmul.mubr.f32.gmra.mrb[102].mxu0 %v8098_v39  ;;  %v3797_v33 = vld [vmem:[#allocation29 + $0x28] sm:$0xff] }
 0x8d4   :  { %7577 = vmatpush3.bf16.msra.mxu1 %v7574_v37  ;;  %7673 = vmatpush3.bf16.msra.mxu0 %v7670_v46  ;;  %v7590_v37 = vpack.c.bf16 %v3303_v30, %v3302_v60  ;;  %v7686_v46 = vpack.c.bf16 %v3793_v51, %v3792_v8  ;;  %v7694_v28 = vpack.c.bf16 %v3797_v33, %v3796_v45  ;;  %v3804_v8 = vld [vmem:[#allocation29 + $0x60] sm:$0xff]  ;;  %v3805_v51 = vld [vmem:[#allocation29 + $0x68] sm:$0xff] }
 0x8d5   :  { %6573 = vmatprep.mubr.f32.mxu1 %v8099_v0  ;;  %6741 = vmatprep.mubr.f32.mxu0 %v8100_v43  ;;  %v3798_v0 = vld [vmem:[#allocation29 + $0x30] sm:$0xff]  ;;  %v3799_v43 = vld [vmem:[#allocation29 + $0x38] sm:$0xff] }
 0x8d6   :  { %7579 = vmatprep.subr.bf16.mxu1 %v7578_v36  ;;  %7675 = vmatprep.subr.bf16.mxu0 %v7674_v55 }
 0x8d7   :  { %6574 = vmatmul.mubr.f32.gmra.mrb[90].mxu1 %v8101_v20  ;;  %6742 = vmatmul.mubr.f32.gmra.mrb[104].mxu0 %v8102_v32  ;;  %v7698_v20 = vpack.c.bf16 %v3799_v43, %v3798_v0  ;;  %v3800_v32 = vld [vmem:[#allocation29 + $0x40] sm:$0xff]  ;;  %v6507_v17 = vpop.f32.mrb[80].mxu0 }
 0x8d8   :  { %7581 = vmatpush3.bf16.msra.mxu1 %v7578_v36  ;;  %7677 = vmatpush3.bf16.msra.mxu0 %v7674_v55  ;;  %v3307_v36 = vld [vmem:[#allocation26 + $0x28] sm:$0xff]  ;;  %v7690_v55 = vpack.c.bf16 %v3795_v18, %v3794_v38  ;;  %v2651_v18 = vpop.f32.mrb[81].mxu0 }
 0x8d9   :  { %6576 = vmatprep.mubr.f32.mxu1 %v8103_v7  ;;  %6744 = vmatprep.mubr.f32.mxu0 %v8104_v27  ;;  %v7598_v39 = vpack.c.bf16 %v3307_v36, %v3306_v54  ;;  %v3313_v7 = vld [vmem:[#allocation26 + $0x58] sm:$0xff]  ;;  %v7702_v27 = vpack.c.bf16 %v3801_v24, %v3800_v32 }
 0x8da   :  { %7583 = vmatprep.subr.bf16.mxu1 %v7582_v1  ;;  %7679 = vmatprep.subr.bf16.mxu0 %v7678_v19  ;;  %v7610_v60 = vpack.c.bf16 %v3313_v7, %v3312_v57 }
 0x8db   :  { %6577 = vmatmul.mubr.f32.gmra.mrb[92].mxu1 %v8105_v11  ;;  %6745 = vmatmul.mubr.f32.gmra.mrb[106].mxu0 %v8106_v6  ;;  %v3314_v11 = vld [vmem:[#allocation26 + $0x60] sm:$0xff]  ;;  %v3315_v6 = vld [vmem:[#allocation26 + $0x68] sm:$0xff] }
 0x8dc   :  { %7585 = vmatpush3.bf16.msra.mxu1 %v7582_v1  ;;  %7681 = vmatpush3.bf16.msra.mxu0 %v7678_v19  ;;  %v7602_v1 = vpack.c.bf16 %v3309_v48, %v3308_v29  ;;  %v3310_v19 = vld [vmem:[#allocation26 + $0x40] sm:$0xff] }
 0x8dd   :  { %6579 = vmatprep.mubr.f32.mxu1 %v8107_v4  ;;  %6747 = vmatprep.mubr.f32.mxu0 %v8108_v15  ;;  %v7606_v23 = vpack.c.bf16 %v3311_v12, %v3310_v19  ;;  %v7614_v4 = vpack.c.bf16 %v3315_v6, %v3314_v11  ;;  %v3316_v15 = vld [vmem:[#allocation26 + $0x70] sm:$0xff] }
 0x8de   :  { %7587 = vmatprep.subr.bf16.mxu1 %v7586_v49  ;;  %7683 = vmatprep.subr.bf16.mxu0 %v7682_v42 }
 0x8df   :  { %6580 = vmatmul.mubr.f32.gmra.mrb[94].mxu1 %v8109_v47  ;;  %6748 = vmatmul.mubr.f32.gmra.mrb[108].mxu0 %v8110_v56  ;;  %v3806_v47 = vld [vmem:[#allocation29 + $0x70] sm:$0xff]  ;;  %v3807_v56 = vld [vmem:[#allocation29 + $0x78] sm:$0xff] }
 0x8e0   :  { %7589 = vmatpush3.bf16.msra.mxu1 %v7586_v49  ;;  %6614 = vmatprep.mubr.f32.mxu1 %v9607_v50  ;;  %v3802_v49 = vld [vmem:[#allocation29 + $0x50] sm:$0xff]  ;;  %v7714_v38 = vpack.c.bf16 %v3807_v56, %v3806_v47 }
 0x8e1   :  { %7685 = vmatpush3.bf16.msra.mxu0 %v7682_v42  ;;  %6782 = vmatprep.mubr.f32.mxu0 %v9607_v50  ;;  %v3803_v42 = vld [vmem:[#allocation29 + $0x58] sm:$0xff] }
 0x8e2   :  { %7591 = vmatprep.subr.bf16.mxu1 %v7590_v37  ;;  %7687 = vmatprep.subr.bf16.mxu0 %v7686_v46  ;;  %v7706_v30 = vpack.c.bf16 %v3803_v42, %v3802_v49 }
 0x8e3   :  { %6615 = vmatmul.mubr.f32.vlgmr.msra.gmra.mrb[96].mxu1 %v9610_v34 }
 0x8e4   :  { %6783 = vmatmul.mubr.f32.vlgmr.msra.gmra.mrb[110].mxu0 %v9610_v34  ;;  %6617 = vmatprep.mubr.f32.mxu1 %v9622_v10 }
 0x8e5   :  { %7593 = vmatpush3.bf16.msra.mxu1 %v7590_v37  ;;  %6785 = vmatprep.mubr.f32.mxu0 %v9622_v10  ;;  %v3317_v37 = vld [vmem:[#allocation26 + $0x78] sm:$0xff] }
 0x8e6   :  { %7595 = vmatprep.subr.bf16.mxu1 %v7594_v63  ;;  %7689 = vmatpush3.bf16.msra.mxu0 %v7686_v46  ;;  %v7710_v46 = vpack.c.bf16 %v3805_v51, %v3804_v8  ;;  %v7618_v9 = vpack.c.bf16 %v3317_v37, %v3316_v15 }
 0x8e7   :  { %6618 = vmatmul.mubr.f32.gmra.mrb[98].mxu1 %v9625_v53  ;;  %7691 = vmatprep.subr.bf16.mxu0 %v7690_v55 }
 0x8e8   :  { %6786 = vmatmul.mubr.f32.gmra.mrb[112].mxu0 %v9625_v53  ;;  %6620 = vmatprep.mubr.f32.mxu1 %v9639_v59 }
 0x8e9   :  { %7597 = vmatpush3.bf16.msra.mxu1 %v7594_v63  ;;  %6788 = vmatprep.mubr.f32.mxu0 %v9639_v59  ;;  %v6510_v63 = vpop.f32.mrb[82].mxu0 }
 0x8ea   :  { %7599 = vmatprep.subr.bf16.mxu1 %v7598_v39  ;;  %7693 = vmatpush3.bf16.msra.mxu0 %v7690_v55  ;;  %v2661_v54 = vpop.f32.mrb[83].mxu0 }
 0x8eb   :  { %6621 = vmatmul.mubr.f32.gmra.mrb[100].mxu1 %v9642_v44  ;;  %7695 = vmatprep.subr.bf16.mxu0 %v7694_v28  ;;  %v6513_v36 = vpop.f32.mrb[84].mxu0  ;;  %v4300_v54 = vld [vmem:[#allocation25 + $0x10] sm:$0xff] }
 0x8ec   :  { %6789 = vmatmul.mubr.f32.gmra.mrb[114].mxu0 %v9642_v44  ;;  %6623 = vmatprep.mubr.f32.mxu1 %v9658_v21  ;;  %v2671_v55 = vpop.f32.mrb[85].mxu0  ;;  %v4301_v36 = vld [vmem:[#allocation25 + $0x18] sm:$0xff] }
 0x8ed   :  { %7601 = vmatpush3.bf16.msra.mxu1 %v7598_v39  ;;  %6791 = vmatprep.mubr.f32.mxu0 %v9658_v21  ;;  %v8111_v55 = vld [vmem:[#allocation8] sm:$0xff] }
 0x8ee   :  { %7603 = vmatprep.subr.bf16.mxu1 %v7602_v1  ;;  %7697 = vmatpush3.bf16.msra.mxu0 %v7694_v28  ;;  %v6516_v45 = vpop.f32.mrb[86].mxu0 }
 0x8ef   :  { %6624 = vmatmul.mubr.f32.gmra.mrb[102].mxu1 %v9661_v14  ;;  %7699 = vmatprep.subr.bf16.mxu0 %v7698_v20  ;;  %v2681_v33 = vpop.f32.mrb[87].mxu0 }
 0x8f0   :  { %6792 = vmatmul.mubr.f32.gmra.mrb[116].mxu0 %v9661_v14  ;;  %6626 = vmatprep.mubr.f32.mxu1 %v9675_v61 }
 0x8f1   :  { %7605 = vmatpush3.bf16.msra.mxu1 %v7602_v1  ;;  %6794 = vmatprep.mubr.f32.mxu0 %v9675_v61 }
 0x8f2   :  { %7607 = vmatprep.subr.bf16.mxu1 %v7606_v23  ;;  %7701 = vmatpush3.bf16.msra.mxu0 %v7698_v20  ;;  %v6519_v39 = vpop.f32.mrb[88].mxu0 }
 0x8f3   :  { %6627 = vmatmul.mubr.f32.gmra.mrb[104].mxu1 %v9678_v58  ;;  %7703 = vmatprep.subr.bf16.mxu0 %v7702_v27  ;;  %v2691_v29 = vpop.f32.mrb[89].mxu0  ;;  %v4302_v39 = vld [vmem:[#allocation25 + $0x20] sm:$0xff] }
 0x8f4   :  { %6795 = vmatmul.mubr.f32.gmra.mrb[118].mxu0 %v9678_v58  ;;  %6629 = vmatprep.mubr.f32.mxu1 %v9694_v16  ;;  %v4303_v29 = vld [vmem:[#allocation25 + $0x28] sm:$0xff] }
 0x8f5   :  { %7609 = vmatpush3.bf16.msra.mxu1 %v7606_v23  ;;  %6797 = vmatprep.mubr.f32.mxu0 %v9694_v16 }
 0x8f6   :  { %7611 = vmatprep.subr.bf16.mxu1 %v7610_v60  ;;  %7705 = vmatpush3.bf16.msra.mxu0 %v7702_v27  ;;  %v6522_v48 = vpop.f32.mrb[90].mxu0 }
 0x8f7   :  { %6630 = vmatmul.mubr.f32.gmra.mrb[106].mxu1 %v9697_v25  ;;  %7707 = vmatprep.subr.bf16.mxu0 %v7706_v30  ;;  %v2701_v28 = vpop.f32.mrb[91].mxu0  ;;  %v8112_v48 = vld [vmem:[#allocation8 + $0x8] sm:$0xff] }
 0x8f8   :  { %6798 = vmatmul.mubr.f32.gmra.mrb[120].mxu0 %v9697_v25  ;;  %6632 = vmatprep.mubr.f32.mxu1 %v9711_v22 }
 0x8f9   :  { %7613 = vmatpush3.bf16.msra.mxu1 %v7610_v60  ;;  %6800 = vmatprep.mubr.f32.mxu0 %v9711_v22 }
 0x8fa   :  { %7615 = vmatprep.subr.bf16.mxu1 %v7614_v4  ;;  %7709 = vmatpush3.bf16.msra.mxu0 %v7706_v30  ;;  %v6525_v0 = vpop.f32.mrb[92].mxu0 }
 0x8fb   :  { %6633 = vmatmul.mubr.f32.gmra.mrb[108].mxu1 %v9714_v62  ;;  %7711 = vmatprep.subr.bf16.mxu0 %v7710_v46  ;;  %v2711_v43 = vpop.f32.mrb[93].mxu0  ;;  %v8113_v0 = vld [vmem:[#allocation8 + $0x10] sm:$0xff] }
 0x8fc   :  { %6801 = vmatmul.mubr.f32.gmra.mrb[122].mxu0 %v9714_v62  ;;  %6635 = vmatprep.mubr.f32.mxu1 %v9728_v3 }
 0x8fd   :  { %7617 = vmatpush3.bf16.msra.mxu1 %v7614_v4  ;;  %6803 = vmatprep.mubr.f32.mxu0 %v9728_v3 }
 0x8fe   :  { %7619 = vmatprep.subr.bf16.mxu1 %v7618_v9  ;;  %7713 = vmatpush3.bf16.msra.mxu0 %v7710_v46 }
 0x8ff   :  { %6636 = vmatmul.mubr.f32.gmra.mrb[110].mxu1 %v9731_v13  ;;  %7715 = vmatprep.subr.bf16.mxu0 %v7714_v38 }
 0x900   :  { %6804 = vmatmul.mubr.f32.gmra.mrb[124].mxu0 %v9731_v13 }
 0x901   :  { %7621 = vmatpush3.bf16.msra.mxu1 %v7618_v9  ;;  %v4299_v9 = vld [vmem:[#allocation25 + $0x8] sm:$0xff] }
 0x902   :  { %7719 = vmatprep.subr.bf16.mxu1 %v9618_v2  ;;  %7717 = vmatpush3.bf16.msra.mxu0 %v7714_v38 }
 0x996   :  { %v6560_v1 = vpop.f32.mrb[80].mxu1  ;;  %v6728_v19 = vpop.f32.mrb[94].mxu0 }
 0x997   :  { %v3223_v12 = vpop.f32.mrb[81].mxu1  ;;  %v3713_v20 = vpop.f32.mrb[95].mxu0 }
 0x998   :  { %6670 = vmatprep.mubr.f32.mxu1 %v3223_v12  ;;  %6838 = vmatprep.mubr.f32.mxu0 %v3713_v20  ;;  %v4305_v12 = vld [vmem:[#allocation25 + $0x38] sm:$0xff] }
 0x999   :  { %6671 = vmatmul.mubr.f32.vlgmr.msra.gmra.mrb[96].mxu1 %v6560_v1  ;;  %6839 = vmatmul.mubr.f32.vlgmr.msra.gmra.mrb[126].mxu0 %v6728_v19  ;;  %v7758_v1 = vpack.c.bf16 %v4303_v29, %v4302_v39  ;;  %v4304_v19 = vld [vmem:[#allocation25 + $0x30] sm:$0xff]  ;;  %v4293_v39 = vld [vmem:[#allocation23 + $0x58] sm:$0xff] }
 0x99a   :  { %7721 = vmatpush3.bf16.msra.mxu1 %v9618_v2  ;;  %v6563_v32 = vpop.f32.mrb[82].mxu1  ;;  %v6731_v24 = vpop.f32.mrb[96].mxu0 }
 0x99b   :  { %7723 = vmatprep.subr.bf16.mxu1 %v9636_v41  ;;  %v3233_v23 = vpop.f32.mrb[83].mxu1  ;;  %v3723_v57 = vpop.f32.mrb[97].mxu0 }
 0x99c   :  { %6673 = vmatprep.mubr.f32.mxu1 %v3233_v23  ;;  %6841 = vmatprep.mubr.f32.mxu0 %v3723_v57  ;;  %v7762_v23 = vpack.c.bf16 %v4305_v12, %v4304_v19  ;;  %v4306_v57 = vld [vmem:[#allocation25 + $0x40] sm:$0xff]  ;;  %v4676_v12 = vld [vmem:[#allocation32 + $0x8] sm:$0xff] }
 0x99d   :  { %6674 = vmatmul.mubr.f32.gmra.mrb[112].mxu1 %v6563_v32  ;;  %6842 = vmatmul.mubr.f32.gmra.mrb[112].mxu0 %v6731_v24  ;;  %v8115_v32 = vld [vmem:[#allocation8 + $0x20] sm:$0xff] }
 0x99e   :  { %7725 = vmatpush3.bf16.msra.mxu1 %v9636_v41  ;;  %v6566_v7 = vpop.f32.mrb[84].mxu1  ;;  %v6734_v27 = vpop.f32.mrb[98].mxu0  ;;  %v4675_v19 = vld [vmem:[#allocation32] sm:$0xff] }
 0x99f   :  { %7727 = vmatprep.subr.bf16.mxu1 %v9654_v35  ;;  %v3243_v49 = vpop.f32.mrb[85].mxu1  ;;  %v3733_v42 = vpop.f32.mrb[99].mxu0 }
 0x9a0   :  { %6676 = vmatprep.mubr.f32.mxu1 %v3243_v49  ;;  %6844 = vmatprep.mubr.f32.mxu0 %v3733_v42  ;;  %v8117_v42 = vld [vmem:[#allocation8 + $0x30] sm:$0xff] }
 0x9a1   :  { %6677 = vmatmul.mubr.f32.gmra.mrb[114].mxu1 %v6566_v7  ;;  %6845 = vmatmul.mubr.f32.gmra.mrb[114].mxu0 %v6734_v27  ;;  %v4307_v7 = vld [vmem:[#allocation25 + $0x48] sm:$0xff] }
 0x9a2   :  { %7729 = vmatpush3.bf16.msra.mxu1 %v9654_v35  ;;  %v6569_v2 = vpop.f32.mrb[86].mxu1  ;;  %v6737_v60 = vpop.f32.mrb[100].mxu0  ;;  %v8116_v27 = vld [vmem:[#allocation8 + $0x28] sm:$0xff] }
 0x9a3   :  { %7731 = vmatprep.subr.bf16.mxu1 %v9672_v26  ;;  %v3253_v11 = vpop.f32.mrb[87].mxu1  ;;  %v3743_v6 = vpop.f32.mrb[101].mxu0 }
 0x9a4   :  { %6679 = vmatprep.mubr.f32.mxu1 %v3253_v11  ;;  %6847 = vmatprep.mubr.f32.mxu0 %v3743_v6  ;;  %v4308_v11 = vld [vmem:[#allocation25 + $0x50] sm:$0xff]  ;;  %v4309_v6 = vld [vmem:[#allocation25 + $0x58] sm:$0xff] }
 0x9a5   :  { %6680 = vmatmul.mubr.f32.gmra.mrb[116].mxu1 %v6569_v2  ;;  %6848 = vmatmul.mubr.f32.gmra.mrb[116].mxu0 %v6737_v60  ;;  %v7766_v60 = vpack.c.bf16 %v4307_v7, %v4306_v57  ;;  %v4680_v57 = vld [vmem:[#allocation32 + $0x28] sm:$0xff] }
 0x9a6   :  { %7733 = vmatpush3.bf16.msra.mxu1 %v9672_v26  ;;  %v6572_v41 = vpop.f32.mrb[88].mxu1  ;;  %v6740_v30 = vpop.f32.mrb[102].mxu0 }
 0x9a7   :  { %7735 = vmatprep.subr.bf16.mxu1 %v9690_v5  ;;  %v3263_v8 = vpop.f32.mrb[89].mxu1  ;;  %v3753_v51 = vpop.f32.mrb[103].mxu0 }
 0x9a8   :  { %6682 = vmatprep.mubr.f32.mxu1 %v3263_v8  ;;  %6850 = vmatprep.mubr.f32.mxu0 %v3753_v51  ;;  %v8119_v8 = vld [vmem:[#allocation8 + $0x40] sm:$0xff] }
 0x9a9   :  { %6683 = vmatmul.mubr.f32.gmra.mrb[118].mxu1 %v6572_v41  ;;  %6851 = vmatmul.mubr.f32.gmra.mrb[118].mxu0 %v6740_v30  ;;  %v8118_v41 = vld [vmem:[#allocation8 + $0x38] sm:$0xff] }
 0x9aa   :  { %7737 = vmatpush3.bf16.msra.mxu1 %v9690_v5  ;;  %v6575_v35 = vpop.f32.mrb[90].mxu1  ;;  %v6743_v4 = vpop.f32.mrb[104].mxu0  ;;  %v4298_v5 = vld [vmem:[#allocation25] sm:$0xff] }
 0x9ab   :  { %7739 = vmatprep.subr.bf16.mxu1 %v9708_v52  ;;  %v3273_v15 = vpop.f32.mrb[91].mxu1  ;;  %v3763_v37 = vpop.f32.mrb[105].mxu0  ;;  %v7750_v63 = vpack.c.bf16 %v4299_v9, %v4298_v5  ;;  %v4312_v5 = vld [vmem:[#allocation25 + $0x70] sm:$0xff]  ;;  %v4313_v9 = vld [vmem:[#allocation25 + $0x78] sm:$0xff] }
 0x9ac   :  { %6685 = vmatprep.mubr.f32.mxu1 %v3273_v15  ;;  %6853 = vmatprep.mubr.f32.mxu0 %v3763_v37  ;;  %v4311_v15 = vld [vmem:[#allocation25 + $0x68] sm:$0xff] }
 0x9ad   :  { %6686 = vmatmul.mubr.f32.gmra.mrb[120].mxu1 %v6575_v35  ;;  %6854 = vmatmul.mubr.f32.gmra.mrb[120].mxu0 %v6743_v4  ;;  %v7770_v35 = vpack.c.bf16 %v4309_v6, %v4308_v11  ;;  %v4310_v4 = vld [vmem:[#allocation25 + $0x60] sm:$0xff]  ;;  %v8120_v37 = vld [vmem:[#allocation8 + $0x48] sm:$0xff]  ;;  %v4685_v6 = vld [vmem:[#allocation32 + $0x50] sm:$0xff] }
 0x9ae   :  { %7741 = vmatpush3.bf16.msra.mxu1 %v9708_v52  ;;  %v6578_v26 = vpop.f32.mrb[92].mxu1  ;;  %v6746_v46 = vpop.f32.mrb[106].mxu0 }
 0x9af   :  { %7743 = vmatprep.subr.bf16.mxu1 %v9725_v40  ;;  %v3283_v47 = vpop.f32.mrb[93].mxu1  ;;  %v3773_v56 = vpop.f32.mrb[107].mxu0 }
 0x9b0   :  { %6688 = vmatprep.mubr.f32.mxu1 %v3283_v47  ;;  %6856 = vmatprep.mubr.f32.mxu0 %v3773_v56  ;;  %v7774_v56 = vpack.c.bf16 %v4311_v15, %v4310_v4 }
 0x9b1   :  { %6689 = vmatmul.mubr.f32.gmra.mrb[122].mxu1 %v6578_v26  ;;  %6857 = vmatmul.mubr.f32.gmra.mrb[122].mxu0 %v6746_v46  ;;  %v8121_v46 = vld [vmem:[#allocation8 + $0x50] sm:$0xff] }
 0x9b2   :  { %7745 = vmatpush3.bf16.msra.mxu1 %v9725_v40  ;;  %v6581_v17 = vpop.f32.mrb[94].mxu1  ;;  %v6749_v38 = vpop.f32.mrb[108].mxu0  ;;  %v7754_v40 = vpack.c.bf16 %v4301_v36, %v4300_v54  ;;  %v8124_v54 = vld [vmem:[#allocation8 + $0x68] sm:$0xff] }
 0x9b3   :  { %7747 = vmatprep.subr.bf16.mxu1 %v9739_v31  ;;  %v3293_v18 = vpop.f32.mrb[95].mxu1  ;;  %v3783_v52 = vpop.f32.mrb[109].mxu0 }
 0x9b4   :  { %6691 = vmatprep.mubr.f32.mxu1 %v3293_v18  ;;  %6859 = vmatprep.mubr.f32.mxu0 %v3783_v52  ;;  %v8123_v18 = vld [vmem:[#allocation8 + $0x60] sm:$0xff] }
 0x9b5   :  { %6692 = vmatmul.mubr.f32.gmra.mrb[124].mxu1 %v6581_v17  ;;  %6860 = vmatmul.mubr.f32.gmra.mrb[124].mxu0 %v6749_v38  ;;  %v8122_v17 = vld [vmem:[#allocation8 + $0x58] sm:$0xff] }
 0x9b6   :  { %7749 = vmatpush3.bf16.msra.mxu1 %v9739_v31  ;;  %6894 = vmatprep.mubr.f32.mxu1 %v8111_v55  ;;  %v8114_v31 = vld [vmem:[#allocation8 + $0x18] sm:$0xff]  ;;  %v8125_v55 = vld [vmem:[#allocation8 + $0x70] sm:$0xff] }
 0x9b7   :  { %v6784_v45 = vpop.f32.mrb[110].mxu0  ;;  %7751 = vmatprep.subr.bf16.mxu1 %v7750_v63 }
 0x9b8   :  { %v3890_v33 = vpop.f32.mrb[111].mxu0 }
 0x9b9   :  { %6895 = vmatmul.mubr.f32.vlgmr.msra.gmra.mrb[126].mxu1 %v8112_v48  ;;  %v4295_v48 = vld [vmem:[#allocation23 + $0x68] sm:$0xff] }
 0x9ba   :  { %v6619_v28 = vpop.f32.mrb[98].mxu1  ;;  %7753 = vmatpush3.bf16.msra.mxu1 %v7750_v63  ;;  %6897 = vmatprep.mubr.f32.mxu1 %v8113_v0  ;;  %v7778_v63 = vpack.c.bf16 %v4313_v9, %v4312_v5  ;;  %v4296_v0 = vld [vmem:[#allocation23 + $0x70] sm:$0xff] }
 0x9bb   :  { %v3410_v43 = vpop.f32.mrb[99].mxu1  ;;  %7755 = vmatprep.subr.bf16.mxu1 %v7754_v40 }
 0x9bc   :  { %v4297_v43 = vld [vmem:[#allocation23 + $0x78] sm:$0xff] }
 0x9bd   :  { %6898 = vmatmul.mubr.f32.gmra.mrb[128].mxu1 %v8114_v31  ;;  %v4677_v31 = vld [vmem:[#allocation32 + $0x10] sm:$0xff] }
 0x9be   :  { %v6622_v20 = vpop.f32.mrb[100].mxu1  ;;  %7757 = vmatpush3.bf16.msra.mxu1 %v7754_v40  ;;  %6900 = vmatprep.mubr.f32.mxu1 %v8115_v32  ;;  %v8126_v40 = vld [vmem:[#allocation8 + $0x78] sm:$0xff] }
 0x9bf   :  { %v3420_v24 = vpop.f32.mrb[101].mxu1  ;;  %7759 = vmatprep.subr.bf16.mxu1 %v7758_v1  ;;  %v7814_v20 = vpack.c.bf16 %v4676_v12, %v4675_v19  ;;  %v4678_v32 = vld [vmem:[#allocation32 + $0x18] sm:$0xff] }
 0x9c0   :  { %v7818_v24 = vpack.c.bf16 %v4678_v32, %v4677_v31 }
 0x9c1   :  { %6901 = vmatmul.mubr.f32.gmra.mrb[130].mxu1 %v8116_v27  ;;  %7815 = vmatprep.subr.bf16.mxu0 %v7814_v20  ;;  %v4681_v27 = vld [vmem:[#allocation32 + $0x30] sm:$0xff] }
 0x9c2   :  { %v6625_v49 = vpop.f32.mrb[102].mxu1  ;;  %7761 = vmatpush3.bf16.msra.mxu1 %v7758_v1  ;;  %6903 = vmatprep.mubr.f32.mxu1 %v8117_v42  ;;  %v7810_v1 = vpack.c.bf16 %v4297_v43, %v4296_v0 }
 0x9c3   :  { %v3430_v2 = vpop.f32.mrb[103].mxu1  ;;  %7763 = vmatprep.subr.bf16.mxu1 %v7762_v23  ;;  %7817 = vmatpush3.bf16.msra.mxu0 %v7814_v20  ;;  %v4682_v49 = vld [vmem:[#allocation32 + $0x38] sm:$0xff] }
 0x9c4   :  { %7819 = vmatprep.subr.bf16.mxu0 %v7818_v24  ;;  %v7826_v42 = vpack.c.bf16 %v4682_v49, %v4681_v27  ;;  %v4683_v2 = vld [vmem:[#allocation32 + $0x40] sm:$0xff] }
 0x9c5   :  { %6904 = vmatmul.mubr.f32.gmra.mrb[132].mxu1 %v8118_v41  ;;  %v4686_v41 = vld [vmem:[#allocation32 + $0x58] sm:$0xff] }
 0x9c6   :  { %v6628_v30 = vpop.f32.mrb[104].mxu1  ;;  %7765 = vmatpush3.bf16.msra.mxu1 %v7762_v23  ;;  %6906 = vmatprep.mubr.f32.mxu1 %v8119_v8  ;;  %v4679_v23 = vld [vmem:[#allocation32 + $0x20] sm:$0xff] }
 0x9c7   :  { %v3440_v51 = vpop.f32.mrb[105].mxu1  ;;  %7767 = vmatprep.subr.bf16.mxu1 %v7766_v60  ;;  %v7822_v7 = vpack.c.bf16 %v4680_v57, %v4679_v23  ;;  %7821 = vmatpush3.bf16.msra.mxu0 %v7818_v24  ;;  %v7834_v30 = vpack.c.bf16 %v4686_v41, %v4685_v6  ;;  %v4688_v6 = vld [vmem:[#allocation32 + $0x68] sm:$0xff] }
 0x9c9   :  { %6907 = vmatmul.mubr.f32.gmra.mrb[134].mxu1 %v8120_v37  ;;  %7823 = vmatprep.subr.bf16.mxu0 %v7822_v7 }
 0x9ca   :  { %v6631_v26 = vpop.f32.mrb[106].mxu1  ;;  %7769 = vmatpush3.bf16.msra.mxu1 %v7766_v60  ;;  %6909 = vmatprep.mubr.f32.mxu1 %v8121_v46  ;;  %v4684_v60 = vld [vmem:[#allocation32 + $0x48] sm:$0xff] }
 0x9cb   :  { %v3450_v47 = vpop.f32.mrb[107].mxu1  ;;  %7771 = vmatprep.subr.bf16.mxu1 %v7770_v35  ;;  %7825 = vmatpush3.bf16.msra.mxu0 %v7822_v7  ;;  %v7830_v11 = vpack.c.bf16 %v4684_v60, %v4683_v2 }
 0x9cc   :  { %7827 = vmatprep.subr.bf16.mxu0 %v7826_v42 }
 0x9cd   :  { %6910 = vmatmul.mubr.f32.gmra.mrb[136].mxu1 %v8122_v17 }
 0x9ce   :  { %v6634_v38 = vpop.f32.mrb[108].mxu1  ;;  %7773 = vmatpush3.bf16.msra.mxu1 %v7770_v35  ;;  %6912 = vmatprep.mubr.f32.mxu1 %v8123_v18 }
 0x9cf   :  { %v3460_v52 = vpop.f32.mrb[109].mxu1  ;;  %7775 = vmatprep.subr.bf16.mxu1 %v7774_v56  ;;  %7829 = vmatpush3.bf16.msra.mxu0 %v7826_v42 }
 0x9d0   :  { %7831 = vmatprep.subr.bf16.mxu0 %v7830_v11 }
 0x9d1   :  { %6913 = vmatmul.mubr.f32.gmra.mrb[138].mxu1 %v8124_v54 }
 0x9d2   :  { %v6637_v36 = vpop.f32.mrb[110].mxu1  ;;  %7777 = vmatpush3.bf16.msra.mxu1 %v7774_v56  ;;  %6915 = vmatprep.mubr.f32.mxu1 %v8125_v55 }
 0x9d3   :  { %v3470_v45 = vpop.f32.mrb[111].mxu1  ;;  %7779 = vmatprep.subr.bf16.mxu1 %v7778_v63  ;;  %7833 = vmatpush3.bf16.msra.mxu0 %v7830_v11  ;;  %v4687_v11 = vld [vmem:[#allocation32 + $0x60] sm:$0xff] }
 0x9d4   :  { %7835 = vmatprep.subr.bf16.mxu0 %v7834_v30  ;;  %v7838_v41 = vpack.c.bf16 %v4688_v6, %v4687_v11 }
 0x9d5   :  { %6916 = vmatmul.mubr.f32.gmra.mrb[140].mxu1 %v8126_v40 }
 0x9d6   :  { %7781 = vmatpush3.bf16.msra.mxu1 %v7778_v63  ;;  %6950 = vmatprep.mubr.f32.mxu1 %v9607_v50  ;;  %v4282_v50 = vld [vmem:[#allocation23] sm:$0xff] }
 0x9d7   :  { %7837 = vmatpush3.bf16.msra.mxu0 %v7834_v30  ;;  %v4689_v30 = vld [vmem:[#allocation32 + $0x70] sm:$0xff] }
 0x9d8   :  { %7839 = vmatprep.subr.bf16.mxu0 %v7838_v41 }
 0x9d9   :  { %6951 = vmatmul.mubr.f32.vlgmr.msra.gmra.mrb[96].mxu1 %v9610_v34  ;;  %v4283_v34 = vld [vmem:[#allocation23 + $0x8] sm:$0xff] }
 0x9da   :  { %6953 = vmatprep.mubr.f32.mxu1 %v9622_v10  ;;  %v7782_v10 = vpack.c.bf16 %v4283_v34, %v4282_v50 }
 0x9db   :  { %7841 = vmatpush3.bf16.msra.mxu0 %v7838_v41 }
 0x9dc   :  { %7783 = vmatprep.subr.bf16.mxu1 %v7782_v10 }
 0x9dd   :  { %6954 = vmatmul.mubr.f32.gmra.mrb[142].mxu1 %v9625_v53  ;;  %v4284_v53 = vld [vmem:[#allocation23 + $0x10] sm:$0xff] }
 0x9de   :  { %6956 = vmatprep.mubr.f32.mxu1 %v9639_v59  ;;  %v4285_v59 = vld [vmem:[#allocation23 + $0x18] sm:$0xff]  ;;  %7785 = vmatpush3.bf16.msra.mxu1 %v7782_v10 }
 0x9e1   :  { %6957 = vmatmul.mubr.f32.gmra.mrb[144].mxu1 %v9642_v44  ;;  %v7786_v44 = vpack.c.bf16 %v4285_v59, %v4284_v53 }
 0x9e2   :  { %6959 = vmatprep.mubr.f32.mxu1 %v9658_v21  ;;  %v4286_v21 = vld [vmem:[#allocation23 + $0x20] sm:$0xff] }
 0x9e3   :  { %7787 = vmatprep.subr.bf16.mxu1 %v7786_v44 }
 0x9e4   :  { %7789 = vmatpush3.bf16.msra.mxu1 %v7786_v44 }
 0x9e5   :  { %6960 = vmatmul.mubr.f32.gmra.mrb[146].mxu1 %v9661_v14  ;;  %v4287_v14 = vld [vmem:[#allocation23 + $0x28] sm:$0xff] }
 0x9e6   :  { %6962 = vmatprep.mubr.f32.mxu1 %v9675_v61  ;;  %v7790_v61 = vpack.c.bf16 %v4287_v14, %v4286_v21 }
 0x9e8   :  { %7791 = vmatprep.subr.bf16.mxu1 %v7790_v61 }
 0x9e9   :  { %6963 = vmatmul.mubr.f32.gmra.mrb[148].mxu1 %v9678_v58  ;;  %v4288_v58 = vld [vmem:[#allocation23 + $0x30] sm:$0xff] }
 0x9ea   :  { %6965 = vmatprep.mubr.f32.mxu1 %v9694_v16  ;;  %v4289_v16 = vld [vmem:[#allocation23 + $0x38] sm:$0xff]  ;;  %7793 = vmatpush3.bf16.msra.mxu1 %v7790_v61 }
 0x9ed   :  { %6966 = vmatmul.mubr.f32.gmra.mrb[150].mxu1 %v9697_v25  ;;  %v7794_v25 = vpack.c.bf16 %v4289_v16, %v4288_v58 }
 0x9ee   :  { %6968 = vmatprep.mubr.f32.mxu1 %v9711_v22  ;;  %v4290_v22 = vld [vmem:[#allocation23 + $0x40] sm:$0xff] }
 0x9ef   :  { %7795 = vmatprep.subr.bf16.mxu1 %v7794_v25 }
 0x9f0   :  { %7797 = vmatpush3.bf16.msra.mxu1 %v7794_v25 }
 0x9f1   :  { %6969 = vmatmul.mubr.f32.gmra.mrb[152].mxu1 %v9714_v62  ;;  %v4291_v62 = vld [vmem:[#allocation23 + $0x48] sm:$0xff] }
 0x9f2   :  { %6971 = vmatprep.mubr.f32.mxu1 %v9728_v3  ;;  %v7798_v33 = vpack.c.bf16 %v4291_v62, %v4290_v22  ;;  %v4292_v3 = vld [vmem:[#allocation23 + $0x50] sm:$0xff] }
 0x9f3   :  { %v7802_v29 = vpack.c.bf16 %v4293_v39, %v4292_v3 }
 0x9f4   :  { %7799 = vmatprep.subr.bf16.mxu1 %v7798_v33 }
 0x9f5   :  { %6972 = vmatmul.mubr.f32.gmra.mrb[154].mxu1 %v9731_v13  ;;  %v4294_v13 = vld [vmem:[#allocation23 + $0x60] sm:$0xff] }
 0x9f6   :  { %7801 = vmatpush3.bf16.msra.mxu1 %v7798_v33  ;;  %v7806_v28 = vpack.c.bf16 %v4295_v48, %v4294_v13 }
 0x9f7   :  { %7803 = vmatprep.subr.bf16.mxu1 %v7802_v29 }
 0x9fa   :  { %7805 = vmatpush3.bf16.msra.mxu1 %v7802_v29 }
 0x9fb   :  { %7807 = vmatprep.subr.bf16.mxu1 %v7806_v28 }
 0x9fe   :  { %7809 = vmatpush3.bf16.msra.mxu1 %v7806_v28 }
 0x9ff   :  { %7811 = vmatprep.subr.bf16.mxu1 %v7810_v1 }
 0xa02   :  { %7813 = vmatpush3.bf16.msra.mxu1 %v7810_v1 }
 0xa6c   :  { %v6840_v8 = vpop.f32.mrb[126].mxu0 }
 0xa6d   :  { %v4035_v51 = vpop.f32.mrb[127].mxu0  ;;  %v4690_v8 = vld [vmem:[#allocation32 + $0x78] sm:$0xff] }
 0xa6e   :  { %v7842_v51 = vpack.c.bf16 %v4690_v8, %v4689_v30 }
 0xa70   :  { %v6675_v35 = vpop.f32.mrb[112].mxu1  ;;  %v9809_v4 = vpop.f32.mrb[112].mxu0  ;;  %7843 = vmatprep.subr.bf16.mxu0 %v7842_v51 }
 0xa71   :  { %v3555_v15 = vpop.f32.mrb[113].mxu1  ;;  %v9811_v37 = vpop.f32.mrb[113].mxu0  ;;  %7845 = vmatpush3.bf16.msra.mxu0 %v7842_v51  ;;  %v4859_v35 = vld [vmem:[#allocation34] sm:$0xff] }
 0xa72   :  { %v4860_v15 = vld [vmem:[#allocation34 + $0x8] sm:$0xff] }
 0xa74   :  { %v6678_v26 = vpop.f32.mrb[114].mxu1  ;;  %v9813_v46 = vpop.f32.mrb[114].mxu0 }
 0xa75   :  { %v3565_v47 = vpop.f32.mrb[115].mxu1  ;;  %v9815_v56 = vpop.f32.mrb[115].mxu0  ;;  %v4861_v26 = vld [vmem:[#allocation34 + $0x10] sm:$0xff] }
 0xa76   :  { %v7846_v47 = vpack.c.bf16 %v4860_v15, %v4859_v35  ;;  %v4874_v35 = vld [vmem:[#allocation34 + $0x78] sm:$0xff] }
 0xa78   :  { %v6681_v5 = vpop.f32.mrb[116].mxu1  ;;  %v9817_v9 = vpop.f32.mrb[116].mxu0  ;;  %7847 = vmatprep.subr.bf16.mxu0 %v7846_v47  ;;  %7878 = vmatprep.subr.bf16.mxu1 %v7846_v47 }
 0xa79   :  { %v3575_v17 = vpop.f32.mrb[117].mxu1  ;;  %v9819_v38 = vpop.f32.mrb[117].mxu0  ;;  %v4862_v5 = vld [vmem:[#allocation34 + $0x18] sm:$0xff] }
 0xa7a   :  { %v7850_v17 = vpack.c.bf16 %v4862_v5, %v4861_v26  ;;  %v5116_v26 = vld [vmem:[%s9920_s10] ss:$0 sm:$0xff] }
 0xa7c   :  { %v6684_v18 = vpop.f32.mrb[118].mxu1  ;;  %v9821_v52 = vpop.f32.mrb[118].mxu0 }
 0xa7d   :  { %v3585_v63 = vpop.f32.mrb[119].mxu1  ;;  %v9823_v54 = vpop.f32.mrb[119].mxu0  ;;  %v4863_v18 = vld [vmem:[#allocation34 + $0x20] sm:$0xff] }
 0xa7e   :  { %v4864_v63 = vld [vmem:[#allocation34 + $0x28] sm:$0xff] }
 0xa80   :  { %v6687_v36 = vpop.f32.mrb[120].mxu1  ;;  %v9825_v55 = vpop.f32.mrb[120].mxu0 }
 0xa81   :  { %v3595_v45 = vpop.f32.mrb[121].mxu1  ;;  %v9827_v40 = vpop.f32.mrb[121].mxu0  ;;  %v7854_v36 = vpack.c.bf16 %v4864_v63, %v4863_v18 }
 0xa82   :  { %v4865_v45 = vld [vmem:[#allocation34 + $0x30] sm:$0xff] }
 0xa84   :  { %v6690_v50 = vpop.f32.mrb[122].mxu1  ;;  %v9829_v34 = vpop.f32.mrb[122].mxu0 }
 0xa85   :  { %v3605_v10 = vpop.f32.mrb[123].mxu1  ;;  %v9831_v53 = vpop.f32.mrb[123].mxu0  ;;  %v4866_v50 = vld [vmem:[#allocation34 + $0x38] sm:$0xff] }
 0xa86   :  { %v7858_v10 = vpack.c.bf16 %v4866_v50, %v4865_v45 }
 0xa88   :  { %v6693_v59 = vpop.f32.mrb[124].mxu1  ;;  %v9833_v44 = vpop.f32.mrb[124].mxu0 }
 0xa89   :  { %v3615_v21 = vpop.f32.mrb[125].mxu1  ;;  %v9835_v14 = vpop.f32.mrb[125].mxu0  ;;  %v4867_v59 = vld [vmem:[#allocation34 + $0x40] sm:$0xff] }
 0xa8a   :  { %v4868_v21 = vld [vmem:[#allocation34 + $0x48] sm:$0xff] }
 0xa8c   :  { %v6896_v61 = vpop.f32.mrb[126].mxu1 }
 0xa8d   :  { %v4203_v58 = vpop.f32.mrb[127].mxu1 }
 0xa8e   :  { %7006 = vmatprep.mubr.f32.mxu1 %v4203_v58  ;;  %v4869_v58 = vld [vmem:[#allocation34 + $0x50] sm:$0xff] }
 0xa8f   :  { %7007 = vmatmul.mubr.f32.vlgmr.msra.gmra.mrb[96].mxu1 %v6896_v61  ;;  %v9837_v61 = vpack.c.bf16 %v4868_v21, %v4867_v59 }
 0xa90   :  { %v6899_v16 = vpop.f32.mrb[128].mxu1  ;;  %7886 = vmatpush3.bf16.msra.mxu1 %v7846_v47 }
 0xa91   :  { %v4213_v25 = vpop.f32.mrb[129].mxu1  ;;  %7879 = vmatprep.subr.bf16.mxu1 %v7850_v17 }
 0xa92   :  { %7009 = vmatprep.mubr.f32.mxu1 %v4213_v25 }
 0xa93   :  { %7010 = vmatmul.mubr.f32.gmra.mrb[156].mxu1 %v6899_v16  ;;  %v4870_v16 = vld [vmem:[#allocation34 + $0x58] sm:$0xff] }
 0xa94   :  { %v6902_v22 = vpop.f32.mrb[130].mxu1  ;;  %7887 = vmatpush3.bf16.msra.mxu1 %v7850_v17  ;;  %v9840_v25 = vpack.c.bf16 %v4870_v16, %v4869_v58 }
 0xa95   :  { %v4223_v62 = vpop.f32.mrb[131].mxu1  ;;  %7880 = vmatprep.subr.bf16.mxu1 %v7854_v36 }
 0xa96   :  { %7012 = vmatprep.mubr.f32.mxu1 %v4223_v62  ;;  %v4872_v62 = vld [vmem:[#allocation34 + $0x68] sm:$0xff] }
 0xa97   :  { %7013 = vmatmul.mubr.f32.gmra.mrb[158].mxu1 %v6902_v22  ;;  %v4871_v22 = vld [vmem:[#allocation34 + $0x60] sm:$0xff] }
 0xa98   :  { %v6905_v33 = vpop.f32.mrb[132].mxu1  ;;  %7888 = vmatpush3.bf16.msra.mxu1 %v7854_v36 }
 0xa99   :  { %v4233_v3 = vpop.f32.mrb[133].mxu1  ;;  %7881 = vmatprep.subr.bf16.mxu1 %v7858_v10 }
 0xa9a   :  { %7015 = vmatprep.mubr.f32.mxu1 %v4233_v3  ;;  %v5113_v3 = vld [vmem:[%s9917_s6] ss:$0 sm:$0xff] }
 0xa9b   :  { %7016 = vmatmul.mubr.f32.gmra.mrb[160].mxu1 %v6905_v33  ;;  %v9844_v33 = vpack.c.bf16 %v4872_v62, %v4871_v22 }
 0xa9c   :  { %v6908_v39 = vpop.f32.mrb[134].mxu1  ;;  %7889 = vmatpush3.bf16.msra.mxu1 %v7858_v10 }
 0xa9d   :  { %v4243_v29 = vpop.f32.mrb[135].mxu1  ;;  %7882 = vmatprep.subr.bf16.mxu1 %v9837_v61 }
 0xa9e   :  { %7018 = vmatprep.mubr.f32.mxu1 %v4243_v29  ;;  %v5115_v29 = vld [vmem:[%s9918_s7] ss:$0 sm:$0xff] }
 0xa9f   :  { %7019 = vmatmul.mubr.f32.gmra.mrb[162].mxu1 %v6908_v39 }
 0xaa0   :  { %v6911_v13 = vpop.f32.mrb[136].mxu1  ;;  %7890 = vmatpush3.bf16.msra.mxu1 %v9837_v61 }
 0xaa1   :  { %v4253_v48 = vpop.f32.mrb[137].mxu1  ;;  %7883 = vmatprep.subr.bf16.mxu1 %v9840_v25 }
 0xaa2   :  { %7021 = vmatprep.mubr.f32.mxu1 %v4253_v48 }
 0xaa3   :  { %7022 = vmatmul.mubr.f32.gmra.mrb[164].mxu1 %v6911_v13 }
 0xaa4   :  { %v6914_v28 = vpop.f32.mrb[138].mxu1  ;;  %7891 = vmatpush3.bf16.msra.mxu1 %v9840_v25 }
 0xaa5   :  { %v4263_v0 = vpop.f32.mrb[139].mxu1  ;;  %7884 = vmatprep.subr.bf16.mxu1 %v9844_v33 }
 0xaa6   :  { %7024 = vmatprep.mubr.f32.mxu1 %v4263_v0 }
 0xaa7   :  { %7025 = vmatmul.mubr.f32.gmra.mrb[166].mxu1 %v6914_v28 }
 0xaa8   :  { %v6917_v43 = vpop.f32.mrb[140].mxu1  ;;  %7892 = vmatpush3.bf16.msra.mxu1 %v9844_v33 }
 0xaa9   :  { %v4273_v1 = vpop.f32.mrb[141].mxu1 }
 0xaaa   :  { %7027 = vmatprep.mubr.f32.mxu1 %v4273_v1 }
 0xaab   :  { %7028 = vmatmul.mubr.f32.gmra.mrb[168].mxu1 %v6917_v43 }
 0xab0   :  { %v6955_v19 = vpop.f32.mrb[142].mxu1 }
 0xab1   :  { %v4390_v12 = vpop.f32.mrb[143].mxu1  ;;  %v5114_v19 = vld [vmem:[%s9919_s30] ss:$0 sm:$0xff] }
 0xab4   :  { %v6958_v31 = vpop.f32.mrb[144].mxu1 }
 0xab5   :  { %v4400_v20 = vpop.f32.mrb[145].mxu1 }
 0xab8   :  { %v6961_v32 = vpop.f32.mrb[146].mxu1 }
 0xab9   :  { %v4410_v24 = vpop.f32.mrb[147].mxu1  ;;  %v4123_v32 = vadd.f32 %v5114_v19, %v9811_v37  ;;  %v4127_v37 = vadd.f32 %v5114_v19, %v9819_v38  ;;  %v4131_v38 = vadd.f32 %v5114_v19, %v9827_v40  ;;  %v4135_v40 = vadd.f32 %v5114_v19, %v9835_v14 }
 0xabc   :  { %v6964_v23 = vpop.f32.mrb[148].mxu1 }
 0xabd   :  { %v4420_v57 = vpop.f32.mrb[149].mxu1 }
 0xabe   :  { %v4124_v57 = vadd.f32 %v9809_v4, %v5114_v19  ;;  %v4128_v4 = vadd.f32 %v9817_v9, %v5114_v19  ;;  %v4132_v9 = vadd.f32 %v9825_v55, %v5114_v19  ;;  %v4136_v55 = vadd.f32 %v9833_v44, %v5114_v19 }
 0xac0   :  { %v6967_v7 = vpop.f32.mrb[150].mxu1 }
 0xac1   :  { %v4430_v27 = vpop.f32.mrb[151].mxu1  ;;  %v4125_v7 = vadd.f32 %v5114_v19, %v9815_v56  ;;  %v4129_v56 = vadd.f32 %v5114_v19, %v9823_v54  ;;  %v4133_v54 = vadd.f32 %v5114_v19, %v9831_v53  ;;  %v4873_v53 = vld [vmem:[#allocation34 + $0x70] sm:$0xff] }
 0xac2   :  { %v7874_v15 = vpack.c.bf16 %v4874_v35, %v4873_v53 }
 0xac4   :  { %v6970_v49 = vpop.f32.mrb[152].mxu1  ;;  %7885 = vmatprep.subr.bf16.mxu1 %v7874_v15 }
 0xac5   :  { %v4440_v42 = vpop.f32.mrb[153].mxu1  ;;  %7893 = vmatpush3.bf16.msra.mxu1 %v7874_v15 }
 0xac6   :  { %v4126_v42 = vadd.f32 %v9813_v46, %v5114_v19  ;;  %v4130_v46 = vadd.f32 %v9821_v52, %v5114_v19  ;;  %v4134_v52 = vadd.f32 %v9829_v34, %v5114_v19 }
 0xac8   :  { %v6973_v2 = vpop.f32.mrb[154].mxu1 }
 0xac9   :  { %v4450_v60 = vpop.f32.mrb[155].mxu1 }
 0xb62   :  { %v7008_v39 = vpop.f32.mrb[96].mxu1 }
 0xb63   :  { %v7894_v13 = vadd.f32 %v7008_v39, %v5113_v3  ;;  %v4525_v48 = vpop.f32.mrb[97].mxu1 }
 0xb64   :  { %v7896_v28 = vadd.f32 %v5113_v3, %v4525_v48 }
 0xb65   :  { %v7895_v0 = vadd.f32 %v7894_v13, %v5115_v29 }
 0xb66   :  { %v7897_v43 = vadd.f32 %v7896_v28, %v5115_v29  ;;  %v7011_v1 = vpop.f32.mrb[156].mxu1 }
 0xb67   :  { %v4535_v12 = vpop.f32.mrb[157].mxu1  ;;  %v4644_v20 = vmul.f32 0.5, %v7895_v0 }
 0xb68   :  { %v4643_v31 = vmul.f32 0.5, %v7897_v43 }
 0xb6a   :  { %7062 = vmatprep.mubr.f32.mxu0 %v4643_v31  ;;  %v7014_v24 = vpop.f32.mrb[158].mxu1 }
 0xb6b   :  { %7063 = vmatmul.mubr.f32.vlgmr.msra.gmra.mrb[128].mxu0 %v4644_v20  ;;  %v4545_v23 = vpop.f32.mrb[159].mxu1 }
 0xb6c   :  { %7065 = vmatprep.mubr.f32.mxu0 %v4123_v32  ;;  %7849 = vmatpush3.bf16.msra.mxu0 %v7846_v47 }
 0xb6d   :  { %7851 = vmatprep.subr.bf16.mxu0 %v7850_v17 }
 0xb6e   :  { %v7017_v27 = vpop.f32.mrb[160].mxu1 }
 0xb6f   :  { %7066 = vmatmul.mubr.f32.gmra.mrb[130].mxu0 %v4124_v57  ;;  %v4555_v49 = vpop.f32.mrb[161].mxu1 }
 0xb70   :  { %7068 = vmatprep.mubr.f32.mxu0 %v4125_v7  ;;  %7853 = vmatpush3.bf16.msra.mxu0 %v7850_v17 }
 0xb71   :  { %7855 = vmatprep.subr.bf16.mxu0 %v7854_v36 }
 0xb72   :  { %v7020_v2 = vpop.f32.mrb[162].mxu1 }
 0xb73   :  { %7069 = vmatmul.mubr.f32.gmra.mrb[132].mxu0 %v4126_v42  ;;  %v4565_v60 = vpop.f32.mrb[163].mxu1 }
 0xb74   :  { %7071 = vmatprep.mubr.f32.mxu0 %v4127_v37  ;;  %7857 = vmatpush3.bf16.msra.mxu0 %v7854_v36 }
 0xb75   :  { %7859 = vmatprep.subr.bf16.mxu0 %v7858_v10 }
 0xb76   :  { %v7023_v11 = vpop.f32.mrb[164].mxu1 }
 0xb77   :  { %7072 = vmatmul.mubr.f32.gmra.mrb[134].mxu0 %v4128_v4  ;;  %v4575_v6 = vpop.f32.mrb[165].mxu1 }
 0xb78   :  { %7074 = vmatprep.mubr.f32.mxu0 %v4129_v56  ;;  %7861 = vmatpush3.bf16.msra.mxu0 %v7858_v10  ;;  %v5117_v6 = vld [vmem:[%s8857_s21] ss:$0 sm:$0xff]  ;;  %s8693_s21 = smov [#allocation35]  }
 0xb79   :  { %7863 = vmatprep.subr.bf16.mxu0 %v9837_v61  ;;  %s5048_s5 = sshll.u32 %s8693_s21, 4  ;;  %s5049_s5 = int_to_ptr.vmem [resolvable:$true] %s5048_s5 }
 0xb7a   :  { %v7026_v41 = vpop.f32.mrb[166].mxu1  ;;  %s8589_s11 = scalar_lea.vmem %s5049_s5, 2048  ;;  %p8594_p1 = scmp.lt.s32.totalorder %s5049_s5, %s5049_s5 }
 0xb7b   :  { %7075 = vmatmul.mubr.f32.gmra.mrb[136].mxu0 %v4130_v46  ;;  %v4585_v30 = vpop.f32.mrb[167].mxu1  ;;  %p8590_p0 = scmp.ne.s32.totalorder %s5049_s5, %s8589_s11  ;;  %p8595_p2 = scmp.lt.s32.totalorder %s8589_s11, %s8589_s11 }
 0xb7c   :  { %7077 = vmatprep.mubr.f32.mxu0 %v4131_v38  ;;  %7865 = vmatpush3.bf16.msra.mxu0 %v9837_v61 }
 0xb7d   :  { %7867 = vmatprep.subr.bf16.mxu0 %v9840_v25  ;;  %p8596_p3 = por %p8595_p2, %p8594_p1 }
 0xb7e   :  { %v7029_v8 = vpop.f32.mrb[168].mxu1 }
 0xb7f   :  { %7078 = vmatmul.mubr.f32.gmra.mrb[138].mxu0 %v4132_v9  ;;  %v4595_v51 = vpop.f32.mrb[169].mxu1  ;;  %p8597_p4 = pnand %p8596_p3, %p8590_p0 }
 0xb80   :  { %7080 = vmatprep.mubr.f32.mxu0 %v4133_v54  ;;  %7869 = vmatpush3.bf16.msra.mxu0 %v9840_v25 }
 0xb81   :  { %7871 = vmatprep.subr.bf16.mxu0 %v9844_v33 }
 0xb83   :  { %7081 = vmatmul.mubr.f32.gmra.mrb[140].mxu0 %v4134_v52 }
 0xb84   :  { %7083 = vmatprep.mubr.f32.mxu0 %v4135_v40  ;;  %7873 = vmatpush3.bf16.msra.mxu0 %v9844_v33 }
 0xb85   :  { %7875 = vmatprep.subr.bf16.mxu0 %v7874_v15 }
 0xb87   :  { %7084 = vmatmul.mubr.f32.gmra.mrb[142].mxu0 %v4136_v55 }
 0xb88   :  { %7877 = vmatpush3.bf16.msra.mxu0 %v7874_v15 }
 0xc3e   :  { %v7064_v34 = vpop.f32.mrb[128].mxu0 }
 0xc3f   :  { %v4770_v47 = vadd.f32 %v7064_v34, %v5116_v26  ;;  %v4764_v5 = vpop.f32.mrb[129].mxu0 }
 0xc40   :  { %v4765_v17 = vadd.f32 %v5116_v26, %v4764_v5 }
 0xc41   :  { %v4844_v63 = vmax.f32 %v4770_v47, 0.0 }
 0xc42   :  { %v4843_v14 = vmax.f32 %v4765_v17, 0.0  ;;  %v7067_v18 = vpop.f32.mrb[130].mxu0 }
 0xc43   :  { %v4780_v36 = vadd.f32 %v7067_v18, %v5116_v26  ;;  %v4774_v45 = vpop.f32.mrb[131].mxu0 }
 0xc44   :  { %v4775_v50 = vadd.f32 %v5116_v26, %v4774_v45  ;;  %7118 = vmatprep.mubr.f32.mxu0 %v4843_v14 }
 0xc45   :  { %7119 = vmatmul.mubr.f32.vlgmr.msra.gmra.mrb[144].mxu0 %v4844_v63  ;;  %v4846_v59 = vmax.f32 %v4780_v36, 0.0 }
 0xc46   :  { %v4845_v44 = vmax.f32 %v4775_v50, 0.0  ;;  %v7070_v10 = vpop.f32.mrb[132].mxu0 }
 0xc47   :  { %v4790_v21 = vadd.f32 %v7070_v10, %v5116_v26  ;;  %v4784_v61 = vpop.f32.mrb[133].mxu0 }
 0xc48   :  { %v4785_v58 = vadd.f32 %v5116_v26, %v4784_v61  ;;  %7121 = vmatprep.mubr.f32.mxu0 %v4845_v44 }
 0xc49   :  { %7122 = vmatmul.mubr.f32.gmra.mrb[146].mxu0 %v4846_v59  ;;  %v4848_v22 = vmax.f32 %v4790_v21, 0.0 }
 0xc4a   :  { %v4847_v16 = vmax.f32 %v4785_v58, 0.0  ;;  %v7073_v25 = vpop.f32.mrb[134].mxu0 }
 0xc4b   :  { %v4800_v62 = vadd.f32 %v7073_v25, %v5116_v26  ;;  %v4794_v33 = vpop.f32.mrb[135].mxu0 }
 0xc4c   :  { %v4795_v3 = vadd.f32 %v5116_v26, %v4794_v33  ;;  %7124 = vmatprep.mubr.f32.mxu0 %v4847_v16 }
 0xc4d   :  { %7125 = vmatmul.mubr.f32.gmra.mrb[148].mxu0 %v4848_v22  ;;  %v4850_v13 = vmax.f32 %v4800_v62, 0.0 }
 0xc4e   :  { %v4849_v39 = vmax.f32 %v4795_v3, 0.0  ;;  %v7076_v29 = vpop.f32.mrb[136].mxu0 }
 0xc4f   :  { %v4810_v48 = vadd.f32 %v7076_v29, %v5116_v26  ;;  %v4804_v28 = vpop.f32.mrb[137].mxu0 }
 0xc50   :  { %v4805_v0 = vadd.f32 %v5116_v26, %v4804_v28  ;;  %7127 = vmatprep.mubr.f32.mxu0 %v4849_v39 }
 0xc51   :  { %7128 = vmatmul.mubr.f32.gmra.mrb[150].mxu0 %v4850_v13  ;;  %v4852_v19 = vmax.f32 %v4810_v48, 0.0 }
 0xc52   :  { %v4851_v43 = vmax.f32 %v4805_v0, 0.0  ;;  %v7079_v1 = vpop.f32.mrb[138].mxu0 }
 0xc53   :  { %v4820_v12 = vadd.f32 %v7079_v1, %v5116_v26  ;;  %v4814_v31 = vpop.f32.mrb[139].mxu0 }
 0xc54   :  { %v4815_v20 = vadd.f32 %v5116_v26, %v4814_v31  ;;  %7130 = vmatprep.mubr.f32.mxu1 %v4851_v43 }
 0xc55   :  { %7131 = vmatmul.mubr.f32.vlgmr.msra.gmra.mrb[170].mxu1 %v4852_v19  ;;  %v4854_v23 = vmax.f32 %v4820_v12, 0.0 }
 0xc56   :  { %v4853_v32 = vmax.f32 %v4815_v20, 0.0  ;;  %v7082_v24 = vpop.f32.mrb[140].mxu0 }
 0xc57   :  { %v4830_v57 = vadd.f32 %v7082_v24, %v5116_v26  ;;  %v4824_v7 = vpop.f32.mrb[141].mxu0 }
 0xc58   :  { %v4825_v27 = vadd.f32 %v5116_v26, %v4824_v7  ;;  %7133 = vmatprep.mubr.f32.mxu1 %v4853_v32 }
 0xc59   :  { %7134 = vmatmul.mubr.f32.gmra.mrb[172].mxu1 %v4854_v23  ;;  %v4856_v37 = vmax.f32 %v4830_v57, 0.0 }
 0xc5a   :  { %v4855_v49 = vmax.f32 %v4825_v27, 0.0  ;;  %v7085_v42 = vpop.f32.mrb[142].mxu0 }
 0xc5b   :  { %v4840_v2 = vadd.f32 %v7085_v42, %v5116_v26  ;;  %v4834_v60 = vpop.f32.mrb[143].mxu0 }
 0xc5c   :  { %v4835_v4 = vadd.f32 %v5116_v26, %v4834_v60  ;;  %7136 = vmatprep.mubr.f32.mxu1 %v4855_v49 }
 0xc5d   :  { %7137 = vmatmul.mubr.f32.gmra.mrb[174].mxu1 %v4856_v37  ;;  %v4858_v11 = vmax.f32 %v4840_v2, 0.0 }
 0xc5e   :  { %v4857_v56 = vmax.f32 %v4835_v4, 0.0 }
 0xc60   :  { %7139 = vmatprep.mubr.f32.mxu1 %v4857_v56 }
 0xc61   :  { %7140 = vmatmul.mubr.f32.gmra.mrb[176].mxu1 %v4858_v11 }
 0xd18   :  { %v7120_v46 = vpop.f32.mrb[144].mxu0 }
 0xd19   :  { %v4954_v38 = vadd.f32 %v7120_v46, %v5117_v6  ;;  %v4948_v41 = vpop.f32.mrb[145].mxu0 }
 0xd1a   :  { %v4949_v30 = vadd.f32 %v5117_v6, %v4948_v41 }
 0xd1b   :  { %5028 = vst [vmem:[#allocation35 + $0x8] sm:$0xff] %v4954_v38 }
 0xd1c   :  { %5027 = vst [vmem:[#allocation35] sm:$0xff] %v4949_v30  ;;  %v7123_v9 = vpop.f32.mrb[146].mxu0 }
 0xd1d   :  { %v4964_v54 = vadd.f32 %v7123_v9, %v5117_v6  ;;  %v4958_v8 = vpop.f32.mrb[147].mxu0 }
 0xd1e   :  { %v4959_v51 = vadd.f32 %v5117_v6, %v4958_v8 }
 0xd1f   :  { %5030 = vst [vmem:[#allocation35 + $0x18] sm:$0xff] %v4964_v54 }
 0xd20   :  { %5029 = vst [vmem:[#allocation35 + $0x10] sm:$0xff] %v4959_v51  ;;  %v7126_v52 = vpop.f32.mrb[148].mxu0 }
 0xd21   :  { %v4974_v40 = vadd.f32 %v7126_v52, %v5117_v6  ;;  %v4968_v55 = vpop.f32.mrb[149].mxu0 }
 0xd22   :  { %v4969_v53 = vadd.f32 %v5117_v6, %v4968_v55 }
 0xd23   :  { %5032 = vst [vmem:[#allocation35 + $0x28] sm:$0xff] %v4974_v40 }
 0xd24   :  { %5031 = vst [vmem:[#allocation35 + $0x20] sm:$0xff] %v4969_v53  ;;  %v7129_v35 = vpop.f32.mrb[150].mxu0 }
 0xd25   :  { %v4984_v15 = vadd.f32 %v7129_v35, %v5117_v6  ;;  %v4978_v26 = vpop.f32.mrb[151].mxu0 }
 0xd26   :  { %v4979_v34 = vadd.f32 %v5117_v6, %v4978_v26 }
 0xd27   :  { %5034 = vst [vmem:[#allocation35 + $0x38] sm:$0xff] %v4984_v15 }
 0xd28   :  { %5033 = vst [vmem:[#allocation35 + $0x30] sm:$0xff] %v4979_v34  ;;  %v7132_v47 = vpop.f32.mrb[170].mxu1 }
 0xd29   :  { %v4994_v5 = vadd.f32 %v7132_v47, %v5117_v6  ;;  %v4988_v17 = vpop.f32.mrb[171].mxu1 }
 0xd2a   :  { %v4989_v14 = vadd.f32 %v5117_v6, %v4988_v17 }
 0xd2b   :  { %5036 = vst [vmem:[#allocation35 + $0x48] sm:$0xff] %v4994_v5 }
 0xd2c   :  { %5035 = vst [vmem:[#allocation35 + $0x40] sm:$0xff] %v4989_v14  ;;  %v7135_v18 = vpop.f32.mrb[172].mxu1 }
 0xd2d   :  { %v5004_v63 = vadd.f32 %v7135_v18, %v5117_v6  ;;  %v4998_v36 = vpop.f32.mrb[173].mxu1 }
 0xd2e   :  { %v4999_v45 = vadd.f32 %v5117_v6, %v4998_v36 }
 0xd2f   :  { %5038 = vst [vmem:[#allocation35 + $0x58] sm:$0xff] %v5004_v63 }
 0xd30   :  { %5037 = vst [vmem:[#allocation35 + $0x50] sm:$0xff] %v4999_v45  ;;  %v7138_v50 = vpop.f32.mrb[174].mxu1 }
 0xd31   :  { %v5014_v44 = vadd.f32 %v7138_v50, %v5117_v6  ;;  %v5008_v10 = vpop.f32.mrb[175].mxu1 }
 0xd32   :  { %v5009_v59 = vadd.f32 %v5117_v6, %v5008_v10 }
 0xd33   :  { %5040 = vst [vmem:[#allocation35 + $0x68] sm:$0xff] %v5014_v44 }
 0xd34   :  { %5039 = vst [vmem:[#allocation35 + $0x60] sm:$0xff] %v5009_v59  ;;  %v7141_v21 = vpop.f32.mrb[176].mxu1 }
 0xd35   :  { %v5024_v61 = vadd.f32 %v7141_v21, %v5117_v6  ;;  %v5018_v58 = vpop.f32.mrb[177].mxu1 }
 0xd36   :  { %v5019_v16 = vadd.f32 %v5117_v6, %v5018_v58 }
 0xd37   :  { %5042 = vst [vmem:[#allocation35 + $0x78] sm:$0xff] %v5024_v61 }
 0xd38   :  { %5041 = vst [vmem:[#allocation35 + $0x70] sm:$0xff] %v5019_v16 }
 0xd39   :  { %8600 = shalt.err (!%p8597_p4)
}
 0xd3a   :  { %s8601_s15 = scalar_lea.hbm %s8872_s20, 2048 }
 0xd3b   :  { %p8602_p5 = scmp.ne.s32.totalorder %s8872_s20, %s8601_s15  ;;  %p8605_p6 = scmp.lt.u32.totalorder %s8601_s15, %s8872_s20 }
 0xd3d   :  { %p8607_p7 = pnand %p8605_p6, %p8602_p5 }
 0xd3f   :  { %8610 = shalt.err (!%p8607_p7)
}
 0xd40   :  { %5054 = dma.vmem_to_hbm [thread:$0]  %s5049_s5, 2048, %s8872_s20, [#allocation4], %s8671_s26, %s8671_s26, %s8672_s28  }
 0xd41   :  { %8633 = dma.done.wait [#allocation4], 2048  }
 0xd42   :  { %8634 = vsyncadd [#allocation4], 4294965248 }
 0xd43   :  { %5058 = vsyncpa [#allocation3], 1 }
 0xd44   :  { %5059 = vsyncpa [#allocation6], 1 }
 0xd45   :  { %5060 = vsyncpa [#allocation9], 1 }
 0xd46   :  { %5061 = vsyncpa [#allocation12], 1 }
 0xd47   :  { %5062 = vsyncpa [#allocation15], 1 }
 0xd48   :  { %5063 = vsyncpa [#allocation18], 1 }
 0xd49   :  { %5064 = vsyncpa [#allocation21], 1 }
 0xd4a   :  { %5065 = vsyncpa [#allocation24], 1 }
 0xd4b   :  { %5066 = vsyncpa [#allocation27], 1 }
 0xd4c   :  { %5067 = vsyncpa [#allocation30], 1 }
 0xd4d   :  { %5068 = vsyncpa [#allocation33], 1 }
 0xd4e   :  { %5069 = vsyncpa [#allocation4], 1 }

</bundles_post_ra>
